<compile_context>
chip_gen: v5e
topology: v5e:2x2
jax: 0.10.0
libtpu: 0.0.40
codegen_flags: <defaults>
</compile_context>

<pallas_src>
import functools

import numpy as np

import jax
import jax.numpy as jnp
from jax.experimental import pallas as pl
from jax.experimental.pallas import tpu as pltpu


# ----------------------- init-time weight preprocessing -----------------------

def conv2d_as_dense(w_oihw, b_o, H, W, stride=2, pad=1):
    """Lower a Conv2d(stride, pad) to an equivalent dense matrix D so that
    y_flat = x_flat @ D + b_rep, where x_flat / y_flat are NCHW row-major flattens.
    Pure one-time weight preprocessing (runs once at init, NOT in the forward path)."""
    w = np.asarray(w_oihw, np.float32)
    Cout, Cin, kh, kw = w.shape
    Ho = (H + 2 * pad - kh) // stride + 1
    Wo = (W + 2 * pad - kw) // stride + 1
    D = np.zeros((Cin * H * W, Cout * Ho * Wo), np.float32)
    for co in range(Cout):
        for ci in range(Cin):
            for di in range(kh):
                for dj in range(kw):
                    wv = w[co, ci, di, dj]
                    for oi in range(Ho):
                        ih = oi * stride - pad + di
                        if not (0 <= ih < H):
                            continue
                        for oj in range(Wo):
                            iw = oj * stride - pad + dj
                            if not (0 <= iw < W):
                                continue
                            D[ci * H * W + ih * W + iw,
                              co * Ho * Wo + oi * Wo + oj] = wv
    b_rep = np.repeat(np.asarray(b_o, np.float32), Ho * Wo)   # NCHW flatten: per-channel bias
    return jnp.asarray(D), jnp.asarray(b_rep), (Cout, Ho, Wo)


def _bias_layout(n1, n2, nl, nmu, hidden):
    """128-lane-aligned packing of all small per-call operands into one f32 buffer."""
    def up(n):
        return -(-n // 128) * 128
    o1 = 0
    o2 = o1 + up(n1)
    ol = o2 + up(n2)
    omu = ol + up(nl)
    ow = omu + up(nmu)
    ob = ow + up(hidden)
    total = ob + 128
    return {"b1": (o1, n1), "b2": (o2, n2), "blstm": (ol, nl), "bmu": (omu, nmu),
            "wout": (ow, hidden), "bout": (ob, 1), "total": total}


def init_params(key, C=3, H=16, W=16, latent=32, hidden=32):
    ks = jax.random.split(key, 11)

    def dense(k, shape, fan_in):
        return jax.random.normal(k, shape, jnp.float32) / np.sqrt(fan_in)

    c1, c2 = 8, 16
    conv1_w = dense(ks[0], (c1, C, 3, 3), 3 * 3 * C)          # torch layout (Cout,Cin,kh,kw)
    conv1_b = 0.1 * jax.random.normal(ks[1], (c1,), jnp.float32)
    conv2_w = dense(ks[2], (c2, c1, 3, 3), 3 * 3 * c1)
    conv2_b = 0.1 * jax.random.normal(ks[3], (c2,), jnp.float32)

    w1d, b1d, (_, Ho1, Wo1) = conv2d_as_dense(conv1_w, conv1_b, H, W)
    w2d, b2d, (_, Ho2, Wo2) = conv2d_as_dense(conv2_w, conv2_b, Ho1, Wo1)
    feat = c2 * Ho2 * Wo2                                      # NCHW flatten, matches torch .view(bs,-1)

    fcmu_w = dense(ks[4], (feat, latent), feat)
    fcmu_b = 0.1 * jax.random.normal(ks[5], (latent,), jnp.float32)

    # PyTorch LSTM gate order i, f, g, o; biases b_ih + b_hh are summed at init.
    w_ih = dense(ks[6], (latent, 4 * hidden), latent)
    w_hh = dense(ks[7], (hidden, 4 * hidden), hidden)
    b_lstm = 0.1 * jax.random.normal(ks[8], (4 * hidden,), jnp.float32)
    w_out = dense(ks[9], (hidden, 1), hidden)
    b_out = 0.1 * jax.random.normal(ks[10], (1,), jnp.float32)

    # Pack every small per-call operand (biases + fc_out row + fc_out bias) into ONE
    # 128-lane-aligned f32 buffer -> fewer input DMAs on a launch/DMA-latency-bound kernel.
    n1, n2, nl, nmu = w1d.shape[1], w2d.shape[1], 4 * hidden, latent
    lay = _bias_layout(n1, n2, nl, nmu, hidden)
    packed = np.zeros((1, lay["total"]), np.float32)
    for name, vec in (("b1", b1d), ("b2", b2d), ("bmu", fcmu_b), ("blstm", b_lstm),
                      ("wout", np.asarray(w_out).reshape(-1)), ("bout", b_out)):
        o, n = lay[name]
        packed[0, o:o + n] = np.asarray(vec).reshape(-1)

    bf16 = jnp.bfloat16
    return {
        # MXU matmul operands stored bf16 (native path, half the HBM/VMEM bytes)
        "w1d": w1d.astype(bf16),
        "w2d": w2d.astype(bf16),
        "wmu": fcmu_w.astype(bf16),
        "wih": w_ih.astype(bf16),          # (latent, 4H)
        "whh": w_hh.astype(bf16),          # (hidden, 4H)  kept separate from W_ih
        "bias": jnp.asarray(packed),       # (1, total) f32, 128-aligned segments
    }


# ------------------------------- Pallas kernel ---------------------------------

def _fused_kernel(x_ref, w1_ref, w2_ref, wmu_ref, wih_ref, whh_ref, b_ref, out_ref,
                  *, SB, T, hidden, boff):
    f32, bf16 = jnp.float32, jnp.bfloat16
    Hh = hidden

    # ---- static slices of the packed small-operand buffer (128-lane-aligned starts) ----
    o, n = boff["b1"];    b1    = b_ref[:, o:o + n]
    o, n = boff["b2"];    b2    = b_ref[:, o:o + n]
    o, n = boff["bmu"];   bmu   = b_ref[:, o:o + n]
    o, n = boff["blstm"]; blstm = b_ref[:, o:o + n]
    o, n = boff["wout"];  wout  = b_ref[:, o:o + n]            # (1, hidden) f32
    o, n = boff["bout"];  bout  = b_ref[:, o:o + n]            # (1, 1) f32

    # ---- encoder (conv1+ReLU, conv2+ReLU as dense matmuls) + fc_mu, all T*SB rows at once ----
    x = x_ref[0]                                               # (T*SB, C*H*W) bf16, time-major rows
    h1 = jnp.maximum(jnp.dot(x, w1_ref[...], preferred_element_type=f32) + b1, 0.0)
    h2 = jnp.maximum(jnp.dot(h1.astype(bf16), w2_ref[...], preferred_element_type=f32) + b2, 0.0)
    mu = jnp.dot(h2.astype(bf16), wmu_ref[...], preferred_element_type=f32) + bmu   # (T*SB, latent)

    # ---- LSTM: input projection hoisted out of the recurrence (one matmul for all steps) ----
    xproj = jnp.dot(mu.astype(bf16), wih_ref[...], preferred_element_type=f32) + blstm  # (T*SB, 4H)
    whh = whh_ref[...]                                          # (hidden, 4H) bf16

    # loop-invariant g-gate lane mask, hoisted (JAX does not CSE iota/broadcast in a loop)
    lane = jax.lax.broadcasted_iota(jnp.int32, (SB, 4 * Hh), 1)
    is_g = jnp.logical_and(lane >= 2 * Hh, lane < 3 * Hh)

    h = jnp.zeros((SB, Hh), f32)
    c = jnp.zeros((SB, Hh), f32)
    for t in range(T):                                          # T static -> fully unrolled
        # time-major layout: timestep t is one contiguous static sublane slice
        gates = xproj[t * SB:(t + 1) * SB, :] + jnp.dot(h.astype(bf16), whh,
                                                        preferred_element_type=f32)   # (SB, 4H)
        # full-width nonlinearity (one sigmoid + one tanh pass over the whole vreg),
        # lane-mask select for the g gate; lane slices are cheap XLU work -- keep as is.
        act = jnp.where(is_g, jnp.tanh(gates), jax.nn.sigmoid(gates))
        i_g = act[:, 0 * Hh:1 * Hh]
        f_g = act[:, 1 * Hh:2 * Hh]
        g_g = act[:, 2 * Hh:3 * Hh]
        o_g = act[:, 3 * Hh:4 * Hh]
        c = f_g * c + i_g * g_g
        h = o_g * jnp.tanh(c)

    # ---- fc_out head: N=1, so VPU multiply + lane reduction instead of an MXU push/pop ----
    bp = jnp.sum(h * wout, axis=-1, keepdims=True) + bout       # (SB, 1)
    out_ref[0] = bp.astype(out_ref.dtype)


# --------------------------------- wrapper --------------------------------------

def vae_lstm_forward(params, x, *, seq_block=None):
    """x: [B, C, H, W, T] (PyTorch convention). Returns BP prediction (B, 1) f32."""
    B, C, H, W, T = x.shape
    CHW = C * H * W

    n1 = params["w1d"].shape[1]
    n2 = params["w2d"].shape[1]
    nmu = params["wmu"].shape[1]
    nl = params["wih"].shape[1]
    hidden = nl // 4
    boff = _bias_layout(n1, n2, nl, nmu, hidden)

    # sequence-block size: keep >=2 grid steps when possible (v7x megacore), cap at 8
    if seq_block is None:
        SB = max(1, min(8, B // 2))
    else:
        SB = max(1, min(int(seq_block), B))
    nb = -(-B // SB)
    Bp = nb * SB

    # EXACT torch semantics: forward() does x.reshape(B*T, C, H, W) on the [B,C,H,W,T]
    # tensor -- a raw row-major reinterpretation.  Row b*T+t of that view flattened over
    # (C,H,W) is exactly element (b, t, :) of the reshape below.  bf16 halves input DMA bytes.
    x_flat = jnp.reshape(x, (B, T, CHW)).astype(jnp.bfloat16)
    if Bp != B:
        x_flat = jnp.pad(x_flat, ((0, Bp - B), (0, 0), (0, 0)))
    # Time-major within each sequence block: in-block row index = t*SB + b, so every LSTM
    # step reads one contiguous static slice (no per-step gathers/concats on the serial path).
    x_tm = (x_flat.reshape(nb, SB, T, CHW)
                  .transpose(0, 2, 1, 3)
                  .reshape(nb, T * SB, CHW))

    def resident(a):
        # full-array block, constant index_map -> stays VMEM-resident across grid steps
        z = (0,) * a.ndim
        return pl.BlockSpec(a.shape, lambda i, z=z: z)

    kernel = functools.partial(_fused_kernel, SB=SB, T=T, hidden=hidden, boff=boff)
    out = pl.pallas_call(
        kernel,
        out_shape=jax.ShapeDtypeStruct((nb, SB, 1), jnp.float32),
        grid=(nb,),
        in_specs=[pl.BlockSpec((1, T * SB, CHW), lambda i: (i, 0, 0)),
                  resident(params["w1d"]), resident(params["w2d"]),
                  resident(params["wmu"]), resident(params["wih"]),
                  resident(params["whh"]), resident(params["bias"])],
        out_specs=pl.BlockSpec((1, SB, 1), lambda i: (i, 0, 0)),
        compiler_params=pltpu.CompilerParams(dimension_semantics=("parallel",)),
    )(x_tm, params["w1d"], params["w2d"], params["wmu"],
      params["wih"], params["whh"], params["bias"])

    return out.reshape(Bp, 1)[:B]


if __name__ == "__main__":
    key = jax.random.PRNGKey(0)
    kx, kp = jax.random.split(key)

    B, C, H, W, T = 2, 3, 16, 16, 8
    x = jax.random.normal(kx, (B, C, H, W, T), jnp.float32)
    params = init_params(kp, C=C, H=H, W=W, latent=32, hidden=32)

    bp = jax.jit(vae_lstm_forward)(params, x)
    bp = jax.block_until_ready(bp)
    assert bp.shape == (B, 1) and bp.dtype == jnp.float32
    assert bool(jnp.all(jnp.isfinite(bp)))
    print("KERNEL_OK")
</pallas_src>

<mosaic_0001>
module attributes {stable_mosaic.version = 11 : i64} {
  func.func @_fused_kernel(%arg0: i32, %arg1: memref<1x8x768xbf16, #tpu.memory_space<vmem>>, %arg2: memref<768x512xbf16, #tpu.memory_space<vmem>>, %arg3: memref<512x256xbf16, #tpu.memory_space<vmem>>, %arg4: memref<256x32xbf16, #tpu.memory_space<vmem>>, %arg5: memref<32x128xbf16, #tpu.memory_space<vmem>>, %arg6: memref<32x128xbf16, #tpu.memory_space<vmem>>, %arg7: memref<1x1280xf32, #tpu.memory_space<vmem>>, %arg8: memref<1x1x1xf32, #tpu.memory_space<vmem>>) attributes {dimension_semantics = [#tpu.dimension_semantics<parallel>], iteration_bounds = array<i64: 2>, scalar_prefetch = 0 : i64, scratch_operands = 0 : i64, tpu.core_type = #tpu.core_type<tc>, window_params = [{transform_indices = @transform_0, window_bounds = array<i64: 1, 8, 768>}, {pipeline_mode = #tpu.pipeline_mode<synchronous>, transform_indices = @transform_1, window_bounds = array<i64: 768, 512>}, {pipeline_mode = #tpu.pipeline_mode<synchronous>, transform_indices = @transform_2, window_bounds = array<i64: 512, 256>}, {pipeline_mode = #tpu.pipeline_mode<synchronous>, transform_indices = @transform_3, window_bounds = array<i64: 256, 32>}, {pipeline_mode = #tpu.pipeline_mode<synchronous>, transform_indices = @transform_4, window_bounds = array<i64: 32, 128>}, {pipeline_mode = #tpu.pipeline_mode<synchronous>, transform_indices = @transform_5, window_bounds = array<i64: 32, 128>}, {pipeline_mode = #tpu.pipeline_mode<synchronous>, transform_indices = @transform_6, window_bounds = array<i64: 1, 1280>}, {transform_indices = @transform_7, window_bounds = array<i64: 1, 1, 1>}]} {
    %c0 = arith.constant 0 : index
    %c0_0 = arith.constant 0 : index
    %0 = vector.load %arg7[%c0, %c0_0] : memref<1x1280xf32, #tpu.memory_space<vmem>>, vector<1x512xf32>
    %c0_1 = arith.constant 0 : index
    %c512 = arith.constant 512 : index
    %1 = vector.load %arg7[%c0_1, %c512] : memref<1x1280xf32, #tpu.memory_space<vmem>>, vector<1x256xf32>
    %c0_2 = arith.constant 0 : index
    %c896 = arith.constant 896 : index
    %2 = vector.load %arg7[%c0_2, %c896] : memref<1x1280xf32, #tpu.memory_space<vmem>>, vector<1x32xf32>
    %c0_3 = arith.constant 0 : index
    %c768 = arith.constant 768 : index
    %3 = vector.load %arg7[%c0_3, %c768] : memref<1x1280xf32, #tpu.memory_space<vmem>>, vector<1x128xf32>
    %c0_4 = arith.constant 0 : index
    %c1024 = arith.constant 1024 : index
    %4 = vector.load %arg7[%c0_4, %c1024] : memref<1x1280xf32, #tpu.memory_space<vmem>>, vector<1x32xf32>
    %c0_5 = arith.constant 0 : index
    %c1152 = arith.constant 1152 : index
    %5 = vector.load %arg7[%c0_5, %c1152] : memref<1x1280xf32, #tpu.memory_space<vmem>>, vector<1x1xf32>
    %c0_6 = arith.constant 0 : index
    %c0_7 = arith.constant 0 : index
    %c0_8 = arith.constant 0 : index
    %6 = vector.load %arg1[%c0_6, %c0_7, %c0_8] : memref<1x8x768xbf16, #tpu.memory_space<vmem>>, vector<1x8x768xbf16>
    %7 = vector.shape_cast %6 : vector<1x8x768xbf16> to vector<8x768xbf16>
    %c0_9 = arith.constant 0 : index
    %c0_10 = arith.constant 0 : index
    %8 = vector.load %arg2[%c0_9, %c0_10] : memref<768x512xbf16, #tpu.memory_space<vmem>>, vector<768x512xbf16>
    %cst = arith.constant dense<0.000000e+00> : vector<8x512xf32>
    %9 = tpu.matmul %7, %8, %cst {dimension_numbers = #tpu.dot_dimension_numbers<[1], [0], [0], [1], [0, 0, 1, 1], [], []>} : vector<8x768xbf16>, vector<768x512xbf16>, vector<8x512xf32> -> vector<8x512xf32>
    %10 = vector.broadcast %0 : vector<1x512xf32> to vector<8x512xf32>
    %11 = arith.addf %9, %10 : vector<8x512xf32>
    %cst_11 = arith.constant 0.000000e+00 : f32
    %12 = vector.broadcast %cst_11 : f32 to vector<8x512xf32>
    %13 = arith.maximumf %11, %12 : vector<8x512xf32>
    %14 = arith.truncf %13 : vector<8x512xf32> to vector<8x512xbf16>
    %c0_12 = arith.constant 0 : index
    %c0_13 = arith.constant 0 : index
    %15 = vector.load %arg3[%c0_12, %c0_13] : memref<512x256xbf16, #tpu.memory_space<vmem>>, vector<512x256xbf16>
    %cst_14 = arith.constant dense<0.000000e+00> : vector<8x256xf32>
    %16 = tpu.matmul %14, %15, %cst_14 {dimension_numbers = #tpu.dot_dimension_numbers<[1], [0], [0], [1], [0, 0, 1, 1], [], []>} : vector<8x512xbf16>, vector<512x256xbf16>, vector<8x256xf32> -> vector<8x256xf32>
    %17 = vector.broadcast %1 : vector<1x256xf32> to vector<8x256xf32>
    %18 = arith.addf %16, %17 : vector<8x256xf32>
    %cst_15 = arith.constant 0.000000e+00 : f32
    %19 = vector.broadcast %cst_15 : f32 to vector<8x256xf32>
    %20 = arith.maximumf %18, %19 : vector<8x256xf32>
    %21 = arith.truncf %20 : vector<8x256xf32> to vector<8x256xbf16>
    %c0_16 = arith.constant 0 : index
    %c0_17 = arith.constant 0 : index
    %22 = vector.load %arg4[%c0_16, %c0_17] : memref<256x32xbf16, #tpu.memory_space<vmem>>, vector<256x32xbf16>
    %cst_18 = arith.constant dense<0.000000e+00> : vector<8x32xf32>
    %23 = tpu.matmul %21, %22, %cst_18 {dimension_numbers = #tpu.dot_dimension_numbers<[1], [0], [0], [1], [0, 0, 1, 1], [], []>} : vector<8x256xbf16>, vector<256x32xbf16>, vector<8x32xf32> -> vector<8x32xf32>
    %24 = vector.broadcast %2 : vector<1x32xf32> to vector<8x32xf32>
    %25 = arith.addf %23, %24 : vector<8x32xf32>
    %26 = arith.truncf %25 : vector<8x32xf32> to vector<8x32xbf16>
    %c0_19 = arith.constant 0 : index
    %c0_20 = arith.constant 0 : index
    %27 = vector.load %arg5[%c0_19, %c0_20] : memref<32x128xbf16, #tpu.memory_space<vmem>>, vector<32x128xbf16>
    %cst_21 = arith.constant dense<0.000000e+00> : vector<8x128xf32>
    %28 = tpu.matmul %26, %27, %cst_21 {dimension_numbers = #tpu.dot_dimension_numbers<[1], [0], [0], [1], [0, 0, 1, 1], [], []>} : vector<8x32xbf16>, vector<32x128xbf16>, vector<8x128xf32> -> vector<8x128xf32>
    %29 = vector.broadcast %3 : vector<1x128xf32> to vector<8x128xf32>
    %30 = arith.addf %28, %29 : vector<8x128xf32>
    %c0_22 = arith.constant 0 : index
    %c0_23 = arith.constant 0 : index
    %31 = vector.load %arg6[%c0_22, %c0_23] : memref<32x128xbf16, #tpu.memory_space<vmem>>, vector<32x128xbf16>
    %32 = tpu.iota {dimensions = array<i32: 1>} : vector<1x128xi32>
    %c64_i32 = arith.constant 64 : i32
    %33 = vector.broadcast %c64_i32 : i32 to vector<1x128xi32>
    %34 = arith.cmpi sge, %32, %33 : vector<1x128xi32>
    %c96_i32 = arith.constant 96 : i32
    %35 = vector.broadcast %c96_i32 : i32 to vector<1x128xi32>
    %36 = arith.cmpi slt, %32, %35 : vector<1x128xi32>
    %37 = arith.andi %34, %36 : vector<1x128xi1>
    %cst_24 = arith.constant 0.000000e+00 : f32
    %38 = vector.broadcast %cst_24 : f32 to vector<1x32xf32>
    %cst_25 = arith.constant 0.000000e+00 : f32
    %39 = vector.broadcast %cst_25 : f32 to vector<1x32xf32>
    %40 = vector.extract_strided_slice %30 {offsets = [0, 0], sizes = [1, 128], strides = [1, 1]} : vector<8x128xf32> to vector<1x128xf32>
    %41 = arith.truncf %38 : vector<1x32xf32> to vector<1x32xbf16>
    %cst_26 = arith.constant dense<0.000000e+00> : vector<1x128xf32>
    %42 = tpu.matmul %41, %31, %cst_26 {dimension_numbers = #tpu.dot_dimension_numbers<[1], [0], [0], [1], [0, 0, 1, 1], [], []>} : vector<1x32xbf16>, vector<32x128xbf16>, vector<1x128xf32> -> vector<1x128xf32>
    %43 = arith.addf %40, %42 : vector<1x128xf32>
    %44 = math.tanh %43 : vector<1x128xf32>
    %45 = arith.negf %43 : vector<1x128xf32>
    %46 = math.exp %45 : vector<1x128xf32>
    %cst_27 = arith.constant 1.000000e+00 : f32
    %47 = vector.broadcast %cst_27 : f32 to vector<1x128xf32>
    %48 = arith.addf %47, %46 : vector<1x128xf32>
    %49 = arith.divf %47, %48 : vector<1x128xf32>
    %50 = arith.select %37, %44, %49 : vector<1x128xi1>, vector<1x128xf32>
    %51 = vector.extract_strided_slice %50 {offsets = [0, 0], sizes = [1, 32], strides = [1, 1]} : vector<1x128xf32> to vector<1x32xf32>
    %52 = vector.extract_strided_slice %50 {offsets = [0, 32], sizes = [1, 32], strides = [1, 1]} : vector<1x128xf32> to vector<1x32xf32>
    %53 = vector.extract_strided_slice %50 {offsets = [0, 64], sizes = [1, 32], strides = [1, 1]} : vector<1x128xf32> to vector<1x32xf32>
    %54 = vector.extract_strided_slice %50 {offsets = [0, 96], sizes = [1, 32], strides = [1, 1]} : vector<1x128xf32> to vector<1x32xf32>
    %55 = arith.mulf %52, %39 : vector<1x32xf32>
    %56 = arith.mulf %51, %53 : vector<1x32xf32>
    %57 = arith.addf %55, %56 : vector<1x32xf32>
    %58 = math.tanh %57 : vector<1x32xf32>
    %59 = arith.mulf %54, %58 : vector<1x32xf32>
    %60 = vector.extract_strided_slice %30 {offsets = [1, 0], sizes = [1, 128], strides = [1, 1]} : vector<8x128xf32> to vector<1x128xf32>
    %61 = arith.truncf %59 : vector<1x32xf32> to vector<1x32xbf16>
    %cst_28 = arith.constant dense<0.000000e+00> : vector<1x128xf32>
    %62 = tpu.matmul %61, %31, %cst_28 {dimension_numbers = #tpu.dot_dimension_numbers<[1], [0], [0], [1], [0, 0, 1, 1], [], []>} : vector<1x32xbf16>, vector<32x128xbf16>, vector<1x128xf32> -> vector<1x128xf32>
    %63 = arith.addf %60, %62 : vector<1x128xf32>
    %64 = math.tanh %63 : vector<1x128xf32>
    %65 = arith.negf %63 : vector<1x128xf32>
    %66 = math.exp %65 : vector<1x128xf32>
    %cst_29 = arith.constant 1.000000e+00 : f32
    %67 = vector.broadcast %cst_29 : f32 to vector<1x128xf32>
    %68 = arith.addf %67, %66 : vector<1x128xf32>
    %69 = arith.divf %67, %68 : vector<1x128xf32>
    %70 = arith.select %37, %64, %69 : vector<1x128xi1>, vector<1x128xf32>
    %71 = vector.extract_strided_slice %70 {offsets = [0, 0], sizes = [1, 32], strides = [1, 1]} : vector<1x128xf32> to vector<1x32xf32>
    %72 = vector.extract_strided_slice %70 {offsets = [0, 32], sizes = [1, 32], strides = [1, 1]} : vector<1x128xf32> to vector<1x32xf32>
    %73 = vector.extract_strided_slice %70 {offsets = [0, 64], sizes = [1, 32], strides = [1, 1]} : vector<1x128xf32> to vector<1x32xf32>
    %74 = vector.extract_strided_slice %70 {offsets = [0, 96], sizes = [1, 32], strides = [1, 1]} : vector<1x128xf32> to vector<1x32xf32>
    %75 = arith.mulf %72, %57 : vector<1x32xf32>
    %76 = arith.mulf %71, %73 : vector<1x32xf32>
    %77 = arith.addf %75, %76 : vector<1x32xf32>
    %78 = math.tanh %77 : vector<1x32xf32>
    %79 = arith.mulf %74, %78 : vector<1x32xf32>
    %80 = vector.extract_strided_slice %30 {offsets = [2, 0], sizes = [1, 128], strides = [1, 1]} : vector<8x128xf32> to vector<1x128xf32>
    %81 = arith.truncf %79 : vector<1x32xf32> to vector<1x32xbf16>
    %cst_30 = arith.constant dense<0.000000e+00> : vector<1x128xf32>
    %82 = tpu.matmul %81, %31, %cst_30 {dimension_numbers = #tpu.dot_dimension_numbers<[1], [0], [0], [1], [0, 0, 1, 1], [], []>} : vector<1x32xbf16>, vector<32x128xbf16>, vector<1x128xf32> -> vector<1x128xf32>
    %83 = arith.addf %80, %82 : vector<1x128xf32>
    %84 = math.tanh %83 : vector<1x128xf32>
    %85 = arith.negf %83 : vector<1x128xf32>
    %86 = math.exp %85 : vector<1x128xf32>
    %cst_31 = arith.constant 1.000000e+00 : f32
    %87 = vector.broadcast %cst_31 : f32 to vector<1x128xf32>
    %88 = arith.addf %87, %86 : vector<1x128xf32>
    %89 = arith.divf %87, %88 : vector<1x128xf32>
    %90 = arith.select %37, %84, %89 : vector<1x128xi1>, vector<1x128xf32>
    %91 = vector.extract_strided_slice %90 {offsets = [0, 0], sizes = [1, 32], strides = [1, 1]} : vector<1x128xf32> to vector<1x32xf32>
    %92 = vector.extract_strided_slice %90 {offsets = [0, 32], sizes = [1, 32], strides = [1, 1]} : vector<1x128xf32> to vector<1x32xf32>
    %93 = vector.extract_strided_slice %90 {offsets = [0, 64], sizes = [1, 32], strides = [1, 1]} : vector<1x128xf32> to vector<1x32xf32>
    %94 = vector.extract_strided_slice %90 {offsets = [0, 96], sizes = [1, 32], strides = [1, 1]} : vector<1x128xf32> to vector<1x32xf32>
    %95 = arith.mulf %92, %77 : vector<1x32xf32>
    %96 = arith.mulf %91, %93 : vector<1x32xf32>
    %97 = arith.addf %95, %96 : vector<1x32xf32>
    %98 = math.tanh %97 : vector<1x32xf32>
    %99 = arith.mulf %94, %98 : vector<1x32xf32>
    %100 = vector.extract_strided_slice %30 {offsets = [3, 0], sizes = [1, 128], strides = [1, 1]} : vector<8x128xf32> to vector<1x128xf32>
    %101 = arith.truncf %99 : vector<1x32xf32> to vector<1x32xbf16>
    %cst_32 = arith.constant dense<0.000000e+00> : vector<1x128xf32>
    %102 = tpu.matmul %101, %31, %cst_32 {dimension_numbers = #tpu.dot_dimension_numbers<[1], [0], [0], [1], [0, 0, 1, 1], [], []>} : vector<1x32xbf16>, vector<32x128xbf16>, vector<1x128xf32> -> vector<1x128xf32>
    %103 = arith.addf %100, %102 : vector<1x128xf32>
    %104 = math.tanh %103 : vector<1x128xf32>
    %105 = arith.negf %103 : vector<1x128xf32>
    %106 = math.exp %105 : vector<1x128xf32>
    %cst_33 = arith.constant 1.000000e+00 : f32
    %107 = vector.broadcast %cst_33 : f32 to vector<1x128xf32>
    %108 = arith.addf %107, %106 : vector<1x128xf32>
    %109 = arith.divf %107, %108 : vector<1x128xf32>
    %110 = arith.select %37, %104, %109 : vector<1x128xi1>, vector<1x128xf32>
    %111 = vector.extract_strided_slice %110 {offsets = [0, 0], sizes = [1, 32], strides = [1, 1]} : vector<1x128xf32> to vector<1x32xf32>
    %112 = vector.extract_strided_slice %110 {offsets = [0, 32], sizes = [1, 32], strides = [1, 1]} : vector<1x128xf32> to vector<1x32xf32>
    %113 = vector.extract_strided_slice %110 {offsets = [0, 64], sizes = [1, 32], strides = [1, 1]} : vector<1x128xf32> to vector<1x32xf32>
    %114 = vector.extract_strided_slice %110 {offsets = [0, 96], sizes = [1, 32], strides = [1, 1]} : vector<1x128xf32> to vector<1x32xf32>
    %115 = arith.mulf %112, %97 : vector<1x32xf32>
    %116 = arith.mulf %111, %113 : vector<1x32xf32>
    %117 = arith.addf %115, %116 : vector<1x32xf32>
    %118 = math.tanh %117 : vector<1x32xf32>
    %119 = arith.mulf %114, %118 : vector<1x32xf32>
    %120 = vector.extract_strided_slice %30 {offsets = [4, 0], sizes = [1, 128], strides = [1, 1]} : vector<8x128xf32> to vector<1x128xf32>
    %121 = arith.truncf %119 : vector<1x32xf32> to vector<1x32xbf16>
    %cst_34 = arith.constant dense<0.000000e+00> : vector<1x128xf32>
    %122 = tpu.matmul %121, %31, %cst_34 {dimension_numbers = #tpu.dot_dimension_numbers<[1], [0], [0], [1], [0, 0, 1, 1], [], []>} : vector<1x32xbf16>, vector<32x128xbf16>, vector<1x128xf32> -> vector<1x128xf32>
    %123 = arith.addf %120, %122 : vector<1x128xf32>
    %124 = math.tanh %123 : vector<1x128xf32>
    %125 = arith.negf %123 : vector<1x128xf32>
    %126 = math.exp %125 : vector<1x128xf32>
    %cst_35 = arith.constant 1.000000e+00 : f32
    %127 = vector.broadcast %cst_35 : f32 to vector<1x128xf32>
    %128 = arith.addf %127, %126 : vector<1x128xf32>
    %129 = arith.divf %127, %128 : vector<1x128xf32>
    %130 = arith.select %37, %124, %129 : vector<1x128xi1>, vector<1x128xf32>
    %131 = vector.extract_strided_slice %130 {offsets = [0, 0], sizes = [1, 32], strides = [1, 1]} : vector<1x128xf32> to vector<1x32xf32>
    %132 = vector.extract_strided_slice %130 {offsets = [0, 32], sizes = [1, 32], strides = [1, 1]} : vector<1x128xf32> to vector<1x32xf32>
    %133 = vector.extract_strided_slice %130 {offsets = [0, 64], sizes = [1, 32], strides = [1, 1]} : vector<1x128xf32> to vector<1x32xf32>
    %134 = vector.extract_strided_slice %130 {offsets = [0, 96], sizes = [1, 32], strides = [1, 1]} : vector<1x128xf32> to vector<1x32xf32>
    %135 = arith.mulf %132, %117 : vector<1x32xf32>
    %136 = arith.mulf %131, %133 : vector<1x32xf32>
    %137 = arith.addf %135, %136 : vector<1x32xf32>
    %138 = math.tanh %137 : vector<1x32xf32>
    %139 = arith.mulf %134, %138 : vector<1x32xf32>
    %140 = vector.extract_strided_slice %30 {offsets = [5, 0], sizes = [1, 128], strides = [1, 1]} : vector<8x128xf32> to vector<1x128xf32>
    %141 = arith.truncf %139 : vector<1x32xf32> to vector<1x32xbf16>
    %cst_36 = arith.constant dense<0.000000e+00> : vector<1x128xf32>
    %142 = tpu.matmul %141, %31, %cst_36 {dimension_numbers = #tpu.dot_dimension_numbers<[1], [0], [0], [1], [0, 0, 1, 1], [], []>} : vector<1x32xbf16>, vector<32x128xbf16>, vector<1x128xf32> -> vector<1x128xf32>
    %143 = arith.addf %140, %142 : vector<1x128xf32>
    %144 = math.tanh %143 : vector<1x128xf32>
    %145 = arith.negf %143 : vector<1x128xf32>
    %146 = math.exp %145 : vector<1x128xf32>
    %cst_37 = arith.constant 1.000000e+00 : f32
    %147 = vector.broadcast %cst_37 : f32 to vector<1x128xf32>
    %148 = arith.addf %147, %146 : vector<1x128xf32>
    %149 = arith.divf %147, %148 : vector<1x128xf32>
    %150 = arith.select %37, %144, %149 : vector<1x128xi1>, vector<1x128xf32>
    %151 = vector.extract_strided_slice %150 {offsets = [0, 0], sizes = [1, 32], strides = [1, 1]} : vector<1x128xf32> to vector<1x32xf32>
    %152 = vector.extract_strided_slice %150 {offsets = [0, 32], sizes = [1, 32], strides = [1, 1]} : vector<1x128xf32> to vector<1x32xf32>
    %153 = vector.extract_strided_slice %150 {offsets = [0, 64], sizes = [1, 32], strides = [1, 1]} : vector<1x128xf32> to vector<1x32xf32>
    %154 = vector.extract_strided_slice %150 {offsets = [0, 96], sizes = [1, 32], strides = [1, 1]} : vector<1x128xf32> to vector<1x32xf32>
    %155 = arith.mulf %152, %137 : vector<1x32xf32>
    %156 = arith.mulf %151, %153 : vector<1x32xf32>
    %157 = arith.addf %155, %156 : vector<1x32xf32>
    %158 = math.tanh %157 : vector<1x32xf32>
    %159 = arith.mulf %154, %158 : vector<1x32xf32>
    %160 = vector.extract_strided_slice %30 {offsets = [6, 0], sizes = [1, 128], strides = [1, 1]} : vector<8x128xf32> to vector<1x128xf32>
    %161 = arith.truncf %159 : vector<1x32xf32> to vector<1x32xbf16>
    %cst_38 = arith.constant dense<0.000000e+00> : vector<1x128xf32>
    %162 = tpu.matmul %161, %31, %cst_38 {dimension_numbers = #tpu.dot_dimension_numbers<[1], [0], [0], [1], [0, 0, 1, 1], [], []>} : vector<1x32xbf16>, vector<32x128xbf16>, vector<1x128xf32> -> vector<1x128xf32>
    %163 = arith.addf %160, %162 : vector<1x128xf32>
    %164 = math.tanh %163 : vector<1x128xf32>
    %165 = arith.negf %163 : vector<1x128xf32>
    %166 = math.exp %165 : vector<1x128xf32>
    %cst_39 = arith.constant 1.000000e+00 : f32
    %167 = vector.broadcast %cst_39 : f32 to vector<1x128xf32>
    %168 = arith.addf %167, %166 : vector<1x128xf32>
    %169 = arith.divf %167, %168 : vector<1x128xf32>
    %170 = arith.select %37, %164, %169 : vector<1x128xi1>, vector<1x128xf32>
    %171 = vector.extract_strided_slice %170 {offsets = [0, 0], sizes = [1, 32], strides = [1, 1]} : vector<1x128xf32> to vector<1x32xf32>
    %172 = vector.extract_strided_slice %170 {offsets = [0, 32], sizes = [1, 32], strides = [1, 1]} : vector<1x128xf32> to vector<1x32xf32>
    %173 = vector.extract_strided_slice %170 {offsets = [0, 64], sizes = [1, 32], strides = [1, 1]} : vector<1x128xf32> to vector<1x32xf32>
    %174 = vector.extract_strided_slice %170 {offsets = [0, 96], sizes = [1, 32], strides = [1, 1]} : vector<1x128xf32> to vector<1x32xf32>
    %175 = arith.mulf %172, %157 : vector<1x32xf32>
    %176 = arith.mulf %171, %173 : vector<1x32xf32>
    %177 = arith.addf %175, %176 : vector<1x32xf32>
    %178 = math.tanh %177 : vector<1x32xf32>
    %179 = arith.mulf %174, %178 : vector<1x32xf32>
    %180 = vector.extract_strided_slice %30 {offsets = [7, 0], sizes = [1, 128], strides = [1, 1]} : vector<8x128xf32> to vector<1x128xf32>
    %181 = arith.truncf %179 : vector<1x32xf32> to vector<1x32xbf16>
    %cst_40 = arith.constant dense<0.000000e+00> : vector<1x128xf32>
    %182 = tpu.matmul %181, %31, %cst_40 {dimension_numbers = #tpu.dot_dimension_numbers<[1], [0], [0], [1], [0, 0, 1, 1], [], []>} : vector<1x32xbf16>, vector<32x128xbf16>, vector<1x128xf32> -> vector<1x128xf32>
    %183 = arith.addf %180, %182 : vector<1x128xf32>
    %184 = math.tanh %183 : vector<1x128xf32>
    %185 = arith.negf %183 : vector<1x128xf32>
    %186 = math.exp %185 : vector<1x128xf32>
    %cst_41 = arith.constant 1.000000e+00 : f32
    %187 = vector.broadcast %cst_41 : f32 to vector<1x128xf32>
    %188 = arith.addf %187, %186 : vector<1x128xf32>
    %189 = arith.divf %187, %188 : vector<1x128xf32>
    %190 = arith.select %37, %184, %189 : vector<1x128xi1>, vector<1x128xf32>
    %191 = vector.extract_strided_slice %190 {offsets = [0, 0], sizes = [1, 32], strides = [1, 1]} : vector<1x128xf32> to vector<1x32xf32>
    %192 = vector.extract_strided_slice %190 {offsets = [0, 32], sizes = [1, 32], strides = [1, 1]} : vector<1x128xf32> to vector<1x32xf32>
    %193 = vector.extract_strided_slice %190 {offsets = [0, 64], sizes = [1, 32], strides = [1, 1]} : vector<1x128xf32> to vector<1x32xf32>
    %194 = vector.extract_strided_slice %190 {offsets = [0, 96], sizes = [1, 32], strides = [1, 1]} : vector<1x128xf32> to vector<1x32xf32>
    %195 = arith.mulf %192, %177 : vector<1x32xf32>
    %196 = arith.mulf %191, %193 : vector<1x32xf32>
    %197 = arith.addf %195, %196 : vector<1x32xf32>
    %198 = math.tanh %197 : vector<1x32xf32>
    %199 = arith.mulf %194, %198 : vector<1x32xf32>
    %200 = arith.mulf %199, %4 : vector<1x32xf32>
    %cst_42 = arith.constant dense<0.000000e+00> : vector<1xf32>
    %201 = vector.multi_reduction <add>, %200, %cst_42 [1] : vector<1x32xf32> to vector<1xf32>
    %202 = vector.shape_cast %201 : vector<1xf32> to vector<1x1xf32>
    %203 = arith.addf %202, %5 : vector<1x1xf32>
    %c0_43 = arith.constant 0 : index
    %c0_44 = arith.constant 0 : index
    %c0_45 = arith.constant 0 : index
    %204 = vector.load %arg8[%c0_43, %c0_44, %c0_45] : memref<1x1x1xf32, #tpu.memory_space<vmem>>, vector<1x1x1xf32>
    %205 = vector.shape_cast %204 : vector<1x1x1xf32> to vector<1x1xf32>
    %206 = vector.shape_cast %203 : vector<1x1xf32> to vector<1x1x1xf32>
    tpu.vector_store %arg8[%c0_43, %c0_44, %c0_45], %206 {strides = array<i32>} : memref<1x1x1xf32, #tpu.memory_space<vmem>>, vector<1x1x1xf32>,
    return
  }
  func.func @transform_0(%arg0: i32) -> (i32, i32, i32) {
    %c0_i32 = arith.constant 0 : i32
    %c0_i32_0 = arith.constant 0 : i32
    %c0_i32_1 = arith.constant 0 : i32
    return %arg0, %c0_i32, %c0_i32_0 : i32, i32, i32
  }
  func.func @transform_1(%arg0: i32) -> (i32, i32) {
    %c0_i32 = arith.constant 0 : i32
    %c0_i32_0 = arith.constant 0 : i32
    %c0_i32_1 = arith.constant 0 : i32
    return %c0_i32, %c0_i32_0 : i32, i32
  }
  func.func @transform_2(%arg0: i32) -> (i32, i32) {
    %c0_i32 = arith.constant 0 : i32
    %c0_i32_0 = arith.constant 0 : i32
    %c0_i32_1 = arith.constant 0 : i32
    return %c0_i32, %c0_i32_0 : i32, i32
  }
  func.func @transform_3(%arg0: i32) -> (i32, i32) {
    %c0_i32 = arith.constant 0 : i32
    %c0_i32_0 = arith.constant 0 : i32
    %c0_i32_1 = arith.constant 0 : i32
    return %c0_i32, %c0_i32_0 : i32, i32
  }
  func.func @transform_4(%arg0: i32) -> (i32, i32) {
    %c0_i32 = arith.constant 0 : i32
    %c0_i32_0 = arith.constant 0 : i32
    %c0_i32_1 = arith.constant 0 : i32
    return %c0_i32, %c0_i32_0 : i32, i32
  }
  func.func @transform_5(%arg0: i32) -> (i32, i32) {
    %c0_i32 = arith.constant 0 : i32
    %c0_i32_0 = arith.constant 0 : i32
    %c0_i32_1 = arith.constant 0 : i32
    return %c0_i32, %c0_i32_0 : i32, i32
  }
  func.func @transform_6(%arg0: i32) -> (i32, i32) {
    %c0_i32 = arith.constant 0 : i32
    %c0_i32_0 = arith.constant 0 : i32
    %c0_i32_1 = arith.constant 0 : i32
    return %c0_i32, %c0_i32_0 : i32, i32
  }
  func.func @transform_7(%arg0: i32) -> (i32, i32, i32) {
    %c0_i32 = arith.constant 0 : i32
    %c0_i32_0 = arith.constant 0 : i32
    %c0_i32_1 = arith.constant 0 : i32
    return %arg0, %c0_i32, %c0_i32_0 : i32, i32, i32
  }
}

</mosaic_0001>

<bundles_post_ra>
// kernel: vae_lstm_forward.1
= control target key start
LH: loop header
LB: loop body
LE: loop exit
PB: predicated region body
PF: predicated region fallthrough
CT: control target
= control target key end

     0   :  { %s4624_s24 = smov 0   ;;  %s6384_s0 = inlined_call_operand.vmem [shape: bf16[2,8,768], index: 0, kind: input, shape index: {}]   ;;  %s6385_s1 = inlined_call_operand.vmem [shape: bf16[768,512], index: 1, kind: input, shape index: {}]   ;;  %s6386_s2 = inlined_call_operand.vmem [shape: bf16[512,256], index: 2, kind: input, shape index: {}]   ;;  %s6387_s3 = inlined_call_operand.vmem [shape: bf16[256,32], index: 3, kind: input, shape index: {}]   ;;  %s6388_s4 = inlined_call_operand.vmem [shape: bf16[32,128], index: 4, kind: input, shape index: {}]   ;;  %s6389_s5 = inlined_call_operand.vmem [shape: bf16[32,128], index: 5, kind: input, shape index: {}]   ;;  %s6390_s6 = inlined_call_operand.vmem [shape: f32[1,1280], index: 6, kind: input, shape index: {}]   ;;  %s6391_s7 = inlined_call_operand.vmem [shape: f32[2,1,1], index: 7, kind: output, shape index: {}]  }
   0x1 LB: > { %s3087_s25 = sadd.s32 4294967295, %s4578_s24   ;;  %p3091_p0 = scmp.ge.s32.totalorder %s4578_s24, 1  ;;  %s4578_s24 = sphi %s4624_s24, %s17_s24  }
   0x2   : > { %p237_p1 = scmp.lt.s32.totalorder %s4578_s24, 3 }
   0x4   : > { %p238_p2 = pnand %p3091_p0, %p237_p1 }
   0x5   : > { %p267_p3 = scmp.lt.s32.totalorder (!%p238_p2), %s3087_s25, 1  ;;  %s4581_s11 = smov (!%p238_p2), 64  }
   0x6   : > { %241 = sbr.rel (%p238_p2) target bundleno = 5605 (0x15e5), region = 48  ;;  %s4582_s12 = smov (!%p238_p2), 32  }
   0xb   : > { %v3207_v0 = vld [vmem:[%s6385_s1 + $0xe0] sm:$0xf]  ;;  %v4245_v1 = vld [vmem:[%s6385_s1 + $0xec] sm:$0xf0]  ;;  %s6395_s25 = smov (!%p267_p3, %s3087_s25), 1  ;;  %vm2461_vm0 = vcmask 261120  }
   0xc   : > { %v3335_v2 = vld [vmem:[%s6385_s1 + $0x1e0] sm:$0xf]  ;;  %v3208_v3 = vor.u32 %v4245_v1, %v3207_v0  ;;  %v4277_v4 = vld [vmem:[%s6385_s1 + $0x1ec] sm:$0xf0]  ;;  %s4491_s10 = smul.u32 24, %s6395_s25  ;;  %s274_s19 = scalar_lea.vmem %s6391_s7, %s6395_s25 }
   0xd   : > { %v3463_v5 = vld [vmem:[%s6385_s1 + $0x2e0] sm:$0xf]  ;;  %v4309_v6 = vld [vmem:[%s6385_s1 + $0x2ec] sm:$0xf0]  ;;  %v3336_v7 = vor.u32 %v4277_v4, %v3335_v2 }
   0xe   : > { %v3464_v8 = vor.u32 %v4309_v6, %v3463_v5  ;;  %v3591_v9 = vld [vmem:[%s6385_s1 + $0x3e0] sm:$0xf]  ;;  %v4341_v10 = vld [vmem:[%s6385_s1 + $0x3ec] sm:$0xf0]  ;;  %1467 = vmatpush.bf16.msra.mxu0 %v3208_v3  ;;  %s4951_s23 = scalar_lea.vmem %s6384_s0, %s4491_s10 }
   0xf   : > { %v3191_v11 = vld [vmem:[%s6385_s1 + $0xc0] sm:$0xf]  ;;  %v3592_v12 = vor.u32 %v4341_v10, %v3591_v9  ;;  %v4241_v13 = vld [vmem:[%s6385_s1 + $0xcc] sm:$0xf0]  ;;  %1480 = vmatpush.bf16.msra.mxu1 %v3336_v7 }
  0x10   : > { %v3319_v14 = vld [vmem:[%s6385_s1 + $0x1c0] sm:$0xf]  ;;  %v4273_v15 = vld [vmem:[%s6385_s1 + $0x1cc] sm:$0xf0]  ;;  %1493 = vmatpush.bf16.msra.mxu2 %v3464_v8  ;;  %v3192_v16 = vor.u32 %v4241_v13, %v3191_v11 }
  0x11   : > { %v3320_v17 = vor.u32 %v4273_v15, %v3319_v14  ;;  %v3447_v18 = vld [vmem:[%s6385_s1 + $0x2c0] sm:$0xf]  ;;  %v4305_v19 = vld [vmem:[%s6385_s1 + $0x2cc] sm:$0xf0]  ;;  %1506 = vmatpush.bf16.msra.mxu3 %v3592_v12 }
  0x12   : > { %v3575_v20 = vld [vmem:[%s6385_s1 + $0x3c0] sm:$0xf]  ;;  %v3448_v21 = vor.u32 %v4305_v19, %v3447_v18  ;;  %v4337_v22 = vld [vmem:[%s6385_s1 + $0x3cc] sm:$0xf0]  ;;  %1468 = vmatpush.bf16.msra.mxu0 %v3192_v16 }
  0x13   : > { %v3175_v23 = vld [vmem:[%s6385_s1 + $0xa0] sm:$0xf]  ;;  %v4237_v24 = vld [vmem:[%s6385_s1 + $0xac] sm:$0xf0]  ;;  %v3576_v25 = vor.u32 %v4337_v22, %v3575_v20  ;;  %1481 = vmatpush.bf16.msra.mxu1 %v3320_v17 }
  0x14   : > { %v3303_v26 = vld [vmem:[%s6385_s1 + $0x1a0] sm:$0xf]  ;;  %v4269_v27 = vld [vmem:[%s6385_s1 + $0x1ac] sm:$0xf0]  ;;  %v3176_v29 = vor.u32 %v4237_v24, %v3175_v23  ;;  %1494 = vmatpush.bf16.msra.mxu2 %v3448_v21 }
  0x15   : > { %v3431_v28 = vld [vmem:[%s6385_s1 + $0x2a0] sm:$0xf]  ;;  %v4301_v30 = vld [vmem:[%s6385_s1 + $0x2ac] sm:$0xf0]  ;;  %v3304_v33 = vor.u32 %v4269_v27, %v3303_v26  ;;  %1507 = vmatpush.bf16.msra.mxu3 %v3576_v25 }
  0x16   : > { %v3559_v31 = vld [vmem:[%s6385_s1 + $0x3a0] sm:$0xf]  ;;  %v4333_v32 = vld [vmem:[%s6385_s1 + $0x3ac] sm:$0xf0]  ;;  %v3432_v34 = vor.u32 %v4301_v30, %v3431_v28  ;;  %1469 = vmatpush.bf16.msra.mxu0 %v3176_v29 }
  0x17   : > { %v3159_v35 = vld [vmem:[%s6385_s1 + $0x80] sm:$0xf]  ;;  %v4233_v36 = vld [vmem:[%s6385_s1 + $0x8c] sm:$0xf0]  ;;  %v3560_v38 = vor.u32 %v4333_v32, %v3559_v31  ;;  %1482 = vmatpush.bf16.msra.mxu1 %v3304_v33  ;;  %v4243_v33 = vld [vmem:[%s6385_s1 + $0xe4] sm:$0xf] }
  0x18   : > { %v3287_v37 = vld [vmem:[%s6385_s1 + $0x180] sm:$0xf]  ;;  %v4265_v39 = vld [vmem:[%s6385_s1 + $0x18c] sm:$0xf0]  ;;  %v3160_v44 = vor.u32 %v4233_v36, %v3159_v35  ;;  %1495 = vmatpush.bf16.msra.mxu2 %v3432_v34  ;;  %v3209_v34 = vld [vmem:[%s6385_s1 + $0xf0] sm:$0xf0] }
  0x19   : > { %v3415_v40 = vld [vmem:[%s6385_s1 + $0x280] sm:$0xf]  ;;  %v4297_v41 = vld [vmem:[%s6385_s1 + $0x28c] sm:$0xf0]  ;;  %v3288_v45 = vor.u32 %v4265_v39, %v3287_v37  ;;  %1508 = vmatpush.bf16.msra.mxu3 %v3560_v38  ;;  %v4275_v37 = vld [vmem:[%s6385_s1 + $0x1e4] sm:$0xf] }
  0x1a   : > { %v3543_v42 = vld [vmem:[%s6385_s1 + $0x380] sm:$0xf]  ;;  %v4329_v43 = vld [vmem:[%s6385_s1 + $0x38c] sm:$0xf0]  ;;  %v3416_v46 = vor.u32 %v4297_v41, %v3415_v40  ;;  %1470 = vmatpush.bf16.msra.mxu0 %v3160_v44  ;;  %v3337_v38 = vld [vmem:[%s6385_s1 + $0x1f0] sm:$0xf0] }
  0x1b   : > { %v3143_v47 = vld [vmem:[%s6385_s1 + $0x60] sm:$0xf]  ;;  %v4229_v48 = vld [vmem:[%s6385_s1 + $0x6c] sm:$0xf0]  ;;  %v3544_v50 = vor.u32 %v4329_v43, %v3543_v42  ;;  %1483 = vmatpush.bf16.msra.mxu1 %v3288_v45  ;;  %v3212_v42 = vor.u32 %v4243_v33, %v3209_v34 }
  0x1c   : > { %v3271_v49 = vld [vmem:[%s6385_s1 + $0x160] sm:$0xf]  ;;  %v4261_v51 = vld [vmem:[%s6385_s1 + $0x16c] sm:$0xf0]  ;;  %v3144_v56 = vor.u32 %v4229_v48, %v3143_v47  ;;  %1496 = vmatpush.bf16.msra.mxu2 %v3416_v46  ;;  %v3340_v46 = vor.u32 %v4275_v37, %v3337_v38  ;;  %v4239_v48 = vld [vmem:[%s6385_s1 + $0xc4] sm:$0xf] }
  0x1d   : > { %v3399_v52 = vld [vmem:[%s6385_s1 + $0x260] sm:$0xf]  ;;  %v4293_v53 = vld [vmem:[%s6385_s1 + $0x26c] sm:$0xf0]  ;;  %v3272_v57 = vor.u32 %v4261_v51, %v3271_v49  ;;  %1509 = vmatpush.bf16.msra.mxu3 %v3544_v50  ;;  %v3193_v49 = vld [vmem:[%s6385_s1 + $0xd0] sm:$0xf0] }
  0x1e   : > { %v3527_v54 = vld [vmem:[%s6385_s1 + $0x360] sm:$0xf]  ;;  %v4325_v55 = vld [vmem:[%s6385_s1 + $0x36c] sm:$0xf0]  ;;  %v3400_v58 = vor.u32 %v4293_v53, %v3399_v52  ;;  %1471 = vmatpush.bf16.msra.mxu0 %v3144_v56  ;;  %v4271_v50 = vld [vmem:[%s6385_s1 + $0x1c4] sm:$0xf] }
  0x1f   : > { %v3127_v59 = vld [vmem:[%s6385_s1 + $0x40] sm:$0xf]  ;;  %v4225_v60 = vld [vmem:[%s6385_s1 + $0x4c] sm:$0xf0]  ;;  %v3528_v62 = vor.u32 %v4325_v55, %v3527_v54  ;;  %1484 = vmatpush.bf16.msra.mxu1 %v3272_v57  ;;  %v3321_v51 = vld [vmem:[%s6385_s1 + $0x1d0] sm:$0xf0]  ;;  %v3196_v54 = vor.u32 %v4239_v48, %v3193_v49 }
  0x20   : > { %v3255_v61 = vld [vmem:[%s6385_s1 + $0x140] sm:$0xf]  ;;  %v4257_v63 = vld [vmem:[%s6385_s1 + $0x14c] sm:$0xf0]  ;;  %v3128_v4 = vor.u32 %v4225_v60, %v3127_v59  ;;  %1497 = vmatpush.bf16.msra.mxu2 %v3400_v58  ;;  %v3324_v58 = vor.u32 %v4271_v50, %v3321_v51  ;;  %v4235_v60 = vld [vmem:[%s6385_s1 + $0xa4] sm:$0xf] }
  0x21   : > { %v3383_v0 = vld [vmem:[%s6385_s1 + $0x240] sm:$0xf]  ;;  %v4289_v1 = vld [vmem:[%s6385_s1 + $0x24c] sm:$0xf0]  ;;  %v3256_v5 = vor.u32 %v4257_v63, %v3255_v61  ;;  %1510 = vmatpush.bf16.msra.mxu3 %v3528_v62  ;;  %v3177_v61 = vld [vmem:[%s6385_s1 + $0xb0] sm:$0xf0] }
  0x22   : > { %v3511_v2 = vld [vmem:[%s6385_s1 + $0x340] sm:$0xf]  ;;  %v4321_v3 = vld [vmem:[%s6385_s1 + $0x34c] sm:$0xf0]  ;;  %v3384_v6 = vor.u32 %v4289_v1, %v3383_v0  ;;  %1472 = vmatpush.bf16.msra.mxu0 %v3128_v4  ;;  %v4267_v62 = vld [vmem:[%s6385_s1 + $0x1a4] sm:$0xf] }
  0x23   : > { %v3111_v7 = vld [vmem:[%s6385_s1 + $0x20] sm:$0xf]  ;;  %v4221_v8 = vld [vmem:[%s6385_s1 + $0x2c] sm:$0xf0]  ;;  %v3512_v10 = vor.u32 %v4321_v3, %v3511_v2  ;;  %1485 = vmatpush.bf16.msra.mxu1 %v3256_v5  ;;  %v3305_v63 = vld [vmem:[%s6385_s1 + $0x1b0] sm:$0xf0]  ;;  %v3180_v3 = vor.u32 %v4235_v60, %v3177_v61 }
  0x24   : > { %v3239_v9 = vld [vmem:[%s6385_s1 + $0x120] sm:$0xf]  ;;  %v4253_v11 = vld [vmem:[%s6385_s1 + $0x12c] sm:$0xf0]  ;;  %v3112_v16 = vor.u32 %v4221_v8, %v3111_v7  ;;  %1498 = vmatpush.bf16.msra.mxu2 %v3384_v6  ;;  %v3308_v7 = vor.u32 %v4267_v62, %v3305_v63  ;;  %v4231_v8 = vld [vmem:[%s6385_s1 + $0x84] sm:$0xf] }
  0x25   : > { %v3367_v12 = vld [vmem:[%s6385_s1 + $0x220] sm:$0xf]  ;;  %v4285_v13 = vld [vmem:[%s6385_s1 + $0x22c] sm:$0xf0]  ;;  %v3240_v19 = vor.u32 %v4253_v11, %v3239_v9  ;;  %1511 = vmatpush.bf16.msra.mxu3 %v3512_v10  ;;  %v3161_v9 = vld [vmem:[%s6385_s1 + $0x90] sm:$0xf0] }
  0x26   : > { %v3495_v14 = vld [vmem:[%s6385_s1 + $0x320] sm:$0xf]  ;;  %v4317_v15 = vld [vmem:[%s6385_s1 + $0x32c] sm:$0xf0]  ;;  %v3368_v20 = vor.u32 %v4285_v13, %v3367_v12  ;;  %1473 = vmatpush.bf16.msra.mxu0 %v3112_v16  ;;  %v4263_v10 = vld [vmem:[%s6385_s1 + $0x184] sm:$0xf]  ;;  %v3164_v16 = vor.u32 %v4231_v8, %v3161_v9 }
  0x27   : > { %v3095_v17 = vld [vmem:[%s6385_s1] sm:$0xf]  ;;  %v4217_v18 = vld [vmem:[%s6385_s1 + $0xc] sm:$0xf0]  ;;  %v3496_v24 = vor.u32 %v4317_v15, %v3495_v14  ;;  %1486 = vmatpush.bf16.msra.mxu1 %v3240_v19  ;;  %v3289_v11 = vld [vmem:[%s6385_s1 + $0x190] sm:$0xf0] }
  0x28   : > { %v3223_v21 = vld [vmem:[%s6385_s1 + $0x100] sm:$0xf]  ;;  %v4249_v22 = vld [vmem:[%s6385_s1 + $0x10c] sm:$0xf0]  ;;  %v3096_v31 = vor.u32 %v4217_v18, %v3095_v17  ;;  %1499 = vmatpush.bf16.msra.mxu2 %v3368_v20  ;;  %v3292_v19 = vor.u32 %v4263_v10, %v3289_v11  ;;  %v4227_v20 = vld [vmem:[%s6385_s1 + $0x64] sm:$0xf] }
  0x29   : > { %v3351_v23 = vld [vmem:[%s6385_s1 + $0x200] sm:$0xf]  ;;  %v4281_v25 = vld [vmem:[%s6385_s1 + $0x20c] sm:$0xf0]  ;;  %v3224_v35 = vor.u32 %v4249_v22, %v3223_v21  ;;  %1512 = vmatpush.bf16.msra.mxu3 %v3496_v24  ;;  %v3145_v21 = vld [vmem:[%s6385_s1 + $0x70] sm:$0xf0] }
  0x2a   : > { %v3479_v26 = vld [vmem:[%s6385_s1 + $0x300] sm:$0xf]  ;;  %v4313_v27 = vld [vmem:[%s6385_s1 + $0x30c] sm:$0xf0]  ;;  %v3352_v36 = vor.u32 %v4281_v25, %v3351_v23  ;;  %1474 = vmatpush.bf16.msra.mxu0 %v3096_v31  ;;  %v4259_v22 = vld [vmem:[%s6385_s1 + $0x164] sm:$0xf] }
  0x2b   : > { %v3719_v28 = vld [vmem:[%s6385_s1 + $0x4e0] sm:$0xf]  ;;  %v4373_v29 = vld [vmem:[%s6385_s1 + $0x4ec] sm:$0xf0]  ;;  %v3480_v39 = vor.u32 %v4313_v27, %v3479_v26  ;;  %1487 = vmatpush.bf16.msra.mxu1 %v3224_v35  ;;  %v3273_v24 = vld [vmem:[%s6385_s1 + $0x170] sm:$0xf0] }
  0x2c   : > { %v3847_v30 = vld [vmem:[%s6385_s1 + $0x5e0] sm:$0xf]  ;;  %v4405_v32 = vld [vmem:[%s6385_s1 + $0x5ec] sm:$0xf0]  ;;  %v3720_v40 = vor.u32 %v4373_v29, %v3719_v28  ;;  %1500 = vmatpush.bf16.msra.mxu2 %v3352_v36  ;;  %v283_v25 = vld [vmem:[%s4951_s23 + $0x8] sm:$0xff]  ;;  %v3276_v36 = vor.u32 %v4259_v22, %v3273_v24 }
  0x2d   : > { %v3848_v41 = vor.u32 %v4405_v32, %v3847_v30  ;;  %v3703_v43 = vld [vmem:[%s6385_s1 + $0x4c0] sm:$0xf]  ;;  %v4369_v44 = vld [vmem:[%s6385_s1 + $0x4cc] sm:$0xf0]  ;;  %1513 = vmatpush.bf16.msra.mxu3 %v3480_v39  ;;  %v491_v27 = vunpack.c.l.b16 %v283_v25  ;;  %v492_v29 = vunpack.c.h.b16 %v283_v25  ;;  %v3148_v32 = vor.u32 %v4227_v20, %v3145_v21  ;;  %v4223_v38 = vld [vmem:[%s6385_s1 + $0x44] sm:$0xf] }
  0x2e   : > { %v3831_v45 = vld [vmem:[%s6385_s1 + $0x5c0] sm:$0xf]  ;;  %v4401_v47 = vld [vmem:[%s6385_s1 + $0x5cc] sm:$0xf0]  ;;  %1519 = vmatpush.bf16.msrb.mxu0 %v3720_v40  ;;  %v3704_v52 = vor.u32 %v4369_v44, %v3703_v43  ;;  %v3129_v39 = vld [vmem:[%s6385_s1 + $0x50] sm:$0xf0] }
  0x2f   : > { %1532 = vmatpush.bf16.msrb.mxu1 %v3848_v41  ;;  %v3832_v53 = vor.u32 %v4401_v47, %v3831_v45  ;;  %v3687_v55 = vld [vmem:[%s6385_s1 + $0x4a0] sm:$0xf]  ;;  %v4365_v56 = vld [vmem:[%s6385_s1 + $0x4ac] sm:$0xf0]  ;;  %v4976_v40 = vpack.c.b16 %v491_v27, %v491_v27  ;;  %v3257_v43 = vld [vmem:[%s6385_s1 + $0x150] sm:$0xf0]  ;;  %v4986_v44 = vpack.c.b16 %v492_v29, %v492_v29  ;;  %v3132_v48 = vor.u32 %v4223_v38, %v3129_v39 }
  0x30   : > { %1545 = vmatpush.bf16.msrb.mxu2 %v3212_v42  ;;  %v3815_v57 = vld [vmem:[%s6385_s1 + $0x5a0] sm:$0xf]  ;;  %v4397_v59 = vld [vmem:[%s6385_s1 + $0x5ac] sm:$0xf0]  ;;  %v3688_v0 = vor.u32 %v4365_v56, %v3687_v55  ;;  %v4255_v42 = vld [vmem:[%s6385_s1 + $0x144] sm:$0xf] }
  0x31   : > { %1558 = vmatpush.bf16.msrb.mxu3 %v3340_v46  ;;  %v3671_v1 = vld [vmem:[%s6385_s1 + $0x480] sm:$0xf]  ;;  %v3816_v2 = vor.u32 %v4397_v59, %v3815_v57  ;;  %v4361_v4 = vld [vmem:[%s6385_s1 + $0x48c] sm:$0xf0]  ;;  %1501 = vmatmul.bf16.vlgmr.msra.gmra.mxu2 %v4976_v40  ;;  %v3113_v55 = vld [vmem:[%s6385_s1 + $0x30] sm:$0xf0] }
  0x32   : > { %1520 = vmatpush.bf16.msrb.mxu0 %v3704_v52  ;;  %v3799_v5 = vld [vmem:[%s6385_s1 + $0x580] sm:$0xf]  ;;  %v4393_v6 = vld [vmem:[%s6385_s1 + $0x58c] sm:$0xf0]  ;;  %v3672_v12 = vor.u32 %v4361_v4, %v3671_v1  ;;  %v3260_v52 = vor.u32 %v4255_v42, %v3257_v43  ;;  %1514 = vmatmul.bf16.vlgmr.msra.gmra.mxu3 %v4986_v44  ;;  %v4251_v56 = vld [vmem:[%s6385_s1 + $0x124] sm:$0xf] }
  0x33   : > { %1533 = vmatpush.bf16.msrb.mxu1 %v3832_v53  ;;  %v3655_v13 = vld [vmem:[%s6385_s1 + $0x460] sm:$0xf]  ;;  %v4357_v14 = vld [vmem:[%s6385_s1 + $0x46c] sm:$0xf0]  ;;  %v3800_v15 = vor.u32 %v4393_v6, %v3799_v5  ;;  %v3241_v57 = vld [vmem:[%s6385_s1 + $0x130] sm:$0xf0] }
  0x34   : > { %1546 = vmatpush.bf16.msrb.mxu2 %v3196_v54  ;;  %v3783_v17 = vld [vmem:[%s6385_s1 + $0x560] sm:$0xf]  ;;  %v4389_v18 = vld [vmem:[%s6385_s1 + $0x56c] sm:$0xf0]  ;;  %v3656_v23 = vor.u32 %v4357_v14, %v3655_v13  ;;  %v4219_v54 = vld [vmem:[%s6385_s1 + $0x24] sm:$0xf] }
  0x35   : > { %1559 = vmatpush.bf16.msrb.mxu3 %v3324_v58  ;;  %v282_v26 = vld [vmem:[%s4951_s23] sm:$0xff]  ;;  %v3784_v31 = vor.u32 %v4389_v18, %v3783_v17  ;;  %v4353_v34 = vld [vmem:[%s6385_s1 + $0x44c] sm:$0xf0]  ;;  %v3116_v62 = vor.u32 %v4219_v54, %v3113_v55  ;;  %v3225_v5 = vld [vmem:[%s6385_s1 + $0x110] sm:$0xf0] }
  0x36   : > { %1521 = vmatpush.bf16.msrb.mxu0 %v3688_v0  ;;  %v489_v28 = vunpack.c.l.b16 %v282_v26  ;;  %v490_v30 = vunpack.c.h.b16 %v282_v26  ;;  %v3639_v33 = vld [vmem:[%s6385_s1 + $0x440] sm:$0xf]  ;;  %v4385_v37 = vld [vmem:[%s6385_s1 + $0x54c] sm:$0xf0]  ;;  %v4215_v1 = vld [vmem:[%s6385_s1 + $0x4] sm:$0xf] }
  0x37   : > { %1534 = vmatpush.bf16.msrb.mxu1 %v3816_v2  ;;  %v3767_v35 = vld [vmem:[%s6385_s1 + $0x540] sm:$0xf]  ;;  %v3640_v46 = vor.u32 %v4353_v34, %v3639_v33  ;;  %v4349_v50 = vld [vmem:[%s6385_s1 + $0x42c] sm:$0xf0]  ;;  %v3244_v2 = vor.u32 %v4251_v56, %v3241_v57  ;;  %v4247_v4 = vld [vmem:[%s6385_s1 + $0x104] sm:$0xf] }
  0x38   : > { %1547 = vmatpush.bf16.msrb.mxu2 %v3180_v3  ;;  %v4978_v41 = vpack.c.b16 %v489_v28, %v489_v28  ;;  %v4988_v45 = vpack.c.b16 %v490_v30, %v490_v30  ;;  %v3768_v47 = vor.u32 %v4385_v37, %v3767_v35  ;;  %v3623_v49 = vld [vmem:[%s6385_s1 + $0x420] sm:$0xf]  ;;  %v4381_v53 = vld [vmem:[%s6385_s1 + $0x52c] sm:$0xf0]  ;;  %v3097_v3 = vld [vmem:[%s6385_s1 + $0x10] sm:$0xf0]  ;;  %v3228_v18 = vor.u32 %v4247_v4, %v3225_v5 }
  0x39   : > { %1560 = vmatpush.bf16.msrb.mxu3 %v3308_v7  ;;  %v3751_v51 = vld [vmem:[%s6385_s1 + $0x520] sm:$0xf]  ;;  %v3624_v58 = vor.u32 %v4349_v50, %v3623_v49  ;;  %v4345_v60 = vld [vmem:[%s6385_s1 + $0x40c] sm:$0xf0]  ;;  %v4307_v6 = vld [vmem:[%s6385_s1 + $0x2e4] sm:$0xf]  ;;  %v3100_v14 = vor.u32 %v4215_v1, %v3097_v3 }
  0x3a   : > { %1522 = vmatpush.bf16.msrb.mxu0 %v3672_v12  ;;  %1488 = vmatmul.bf16.vlgmr.msra.gmra.mxu1 %v4988_v45  ;;  %v3607_v59 = vld [vmem:[%s6385_s1 + $0x400] sm:$0xf]  ;;  %v3752_v61 = vor.u32 %v4381_v53, %v3751_v51  ;;  %v4377_v0 = vld [vmem:[%s6385_s1 + $0x50c] sm:$0xf0]  ;;  %v3465_v7 = vld [vmem:[%s6385_s1 + $0x2f0] sm:$0xf0] }
  0x3b   : > { %1535 = vmatpush.bf16.msrb.mxu1 %v3800_v15  ;;  %1475 = vmatmul.bf16.vlgmr.msra.gmra.mxu0 %v4978_v41  ;;  %v3735_v63 = vld [vmem:[%s6385_s1 + $0x500] sm:$0xf]  ;;  %v4339_v8 = vld [vmem:[%s6385_s1 + $0x3e4] sm:$0xf]  ;;  %v3608_v9 = vor.u32 %v4345_v60, %v3607_v59  ;;  %v3593_v10 = vld [vmem:[%s6385_s1 + $0x3f0] sm:$0xf0] }
  0x3c   : > { %1548 = vmatpush.bf16.msrb.mxu2 %v3164_v16  ;;  %v4371_v11 = vld [vmem:[%s6385_s1 + $0x4e4] sm:$0xf]  ;;  %v3721_v12 = vld [vmem:[%s6385_s1 + $0x4f0] sm:$0xf0]  ;;  %v3736_v13 = vor.u32 %v4377_v0, %v3735_v63  ;;  %v3596_v20 = vor.u32 %v4339_v8, %v3593_v10 }
  0x3d   : > { %1561 = vmatpush.bf16.msrb.mxu3 %v3292_v19  ;;  %v4403_v15 = vld [vmem:[%s6385_s1 + $0x5e4] sm:$0xf]  ;;  %v3849_v16 = vld [vmem:[%s6385_s1 + $0x5f0] sm:$0xf0]  ;;  %v3468_v19 = vor.u32 %v4307_v6, %v3465_v7  ;;  %v3724_v21 = vor.u32 %v4371_v11, %v3721_v12 }
  0x3e   : > { %1523 = vmatpush.bf16.msrb.mxu0 %v3656_v23  ;;  %v284_v17 = vld [vmem:[%s4951_s23 + $0x10] sm:$0xff]  ;;  %v4303_v22 = vld [vmem:[%s6385_s1 + $0x2c4] sm:$0xf]  ;;  %v3852_v25 = vor.u32 %v4403_v15, %v3849_v16  ;;  %s4583_s23 = smov 96  }
  0x3f   : > { %1536 = vmatpush.bf16.msrb.mxu1 %v3784_v31  ;;  %v3449_v23 = vld [vmem:[%s6385_s1 + $0x2d0] sm:$0xf0]  ;;  %v4335_v24 = vld [vmem:[%s6385_s1 + $0x3c4] sm:$0xf]  ;;  %v493_v29 = vunpack.c.l.b16 %v284_v17 }
  0x40   : > { %1549 = vmatpush.bf16.msrb.mxu2 %v3148_v32  ;;  %v3577_v26 = vld [vmem:[%s6385_s1 + $0x3d0] sm:$0xf0]  ;;  %v4367_v27 = vld [vmem:[%s6385_s1 + $0x4c4] sm:$0xf]  ;;  %v494_v32 = vunpack.c.h.b16 %v284_v17  ;;  %v3452_v33 = vor.u32 %v4303_v22, %v3449_v23 }
  0x41   : > { %1562 = vmatpush.bf16.msrb.mxu3 %v3276_v36  ;;  %v3705_v28 = vld [vmem:[%s6385_s1 + $0x4d0] sm:$0xf0]  ;;  %v4399_v30 = vld [vmem:[%s6385_s1 + $0x5c4] sm:$0xf]  ;;  %v3580_v34 = vor.u32 %v4335_v24, %v3577_v26 }
  0x42   : > { %1524 = vmatpush.bf16.msrb.mxu0 %v3640_v46  ;;  %v3833_v31 = vld [vmem:[%s6385_s1 + $0x5d0] sm:$0xf0]  ;;  %v3708_v35 = vor.u32 %v4367_v27, %v3705_v28  ;;  %v4299_v36 = vld [vmem:[%s6385_s1 + $0x2a4] sm:$0xf]  ;;  %v5118_v50 = vpack.c.b16 %v494_v32, %v494_v32 }
  0x43   : > { %1537 = vmatpush.bf16.msrb.mxu1 %v3768_v47  ;;  %v3433_v37 = vld [vmem:[%s6385_s1 + $0x2b0] sm:$0xf0]  ;;  %v4331_v38 = vld [vmem:[%s6385_s1 + $0x3a4] sm:$0xf]  ;;  %v3836_v39 = vor.u32 %v4399_v30, %v3833_v31  ;;  %v5109_v47 = vpack.c.b16 %v493_v29, %v493_v29 }
  0x44   : > { %1550 = vmatpush.bf16.msrb.mxu2 %v3132_v48  ;;  %v3561_v42 = vld [vmem:[%s6385_s1 + $0x3b0] sm:$0xf0]  ;;  %v4363_v43 = vld [vmem:[%s6385_s1 + $0x4a4] sm:$0xf]  ;;  %v3436_v51 = vor.u32 %v4299_v36, %v3433_v37 }
  0x45   : > { %1563 = vmatpush.bf16.msrb.mxu3 %v3260_v52  ;;  %v3689_v46 = vld [vmem:[%s6385_s1 + $0x4b0] sm:$0xf0]  ;;  %v4395_v48 = vld [vmem:[%s6385_s1 + $0x5a4] sm:$0xf]  ;;  %v3564_v52 = vor.u32 %v4331_v38, %v3561_v42 }
  0x46   : > { %1525 = vmatpush.bf16.msrb.mxu0 %v3624_v58  ;;  %v3817_v49 = vld [vmem:[%s6385_s1 + $0x5b0] sm:$0xf0]  ;;  %v3692_v53 = vor.u32 %v4363_v43, %v3689_v46  ;;  %v4295_v54 = vld [vmem:[%s6385_s1 + $0x284] sm:$0xf] }
  0x47   : > { %1538 = vmatpush.bf16.msrb.mxu1 %v3752_v61  ;;  %v3417_v55 = vld [vmem:[%s6385_s1 + $0x290] sm:$0xf0]  ;;  %v4327_v56 = vld [vmem:[%s6385_s1 + $0x384] sm:$0xf]  ;;  %v3820_v57 = vor.u32 %v4395_v48, %v3817_v49 }
  0x48   : > { %1551 = vmatpush.bf16.msrb.mxu2 %v3116_v62  ;;  %v3545_v58 = vld [vmem:[%s6385_s1 + $0x390] sm:$0xf0]  ;;  %v4359_v59 = vld [vmem:[%s6385_s1 + $0x484] sm:$0xf]  ;;  %v3420_v63 = vor.u32 %v4295_v54, %v3417_v55  ;;  %v4246_v54 = vld [vmem:[%s6385_s1 + $0xf4] sm:$0xf0] }
  0x49   : > { %1564 = vmatpush.bf16.msrb.mxu3 %v3244_v2  ;;  %v3673_v60 = vld [vmem:[%s6385_s1 + $0x490] sm:$0xf0]  ;;  %v4391_v61 = vld [vmem:[%s6385_s1 + $0x584] sm:$0xf]  ;;  %v3548_v0 = vor.u32 %v4327_v56, %v3545_v58  ;;  %v3343_v55 = vld [vmem:[%s6385_s1 + $0x1e8] sm:$0xf] }
  0x4a   : > { %1526 = vmatpush.bf16.msrb.mxu0 %v3608_v9  ;;  %v3801_v62 = vld [vmem:[%s6385_s1 + $0x590] sm:$0xf0]  ;;  %v3676_v1 = vor.u32 %v4359_v59, %v3673_v60  ;;  %v4291_v2 = vld [vmem:[%s6385_s1 + $0x264] sm:$0xf]  ;;  %v3471_v58 = vld [vmem:[%s6385_s1 + $0x2e8] sm:$0xf] }
  0x4b   : > { %1539 = vmatpush.bf16.msrb.mxu1 %v3736_v13  ;;  %v3401_v3 = vld [vmem:[%s6385_s1 + $0x270] sm:$0xf0]  ;;  %v4323_v4 = vld [vmem:[%s6385_s1 + $0x364] sm:$0xf]  ;;  %v3804_v5 = vor.u32 %v4391_v61, %v3801_v62  ;;  %v4310_v59 = vld [vmem:[%s6385_s1 + $0x2f4] sm:$0xf0] }
  0x4c   : > { %1552 = vmatpush.bf16.msrb.mxu2 %v3100_v14  ;;  %v3529_v6 = vld [vmem:[%s6385_s1 + $0x370] sm:$0xf0]  ;;  %v4355_v7 = vld [vmem:[%s6385_s1 + $0x464] sm:$0xf]  ;;  %v3404_v11 = vor.u32 %v4291_v2, %v3401_v3  ;;  %v3599_v62 = vld [vmem:[%s6385_s1 + $0x3e8] sm:$0xf]  ;;  %v3472_v3 = vor.u32 %v4310_v59, %v3471_v58 }
  0x4d   : > { %1565 = vmatpush.bf16.msrb.mxu3 %v3228_v18  ;;  %1527 = vmatmul.bf16.vlgmr.msrb.gmra.mxu0 %v5109_v47  ;;  %v3657_v8 = vld [vmem:[%s6385_s1 + $0x470] sm:$0xf0]  ;;  %v4387_v9 = vld [vmem:[%s6385_s1 + $0x564] sm:$0xf]  ;;  %v3532_v12 = vor.u32 %v4323_v4, %v3529_v6  ;;  %v3199_v4 = vld [vmem:[%s6385_s1 + $0xc8] sm:$0xf] }
  0x4e   : > { %1571 = vmatpush.bf16.msra.mxu0 %v3468_v19  ;;  %1540 = vmatmul.bf16.vlgmr.msrb.gmra.mxu1 %v5118_v50  ;;  %v3785_v10 = vld [vmem:[%s6385_s1 + $0x570] sm:$0xf0]  ;;  %v3660_v13 = vor.u32 %v4355_v7, %v3657_v8  ;;  %v4287_v14 = vld [vmem:[%s6385_s1 + $0x244] sm:$0xf]  ;;  %v3327_v6 = vld [vmem:[%s6385_s1 + $0x1c8] sm:$0xf] }
  0x4f   : > { %1584 = vmatpush.bf16.msra.mxu1 %v3596_v20  ;;  %1553 = vmatmul.bf16.vlgmr.msrb.gmra.mxu2 %v4978_v41  ;;  %v3385_v15 = vld [vmem:[%s6385_s1 + $0x250] sm:$0xf0]  ;;  %v4319_v16 = vld [vmem:[%s6385_s1 + $0x344] sm:$0xf]  ;;  %v3788_v17 = vor.u32 %v4387_v9, %v3785_v10  ;;  %v4274_v8 = vld [vmem:[%s6385_s1 + $0x1d4] sm:$0xf0] }
  0x50   : > { %1597 = vmatpush.bf16.msra.mxu2 %v3724_v21  ;;  %1566 = vmatmul.bf16.vlgmr.msrb.gmra.mxu3 %v4988_v45  ;;  %v3513_v18 = vld [vmem:[%s6385_s1 + $0x350] sm:$0xf0]  ;;  %v4351_v19 = vld [vmem:[%s6385_s1 + $0x444] sm:$0xf]  ;;  %v3388_v23 = vor.u32 %v4287_v14, %v3385_v15  ;;  %v3455_v9 = vld [vmem:[%s6385_s1 + $0x2c8] sm:$0xf]  ;;  %v3328_v14 = vor.u32 %v4274_v8, %v3327_v6 }
  0x51   : > { %1610 = vmatpush.bf16.msra.mxu3 %v3852_v25  ;;  %v3641_v20 = vld [vmem:[%s6385_s1 + $0x450] sm:$0xf0]  ;;  %v4383_v21 = vld [vmem:[%s6385_s1 + $0x544] sm:$0xf]  ;;  %v3516_v26 = vor.u32 %v4319_v16, %v3513_v18  ;;  %v4306_v10 = vld [vmem:[%s6385_s1 + $0x2d4] sm:$0xf0] }
  0x52   : > { %1572 = vmatpush.bf16.msra.mxu0 %v3452_v33  ;;  %v3769_v22 = vld [vmem:[%s6385_s1 + $0x550] sm:$0xf0]  ;;  %v4283_v24 = vld [vmem:[%s6385_s1 + $0x224] sm:$0xf]  ;;  %v3644_v27 = vor.u32 %v4351_v19, %v3641_v20  ;;  %v3456_v15 = vor.u32 %v4306_v10, %v3455_v9  ;;  %v3183_v16 = vld [vmem:[%s6385_s1 + $0xa8] sm:$0xf] }
  0x53   : > { %1585 = vmatpush.bf16.msra.mxu1 %v3580_v34  ;;  %v3369_v25 = vld [vmem:[%s6385_s1 + $0x230] sm:$0xf0]  ;;  %v4315_v28 = vld [vmem:[%s6385_s1 + $0x324] sm:$0xf]  ;;  %v3772_v31 = vor.u32 %v4383_v21, %v3769_v22  ;;  %v3311_v18 = vld [vmem:[%s6385_s1 + $0x1a8] sm:$0xf] }
  0x54   : > { %1598 = vmatpush.bf16.msra.mxu2 %v3708_v35  ;;  %v3497_v29 = vld [vmem:[%s6385_s1 + $0x330] sm:$0xf0]  ;;  %v4347_v30 = vld [vmem:[%s6385_s1 + $0x424] sm:$0xf]  ;;  %v3372_v35 = vor.u32 %v4283_v24, %v3369_v25  ;;  %v4270_v20 = vld [vmem:[%s6385_s1 + $0x1b4] sm:$0xf0] }
  0x55   : > { %1611 = vmatpush.bf16.msra.mxu3 %v3836_v39  ;;  %v3625_v32 = vld [vmem:[%s6385_s1 + $0x430] sm:$0xf0]  ;;  %v4379_v33 = vld [vmem:[%s6385_s1 + $0x524] sm:$0xf]  ;;  %v3500_v38 = vor.u32 %v4315_v28, %v3497_v29  ;;  %v3439_v21 = vld [vmem:[%s6385_s1 + $0x2a8] sm:$0xf] }
  0x56   : > { %1573 = vmatpush.bf16.msra.mxu0 %v3436_v51  ;;  %v3753_v34 = vld [vmem:[%s6385_s1 + $0x530] sm:$0xf0]  ;;  %v4279_v36 = vld [vmem:[%s6385_s1 + $0x204] sm:$0xf]  ;;  %v3628_v39 = vor.u32 %v4347_v30, %v3625_v32  ;;  %v4302_v22 = vld [vmem:[%s6385_s1 + $0x2b4] sm:$0xf0] }
  0x57   : > { %1586 = vmatpush.bf16.msra.mxu1 %v3564_v52  ;;  %v3353_v37 = vld [vmem:[%s6385_s1 + $0x210] sm:$0xf0]  ;;  %v4311_v42 = vld [vmem:[%s6385_s1 + $0x304] sm:$0xf]  ;;  %v3756_v48 = vor.u32 %v4379_v33, %v3753_v34  ;;  %v4334_v24 = vld [vmem:[%s6385_s1 + $0x3b4] sm:$0xf0] }
  0x58   : > { %1599 = vmatpush.bf16.msra.mxu2 %v3692_v53  ;;  %v3481_v43 = vld [vmem:[%s6385_s1 + $0x310] sm:$0xf0]  ;;  %v4343_v46 = vld [vmem:[%s6385_s1 + $0x404] sm:$0xf]  ;;  %v3215_v53 = vld [vmem:[%s6385_s1 + $0xe8] sm:$0xf]  ;;  %v3356_v56 = vor.u32 %v4279_v36, %v3353_v37 }
  0x59   : > { %1612 = vmatpush.bf16.msra.mxu3 %v3820_v57  ;;  %v3609_v49 = vld [vmem:[%s6385_s1 + $0x410] sm:$0xf0]  ;;  %v4375_v51 = vld [vmem:[%s6385_s1 + $0x504] sm:$0xf]  ;;  %v4278_v57 = vld [vmem:[%s6385_s1 + $0x1f4] sm:$0xf0]  ;;  %v3484_v60 = vor.u32 %v4311_v42, %v3481_v43 }
  0x5a   : > { %1574 = vmatpush.bf16.msra.mxu0 %v3420_v63  ;;  %v3737_v52 = vld [vmem:[%s6385_s1 + $0x510] sm:$0xf0]  ;;  %v3612_v61 = vor.u32 %v4343_v46, %v3609_v49  ;;  %v4342_v63 = vld [vmem:[%s6385_s1 + $0x3f4] sm:$0xf0]  ;;  %v3344_v2 = vor.u32 %v4278_v57, %v3343_v55  ;;  %v3167_v28 = vld [vmem:[%s6385_s1 + $0x88] sm:$0xf] }
  0x5b   : > { %1587 = vmatpush.bf16.msra.mxu1 %v3548_v0  ;;  %v3740_v0 = vor.u32 %v4375_v51, %v3737_v52  ;;  %v3600_v7 = vor.u32 %v4342_v63, %v3599_v62  ;;  %v4234_v29 = vld [vmem:[%s6385_s1 + $0x94] sm:$0xf0]  ;;  %v3295_v30 = vld [vmem:[%s6385_s1 + $0x188] sm:$0xf] }
  0x5c   : > { %1600 = vmatpush.bf16.msra.mxu2 %v3676_v1  ;;  %v3216_v1 = vor.u32 %v4246_v54, %v3215_v53  ;;  %v4266_v32 = vld [vmem:[%s6385_s1 + $0x194] sm:$0xf0]  ;;  %v3423_v33 = vld [vmem:[%s6385_s1 + $0x288] sm:$0xf]  ;;  %v3168_v37 = vor.u32 %v4234_v29, %v3167_v28 }
  0x5d   : > { %1613 = vmatpush.bf16.msra.mxu3 %v3804_v5  ;;  %v4242_v5 = vld [vmem:[%s6385_s1 + $0xd4] sm:$0xf0]  ;;  %v3151_v42 = vld [vmem:[%s6385_s1 + $0x68] sm:$0xf] }
  0x5e   : > { %1575 = vmatpush.bf16.msra.mxu0 %v3404_v11  ;;  %v3583_v11 = vld [vmem:[%s6385_s1 + $0x3c8] sm:$0xf]  ;;  %v4298_v34 = vld [vmem:[%s6385_s1 + $0x294] sm:$0xf0] }
  0x5f   : > { %1588 = vmatpush.bf16.msra.mxu1 %v3532_v12  ;;  %v4338_v12 = vld [vmem:[%s6385_s1 + $0x3d4] sm:$0xf0]  ;;  %v3279_v46 = vld [vmem:[%s6385_s1 + $0x168] sm:$0xf] }
  0x60   : > { %1601 = vmatpush.bf16.msra.mxu2 %v3660_v13  ;;  %v3200_v13 = vor.u32 %v4242_v5, %v3199_v4  ;;  %v3584_v19 = vor.u32 %v4338_v12, %v3583_v11  ;;  %v4330_v36 = vld [vmem:[%s6385_s1 + $0x394] sm:$0xf0]  ;;  %v3407_v51 = vld [vmem:[%s6385_s1 + $0x268] sm:$0xf] }
  0x61   : > { %1614 = vmatpush.bf16.msra.mxu3 %v3788_v17  ;;  %v4238_v17 = vld [vmem:[%s6385_s1 + $0xb4] sm:$0xf0]  ;;  %v3535_v53 = vld [vmem:[%s6385_s1 + $0x368] sm:$0xf] }
  0x62   : > { %1576 = vmatpush.bf16.msra.mxu0 %v3388_v23  ;;  %v3567_v23 = vld [vmem:[%s6385_s1 + $0x3a8] sm:$0xf]  ;;  %v3184_v25 = vor.u32 %v4238_v17, %v3183_v16  ;;  %v4230_v43 = vld [vmem:[%s6385_s1 + $0x74] sm:$0xf0] }
  0x63   : > { %1589 = vmatpush.bf16.msra.mxu1 %v3516_v26  ;;  %v3312_v26 = vor.u32 %v4270_v20, %v3311_v18  ;;  %v4262_v49 = vld [vmem:[%s6385_s1 + $0x174] sm:$0xf0]  ;;  %v3152_v55 = vor.u32 %v4230_v43, %v3151_v42  ;;  %v3135_v58 = vld [vmem:[%s6385_s1 + $0x48] sm:$0xf] }
  0x64   : > { %1602 = vmatpush.bf16.msra.mxu2 %v3644_v27  ;;  %v3440_v27 = vor.u32 %v4302_v22, %v3439_v21  ;;  %v4294_v52 = vld [vmem:[%s6385_s1 + $0x274] sm:$0xf0]  ;;  %v3391_v63 = vld [vmem:[%s6385_s1 + $0x248] sm:$0xf] }
  0x65   : > { %1615 = vmatpush.bf16.msra.mxu3 %v3772_v31  ;;  %v3568_v31 = vor.u32 %v4334_v24, %v3567_v23  ;;  %v4326_v54 = vld [vmem:[%s6385_s1 + $0x374] sm:$0xf0]  ;;  %v3408_v57 = vor.u32 %v4294_v52, %v3407_v51  ;;  %v3119_v6 = vld [vmem:[%s6385_s1 + $0x28] sm:$0xf] }
  0x66   : > { %1577 = vmatpush.bf16.msra.mxu0 %v3372_v35  ;;  %v3551_v35 = vld [vmem:[%s6385_s1 + $0x388] sm:$0xf]  ;;  %v4226_v59 = vld [vmem:[%s6385_s1 + $0x54] sm:$0xf0] }
  0x67   : > { %1590 = vmatpush.bf16.msra.mxu1 %v3500_v38  ;;  %v3296_v38 = vor.u32 %v4266_v32, %v3295_v30  ;;  %v4258_v62 = vld [vmem:[%s6385_s1 + $0x154] sm:$0xf0]  ;;  %v3247_v8 = vld [vmem:[%s6385_s1 + $0x128] sm:$0xf]  ;;  %v4244_v32 = vld [vmem:[%s6385_s1 + $0xec] sm:$0xf] }
  0x68   : > { %1603 = vmatpush.bf16.msra.mxu2 %v3628_v39  ;;  %v3424_v39 = vor.u32 %v4298_v34, %v3423_v33  ;;  %v4254_v10 = vld [vmem:[%s6385_s1 + $0x134] sm:$0xf0]  ;;  %v3375_v11 = vld [vmem:[%s6385_s1 + $0x228] sm:$0xf]  ;;  %v3217_v33 = vld [vmem:[%s6385_s1 + $0xf8] sm:$0xf0] }
  0x69   : > { %1616 = vmatpush.bf16.msra.mxu3 %v3756_v48  ;;  %v3552_v48 = vor.u32 %v4330_v36, %v3551_v35  ;;  %v4286_v12 = vld [vmem:[%s6385_s1 + $0x234] sm:$0xf0]  ;;  %v3103_v16 = vld [vmem:[%s6385_s1 + $0x8] sm:$0xf]  ;;  %v3248_v18 = vor.u32 %v4254_v10, %v3247_v8  ;;  %v4276_v36 = vld [vmem:[%s6385_s1 + $0x1ec] sm:$0xf]  ;;  %v3220_v43 = vor.u32 %v4244_v32, %v3217_v33 }
  0x6a   : > { %1578 = vmatpush.bf16.msra.mxu0 %v3356_v56  ;;  %v3280_v56 = vor.u32 %v4262_v49, %v3279_v46  ;;  %v4218_v17 = vld [vmem:[%s6385_s1 + $0x14] sm:$0xf0]  ;;  %v3231_v20 = vld [vmem:[%s6385_s1 + $0x108] sm:$0xf] }
  0x6b   : > { %1591 = vmatpush.bf16.msra.mxu1 %v3484_v60  ;;  %v3263_v60 = vld [vmem:[%s6385_s1 + $0x148] sm:$0xf]  ;;  %v4250_v21 = vld [vmem:[%s6385_s1 + $0x114] sm:$0xf0]  ;;  %v3104_v30 = vor.u32 %v4218_v17, %v3103_v16  ;;  %v3297_v16 = vld [vmem:[%s6385_s1 + $0x198] sm:$0xf0] }
  0x6c   : > { %1604 = vmatpush.bf16.msra.mxu2 %v3612_v61  ;;  %v3536_v61 = vor.u32 %v4326_v54, %v3535_v53  ;;  %v3264_v4 = vor.u32 %v4258_v62, %v3263_v60  ;;  %v3359_v22 = vld [vmem:[%s6385_s1 + $0x208] sm:$0xf]  ;;  %v4282_v24 = vld [vmem:[%s6385_s1 + $0x214] sm:$0xf0]  ;;  %v3232_v34 = vor.u32 %v4250_v21, %v3231_v20  ;;  %v4240_v53 = vld [vmem:[%s6385_s1 + $0xcc] sm:$0xf] }
  0x6d   : > { %1617 = vmatpush.bf16.msra.mxu3 %v3740_v0  ;;  %1579 = vmatmul.bf16.vlgmr.msra.gmra.mxu0 %v4976_v40  ;;  %v4290_v0 = vld [vmem:[%s6385_s1 + $0x254] sm:$0xf0]  ;;  %v3855_v29 = vld [vmem:[%s6385_s1 + $0x5e8] sm:$0xf]  ;;  %v3360_v35 = vor.u32 %v4282_v24, %v3359_v22  ;;  %v3201_v54 = vld [vmem:[%s6385_s1 + $0xd8] sm:$0xf0] }
  0x6e   : > { %1623 = vmatpush.bf16.msrb.mxu0 %v3216_v1  ;;  %1592 = vmatmul.bf16.vlgmr.msra.gmra.mxu1 %v4986_v44  ;;  %v3519_v1 = vld [vmem:[%s6385_s1 + $0x348] sm:$0xf]  ;;  %v3392_v5 = vor.u32 %v4290_v0, %v3391_v63  ;;  %v4374_v28 = vld [vmem:[%s6385_s1 + $0x4f4] sm:$0xf0] }
  0x6f   : > { %1636 = vmatpush.bf16.msrb.mxu1 %v3344_v2  ;;  %1605 = vmatmul.bf16.vlgmr.msra.gmra.mxu2 %v5109_v47  ;;  %v4322_v2 = vld [vmem:[%s6385_s1 + $0x354] sm:$0xf0]  ;;  %v3711_v46 = vld [vmem:[%s6385_s1 + $0x4c8] sm:$0xf] }
  0x70   : > { %1649 = vmatpush.bf16.msrb.mxu2 %v3472_v3  ;;  %1618 = vmatmul.bf16.vlgmr.msra.gmra.mxu3 %v5118_v50  ;;  %v3136_v3 = vor.u32 %v4226_v59, %v3135_v58  ;;  %v3520_v9 = vor.u32 %v4322_v2, %v3519_v1  ;;  %v3839_v49 = vld [vmem:[%s6385_s1 + $0x5c8] sm:$0xf]  ;;  %v4402_v52 = vld [vmem:[%s6385_s1 + $0x5d4] sm:$0xf0]  ;;  %v3204_v59 = vor.u32 %v4240_v53, %v3201_v54  ;;  %v4236_v1 = vld [vmem:[%s6385_s1 + $0xac] sm:$0xf] }
  0x71   : > { %1662 = vmatpush.bf16.msrb.mxu3 %v3600_v7  ;;  %v4222_v7 = vld [vmem:[%s6385_s1 + $0x34] sm:$0xf0]  ;;  %v3840_v58 = vor.u32 %v4402_v52, %v3839_v49  ;;  %v3695_v60 = vld [vmem:[%s6385_s1 + $0x4a8] sm:$0xf]  ;;  %v3185_v2 = vld [vmem:[%s6385_s1 + $0xb8] sm:$0xf0] }
  0x72   : > { %1624 = vmatpush.bf16.msrb.mxu0 %v3200_v13  ;;  %v3503_v13 = vld [vmem:[%s6385_s1 + $0x328] sm:$0xf]  ;;  %v4398_v0 = vld [vmem:[%s6385_s1 + $0x5b4] sm:$0xf0] }
  0x73   : > { %1637 = vmatpush.bf16.msrb.mxu1 %v3328_v14  ;;  %v4318_v14 = vld [vmem:[%s6385_s1 + $0x334] sm:$0xf0]  ;;  %v3823_v62 = vld [vmem:[%s6385_s1 + $0x5a8] sm:$0xf] }
  0x74   : > { %1650 = vmatpush.bf16.msrb.mxu2 %v3456_v15  ;;  %v3120_v15 = vor.u32 %v4222_v7, %v3119_v6  ;;  %v3504_v23 = vor.u32 %v4318_v14, %v3503_v13  ;;  %v3824_v6 = vor.u32 %v4398_v0, %v3823_v62  ;;  %v3188_v7 = vor.u32 %v4236_v1, %v3185_v2  ;;  %v3679_v8 = vld [vmem:[%s6385_s1 + $0x488] sm:$0xf]  ;;  %v4232_v13 = vld [vmem:[%s6385_s1 + $0x8c] sm:$0xf]  ;;  %v3169_v14 = vld [vmem:[%s6385_s1 + $0x98] sm:$0xf0] }
  0x75   : > { %1663 = vmatpush.bf16.msrb.mxu3 %v3584_v19  ;;  %v3376_v19 = vor.u32 %v4286_v12, %v3375_v11  ;;  %v3807_v10 = vld [vmem:[%s6385_s1 + $0x588] sm:$0xf]  ;;  %v4394_v12 = vld [vmem:[%s6385_s1 + $0x594] sm:$0xf0]  ;;  %v4216_v2 = vld [vmem:[%s6385_s1 + $0xc] sm:$0xf] }
  0x76   : > { %1625 = vmatpush.bf16.msrb.mxu0 %v3184_v25  ;;  %v3487_v25 = vld [vmem:[%s6385_s1 + $0x308] sm:$0xf]  ;;  %v4358_v21 = vld [vmem:[%s6385_s1 + $0x474] sm:$0xf0] }
  0x77   : > { %1638 = vmatpush.bf16.msrb.mxu1 %v3312_v26  ;;  %v4314_v26 = vld [vmem:[%s6385_s1 + $0x314] sm:$0xf0]  ;;  %v3663_v20 = vld [vmem:[%s6385_s1 + $0x468] sm:$0xf] }
  0x78   : > { %1651 = vmatpush.bf16.msrb.mxu2 %v3440_v27  ;;  %v3727_v27 = vld [vmem:[%s6385_s1 + $0x4e8] sm:$0xf]  ;;  %v4390_v24 = vld [vmem:[%s6385_s1 + $0x574] sm:$0xf0] }
  0x79   : > { %1664 = vmatpush.bf16.msrb.mxu3 %v3568_v31  ;;  %v4406_v31 = vld [vmem:[%s6385_s1 + $0x5f4] sm:$0xf0]  ;;  %v3791_v22 = vld [vmem:[%s6385_s1 + $0x568] sm:$0xf] }
  0x7a   : > { %1626 = vmatpush.bf16.msrb.mxu0 %v3168_v37  ;;  %v3345_v37 = vld [vmem:[%s6385_s1 + $0x1f8] sm:$0xf0]  ;;  %v3856_v42 = vor.u32 %v4406_v31, %v3855_v29  ;;  %v3664_v29 = vor.u32 %v4358_v21, %v3663_v20  ;;  %v3647_v32 = vld [vmem:[%s6385_s1 + $0x448] sm:$0xf]  ;;  %v4354_v33 = vld [vmem:[%s6385_s1 + $0x454] sm:$0xf0] }
  0x7b   : > { %1639 = vmatpush.bf16.msrb.mxu1 %v3296_v38  ;;  %v3488_v38 = vor.u32 %v4314_v26, %v3487_v25  ;;  %v3348_v51 = vor.u32 %v4276_v36, %v3345_v37  ;;  %v4228_v25 = vld [vmem:[%s6385_s1 + $0x6c] sm:$0xf]  ;;  %v3153_v26 = vld [vmem:[%s6385_s1 + $0x78] sm:$0xf0]  ;;  %v4386_v36 = vld [vmem:[%s6385_s1 + $0x554] sm:$0xf0] }
  0x7c   : > { %1652 = vmatpush.bf16.msrb.mxu2 %v3424_v39  ;;  %v3728_v39 = vor.u32 %v4374_v28, %v3727_v27  ;;  %v4260_v27 = vld [vmem:[%s6385_s1 + $0x16c] sm:$0xf]  ;;  %v3281_v28 = vld [vmem:[%s6385_s1 + $0x178] sm:$0xf0]  ;;  %v3156_v31 = vor.u32 %v4228_v25, %v3153_v26  ;;  %v3631_v49 = vld [vmem:[%s6385_s1 + $0x428] sm:$0xf] }
  0x7d   : > { %1665 = vmatpush.bf16.msrb.mxu3 %v3552_v48  ;;  %v4370_v48 = vld [vmem:[%s6385_s1 + $0x4d4] sm:$0xf0]  ;;  %v4224_v37 = vld [vmem:[%s6385_s1 + $0x4c] sm:$0xf]  ;;  %v3759_v52 = vld [vmem:[%s6385_s1 + $0x528] sm:$0xf] }
  0x7e   : > { %1627 = vmatpush.bf16.msrb.mxu0 %v3152_v55  ;;  %v4272_v55 = vld [vmem:[%s6385_s1 + $0x1cc] sm:$0xf]  ;;  %v4382_v54 = vld [vmem:[%s6385_s1 + $0x534] sm:$0xf0]  ;;  %v3743_v0 = vld [vmem:[%s6385_s1 + $0x508] sm:$0xf] }
  0x7f   : > { %1640 = vmatpush.bf16.msrb.mxu1 %v3280_v56  ;;  %v3329_v56 = vld [vmem:[%s6385_s1 + $0x1d8] sm:$0xf0]  ;;  %v3760_v62 = vor.u32 %v4382_v54, %v3759_v52  ;;  %v4378_v1 = vld [vmem:[%s6385_s1 + $0x514] sm:$0xf0] }
  0x80   : > { %1653 = vmatpush.bf16.msrb.mxu2 %v3408_v57  ;;  %v3712_v57 = vor.u32 %v4370_v48, %v3711_v46  ;;  %v3332_v63 = vor.u32 %v4272_v55, %v3329_v56  ;;  %v4220_v55 = vld [vmem:[%s6385_s1 + $0x2c] sm:$0xf]  ;;  %v3121_v56 = vld [vmem:[%s6385_s1 + $0x38] sm:$0xf0] }
  0x81   : > { %1666 = vmatpush.bf16.msrb.mxu3 %v3536_v61  ;;  %v4366_v61 = vld [vmem:[%s6385_s1 + $0x4b4] sm:$0xf0]  ;;  %v3585_v26 = vld [vmem:[%s6385_s1 + $0x3d8] sm:$0xf0] }
  0x82   : > { %1628 = vmatpush.bf16.msrb.mxu0 %v3136_v3  ;;  %v4268_v3 = vld [vmem:[%s6385_s1 + $0x1ac] sm:$0xf]  ;;  %v3425_v52 = vld [vmem:[%s6385_s1 + $0x298] sm:$0xf0] }
  0x83   : > { %1641 = vmatpush.bf16.msrb.mxu1 %v3264_v4  ;;  %v3313_v4 = vld [vmem:[%s6385_s1 + $0x1b8] sm:$0xf0] }
  0x84   : > { %1654 = vmatpush.bf16.msrb.mxu2 %v3392_v5  ;;  %v3696_v5 = vor.u32 %v4366_v61, %v3695_v60  ;;  %v3316_v11 = vor.u32 %v4268_v3, %v3313_v4  ;;  %v3615_v60 = vld [vmem:[%s6385_s1 + $0x408] sm:$0xf]  ;;  %v4346_v61 = vld [vmem:[%s6385_s1 + $0x414] sm:$0xf0]  ;;  %v3105_v4 = vld [vmem:[%s6385_s1 + $0x18] sm:$0xf0] }
  0x85   : > { %1667 = vmatpush.bf16.msrb.mxu3 %v3520_v9  ;;  %v4362_v9 = vld [vmem:[%s6385_s1 + $0x494] sm:$0xf0] }
  0x86   : > { %1629 = vmatpush.bf16.msrb.mxu0 %v3120_v15  ;;  %v4264_v15 = vld [vmem:[%s6385_s1 + $0x18c] sm:$0xf]  ;;  %v3680_v17 = vor.u32 %v4362_v9, %v3679_v8  ;;  %v3473_v8 = vld [vmem:[%s6385_s1 + $0x2f8] sm:$0xf0] }
  0x87   : > { %1642 = vmatpush.bf16.msrb.mxu1 %v3248_v18  ;;  %v3808_v18 = vor.u32 %v4394_v12, %v3807_v10  ;;  %v4340_v9 = vld [vmem:[%s6385_s1 + $0x3ec] sm:$0xf]  ;;  %v3616_v10 = vor.u32 %v4346_v61, %v3615_v60 }
  0x88   : > { %1655 = vmatpush.bf16.msrb.mxu2 %v3376_v19  ;;  %v3172_v19 = vor.u32 %v4232_v13, %v3169_v14  ;;  %v4372_v12 = vld [vmem:[%s6385_s1 + $0x4ec] sm:$0xf]  ;;  %v3729_v13 = vld [vmem:[%s6385_s1 + $0x4f8] sm:$0xf0]  ;;  %v3744_v14 = vor.u32 %v4378_v1, %v3743_v0 }
  0x89   : > { %1668 = vmatpush.bf16.msrb.mxu3 %v3504_v23  ;;  %v3300_v23 = vor.u32 %v4264_v15, %v3297_v16  ;;  %v3108_v15 = vor.u32 %v4216_v2, %v3105_v4  ;;  %v4404_v16 = vld [vmem:[%s6385_s1 + $0x5ec] sm:$0xf]  ;;  %v3732_v21 = vor.u32 %v4372_v12, %v3729_v13  ;;  %v3537_v2 = vld [vmem:[%s6385_s1 + $0x378] sm:$0xf0] }
  0x8a   : > { %1630 = vmatpush.bf16.msrb.mxu0 %v3104_v30  ;;  %v3792_v30 = vor.u32 %v4390_v24, %v3791_v22  ;;  %v4304_v22 = vld [vmem:[%s6385_s1 + $0x2cc] sm:$0xf]  ;;  %v3665_v4 = vld [vmem:[%s6385_s1 + $0x478] sm:$0xf0] }
  0x8b   : > { %1643 = vmatpush.bf16.msrb.mxu1 %v3232_v34  ;;  %v3775_v34 = vld [vmem:[%s6385_s1 + $0x548] sm:$0xf]  ;;  %v4336_v24 = vld [vmem:[%s6385_s1 + $0x3cc] sm:$0xf] }
  0x8c   : > { %1656 = vmatpush.bf16.msrb.mxu2 %v3360_v35  ;;  %v3284_v35 = vor.u32 %v4260_v27, %v3281_v28  ;;  %v3776_v46 = vor.u32 %v4386_v36, %v3775_v34  ;;  %v4368_v27 = vld [vmem:[%s6385_s1 + $0x4cc] sm:$0xf]  ;;  %v3713_v28 = vld [vmem:[%s6385_s1 + $0x4d8] sm:$0xf0] }
  0x8d   : > { %1669 = vmatpush.bf16.msrb.mxu3 %v3488_v38  ;;  %1631 = vmatmul.bf16.vlgmr.msrb.gmra.mxu0 %v4978_v41  ;;  %v3137_v38 = vld [vmem:[%s6385_s1 + $0x58] sm:$0xf0]  ;;  %v4300_v34 = vld [vmem:[%s6385_s1 + $0x2ac] sm:$0xf] }
  0x8e   : > { %1675 = vmatpush.bf16.msra.mxu0 %v3728_v39  ;;  %1644 = vmatmul.bf16.vlgmr.msrb.gmra.mxu1 %v4988_v45  ;;  %v4256_v39 = vld [vmem:[%s6385_s1 + $0x14c] sm:$0xf]  ;;  %v3140_v48 = vor.u32 %v4224_v37, %v3137_v38  ;;  %v3569_v38 = vld [vmem:[%s6385_s1 + $0x3b8] sm:$0xf0] }
  0x8f   : > { %1688 = vmatpush.bf16.msra.mxu1 %v3856_v42  ;;  %1657 = vmatmul.bf16.vlgmr.msrb.gmra.mxu2 %v4976_v40  ;;  %v3265_v42 = vld [vmem:[%s6385_s1 + $0x158] sm:$0xf0]  ;;  %v4332_v36 = vld [vmem:[%s6385_s1 + $0x3ac] sm:$0xf] }
  0x90   : > { %1701 = vmatpush.bf16.msra.mxu2 %v3220_v43  ;;  %1670 = vmatmul.bf16.vlgmr.msrb.gmra.mxu3 %v4986_v44  ;;  %v3648_v43 = vor.u32 %v4354_v33, %v3647_v32  ;;  %v3268_v53 = vor.u32 %v4256_v39, %v3265_v42  ;;  %v3588_v32 = vor.u32 %v4336_v24, %v3585_v26  ;;  %v4364_v39 = vld [vmem:[%s6385_s1 + $0x4ac] sm:$0xf]  ;;  %v3697_v42 = vld [vmem:[%s6385_s1 + $0x4b8] sm:$0xf0] }
  0x91   : > { %1714 = vmatpush.bf16.msra.mxu3 %v3348_v51  ;;  %v4350_v51 = vld [vmem:[%s6385_s1 + $0x434] sm:$0xf0]  ;;  %v3716_v33 = vor.u32 %v4368_v27, %v3713_v28  ;;  %v4324_v0 = vld [vmem:[%s6385_s1 + $0x36c] sm:$0xf]  ;;  %v3505_v26 = vld [vmem:[%s6385_s1 + $0x338] sm:$0xf0] }
  0x92   : > { %1676 = vmatpush.bf16.msra.mxu0 %v3712_v57  ;;  %v4252_v57 = vld [vmem:[%s6385_s1 + $0x12c] sm:$0xf]  ;;  %v3633_v28 = vld [vmem:[%s6385_s1 + $0x438] sm:$0xf0] }
  0x93   : > { %1689 = vmatpush.bf16.msra.mxu1 %v3840_v58  ;;  %v3249_v58 = vld [vmem:[%s6385_s1 + $0x138] sm:$0xf0]  ;;  %v4320_v12 = vld [vmem:[%s6385_s1 + $0x34c] sm:$0xf] }
  0x94   : > { %1702 = vmatpush.bf16.msra.mxu2 %v3204_v59  ;;  %v3632_v59 = vor.u32 %v4350_v51, %v3631_v49  ;;  %v3252_v3 = vor.u32 %v4252_v57, %v3249_v58  ;;  %v3572_v49 = vor.u32 %v4332_v36, %v3569_v38  ;;  %v3700_v51 = vor.u32 %v4364_v39, %v3697_v42  ;;  %v4392_v57 = vld [vmem:[%s6385_s1 + $0x58c] sm:$0xf]  ;;  %v3809_v58 = vld [vmem:[%s6385_s1 + $0x598] sm:$0xf0] }
  0x95   : > { %1715 = vmatpush.bf16.msra.mxu3 %v3332_v63  ;;  %v3124_v63 = vor.u32 %v4220_v55, %v3121_v56  ;;  %v4360_v55 = vld [vmem:[%s6385_s1 + $0x48c] sm:$0xf]  ;;  %v3681_v56 = vld [vmem:[%s6385_s1 + $0x498] sm:$0xf0]  ;;  %v3812_v1 = vor.u32 %v4392_v57, %v3809_v58 }
  0x96   : > { %1677 = vmatpush.bf16.msra.mxu0 %v3696_v5  ;;  %v4248_v5 = vld [vmem:[%s6385_s1 + $0x10c] sm:$0xf]  ;;  %v3684_v61 = vor.u32 %v4360_v55, %v3681_v56  ;;  %v3617_v42 = vld [vmem:[%s6385_s1 + $0x418] sm:$0xf0] }
  0x97   : > { %1690 = vmatpush.bf16.msra.mxu1 %v3824_v6  ;;  %v3233_v6 = vld [vmem:[%s6385_s1 + $0x118] sm:$0xf0]  ;;  %v4316_v24 = vld [vmem:[%s6385_s1 + $0x32c] sm:$0xf] }
  0x98   : > { %1703 = vmatpush.bf16.msra.mxu2 %v3188_v7  ;;  %v4308_v7 = vld [vmem:[%s6385_s1 + $0x2ec] sm:$0xf] }
  0x99   : > { %1716 = vmatpush.bf16.msra.mxu3 %v3316_v11  ;;  %v3601_v11 = vld [vmem:[%s6385_s1 + $0x3f8] sm:$0xf0]  ;;  %v4348_v27 = vld [vmem:[%s6385_s1 + $0x42c] sm:$0xf] }
  0x9a   : > { %1678 = vmatpush.bf16.msra.mxu0 %v3680_v17  ;;  %v3857_v17 = vld [vmem:[%s6385_s1 + $0x5f8] sm:$0xf0]  ;;  %v3604_v20 = vor.u32 %v4340_v9, %v3601_v11  ;;  %v4312_v36 = vld [vmem:[%s6385_s1 + $0x30c] sm:$0xf] }
  0x9b   : > { %1691 = vmatpush.bf16.msra.mxu1 %v3808_v18  ;;  %v3236_v18 = vor.u32 %v4248_v5, %v3233_v6  ;;  %v3860_v25 = vor.u32 %v4404_v16, %v3857_v17  ;;  %v4388_v5 = vld [vmem:[%s6385_s1 + $0x56c] sm:$0xf]  ;;  %v3793_v6 = vld [vmem:[%s6385_s1 + $0x578] sm:$0xf0] }
  0x9c   : > { %1704 = vmatpush.bf16.msra.mxu2 %v3172_v19  ;;  %v3476_v19 = vor.u32 %v4308_v7, %v3473_v8  ;;  %v3540_v8 = vor.u32 %v4324_v0, %v3537_v2  ;;  %v3393_v11 = vld [vmem:[%s6385_s1 + $0x258] sm:$0xf0]  ;;  %v3796_v13 = vor.u32 %v4388_v5, %v3793_v6  ;;  %v4384_v17 = vld [vmem:[%s6385_s1 + $0x54c] sm:$0xf]  ;;  %v3975_v0 = vld [vmem:[%s6386_s2 + $0xe0] sm:$0xf] }
  0x9d   : > { %1717 = vmatpush.bf16.msra.mxu3 %v3300_v23  ;;  %v3457_v23 = vld [vmem:[%s6385_s1 + $0x2d8] sm:$0xf0]  ;;  %v4344_v39 = vld [vmem:[%s6385_s1 + $0x40c] sm:$0xf]  ;;  %v3903_v5 = vld [vmem:[%s6386_s2 + $0x50] sm:$0xf] }
  0x9e   : > { %1679 = vmatpush.bf16.msra.mxu0 %v3664_v29  ;;  %v4400_v29 = vld [vmem:[%s6385_s1 + $0x5cc] sm:$0xf]  ;;  %v3649_v16 = vld [vmem:[%s6385_s1 + $0x458] sm:$0xf0]  ;;  %v3620_v56 = vor.u32 %v4344_v39, %v3617_v42  ;;  %v4418_v6 = vld [vmem:[%s6386_s2 + $0x54] sm:$0xf0] }
  0x9f   : > { %1692 = vmatpush.bf16.msra.mxu1 %v3792_v30  ;;  %v3841_v30 = vld [vmem:[%s6385_s1 + $0x5d8] sm:$0xf0]  ;;  %v3935_v42 = vld [vmem:[%s6386_s2 + $0x90] sm:$0xf] }
  0xa0   : > { %1705 = vmatpush.bf16.msra.mxu2 %v3156_v31  ;;  %v3460_v31 = vor.u32 %v4304_v22, %v3457_v23  ;;  %v3844_v37 = vor.u32 %v4400_v29, %v3841_v30  ;;  %v4284_v22 = vld [vmem:[%s6385_s1 + $0x22c] sm:$0xf]  ;;  %v3377_v23 = vld [vmem:[%s6385_s1 + $0x238] sm:$0xf0] }
  0xa1   : > { %1718 = vmatpush.bf16.msra.mxu3 %v3284_v35  ;;  %v3441_v35 = vld [vmem:[%s6385_s1 + $0x2b8] sm:$0xf0]  ;;  %v4380_v29 = vld [vmem:[%s6385_s1 + $0x52c] sm:$0xf] }
  0xa2   : > { %1680 = vmatpush.bf16.msra.mxu0 %v3648_v43  ;;  %v4396_v43 = vld [vmem:[%s6385_s1 + $0x5ac] sm:$0xf]  ;;  %v3761_v30 = vld [vmem:[%s6385_s1 + $0x538] sm:$0xf0] }
  0xa3   : > { %1693 = vmatpush.bf16.msra.mxu1 %v3776_v46  ;;  %v3825_v46 = vld [vmem:[%s6385_s1 + $0x5b8] sm:$0xf0]  ;;  %v3764_v38 = vor.u32 %v4380_v29, %v3761_v30  ;;  %v4412_v29 = vld [vmem:[%s6386_s2 + $0x24] sm:$0xf0] }
  0xa4   : > { %1706 = vmatpush.bf16.msra.mxu2 %v3140_v48  ;;  %v3444_v48 = vor.u32 %v4300_v34, %v3441_v35  ;;  %v3828_v54 = vor.u32 %v4396_v43, %v3825_v46  ;;  %v3636_v34 = vor.u32 %v4348_v27, %v3633_v28  ;;  %v3361_v35 = vld [vmem:[%s6385_s1 + $0x218] sm:$0xf0]  ;;  %v4376_v43 = vld [vmem:[%s6385_s1 + $0x50c] sm:$0xf]  ;;  %v3879_v28 = vld [vmem:[%s6386_s2 + $0x20] sm:$0xf] }
  0xa5   : > { %1719 = vmatpush.bf16.msra.mxu3 %v3268_v53  ;;  %v4328_v53 = vld [vmem:[%s6385_s1 + $0x38c] sm:$0xf]  ;;  %v3745_v46 = vld [vmem:[%s6385_s1 + $0x518] sm:$0xf0] }
  0xa6   : > { %1681 = vmatpush.bf16.msra.mxu0 %v3632_v59  ;;  %v3748_v57 = vor.u32 %v4376_v43, %v3745_v46  ;;  %v4426_v43 = vld [vmem:[%s6386_s2 + $0x94] sm:$0xf0] }
  0xa7   : > { %1694 = vmatpush.bf16.msra.mxu1 %v3760_v62  ;;  %v4292_v62 = vld [vmem:[%s6385_s1 + $0x26c] sm:$0xf] }
  0xa8   : > { %1707 = vmatpush.bf16.msra.mxu2 %v3124_v63  ;;  %v3409_v63 = vld [vmem:[%s6385_s1 + $0x278] sm:$0xf0] }
  0xa9   : > { %1720 = vmatpush.bf16.msra.mxu3 %v3252_v3  ;;  %v4356_v3 = vld [vmem:[%s6385_s1 + $0x46c] sm:$0xf]  ;;  %v3412_v7 = vor.u32 %v4292_v62, %v3409_v63 }
  0xaa   : > { %1682 = vmatpush.bf16.msra.mxu0 %v3616_v10  ;;  %v3668_v9 = vor.u32 %v4356_v3, %v3665_v4  ;;  %v4288_v10 = vld [vmem:[%s6385_s1 + $0x24c] sm:$0xf] }
  0xab   : > { %1695 = vmatpush.bf16.msra.mxu1 %v3744_v14  ;;  %v3521_v14 = vld [vmem:[%s6385_s1 + $0x358] sm:$0xf0] }
  0xac   : > { %1708 = vmatpush.bf16.msra.mxu2 %v3108_v15  ;;  %v4352_v15 = vld [vmem:[%s6385_s1 + $0x44c] sm:$0xf] }
  0xad   : > { %1721 = vmatpush.bf16.msra.mxu3 %v3236_v18  ;;  %1683 = vmatmul.bf16.vlgmr.msra.gmra.mxu0 %v5109_v47  ;;  %v3777_v18 = vld [vmem:[%s6385_s1 + $0x558] sm:$0xf0] }
  0xae   : > { %1727 = vmatpush.bf16.msrb.mxu0 %v3476_v19  ;;  %1696 = vmatmul.bf16.vlgmr.msra.gmra.mxu1 %v5118_v50  ;;  %v3396_v19 = vor.u32 %v4288_v10, %v3393_v11  ;;  %v4434_v10 = vld [vmem:[%s6386_s2 + $0xd4] sm:$0xf0]  ;;  %v3904_v11 = vor.u32 %v4418_v6, %v3903_v5  ;;  %v4435_v6 = vld [vmem:[%s6386_s2 + $0xe4] sm:$0xf] }
  0xaf   : > { %1740 = vmatpush.bf16.msrb.mxu1 %v3604_v20  ;;  %1709 = vmatmul.bf16.vlgmr.msra.gmra.mxu2 %v4978_v41  ;;  %v4296_v41 = vld [vmem:[%s6385_s1 + $0x28c] sm:$0xf]  ;;  %v3524_v20 = vor.u32 %v4320_v12, %v3521_v14 }
  0xb0   : > { %1753 = vmatpush.bf16.msrb.mxu2 %v3732_v21  ;;  %1722 = vmatmul.bf16.vlgmr.msra.gmra.mxu3 %v4988_v45  ;;  %v3553_v45 = vld [vmem:[%s6385_s1 + $0x398] sm:$0xf0]  ;;  %v3428_v59 = vor.u32 %v4296_v41, %v3425_v52  ;;  %v3652_v21 = vor.u32 %v4352_v15, %v3649_v16  ;;  %v5840_v52 = vld [vmem:[%s6390_s6] sm:$0xf] }
  0xb1   : > { %1766 = vmatpush.bf16.msrb.mxu3 %v3860_v25  ;;  %v3556_v60 = vor.u32 %v4328_v53, %v3553_v45  ;;  %v3780_v25 = vor.u32 %v4384_v17, %v3777_v18  ;;  %v4438_v45 = vld [vmem:[%s6386_s2 + $0xf4] sm:$0xf0]  ;;  %v3959_v15 = vld [vmem:[%s6386_s2 + $0xc0] sm:$0xf]  ;;  %v479_v5 = vperm.slane %v5840_v52, 1 }
  0xb2   : > { %1728 = vmatpush.bf16.msrb.mxu0 %v3460_v31  ;;  %v3380_v31 = vor.u32 %v4284_v22, %v3377_v23  ;;  %v3951_v22 = vld [vmem:[%s6386_s2 + $0xb0] sm:$0xf]  ;;  %v4430_v23 = vld [vmem:[%s6386_s2 + $0xb4] sm:$0xf0] }
  0xb3   : > { %1741 = vmatpush.bf16.msrb.mxu1 %v3588_v32  ;;  %v4280_v32 = vld [vmem:[%s6385_s1 + $0x20c] sm:$0xf]  ;;  %v3952_v30 = vor.u32 %v4430_v23, %v3951_v22 }
  0xb4   : > { %1754 = vmatpush.bf16.msrb.mxu2 %v3716_v33  ;;  %v3508_v33 = vor.u32 %v4316_v24, %v3505_v26  ;;  %v3364_v41 = vor.u32 %v4280_v32, %v3361_v35  ;;  %v1502_v62 = vpop.f32.mrf.mxu2  ;;  %v3943_v32 = vld [vmem:[%s6386_s2 + $0xa0] sm:$0xf]  ;;  %v3897_v22 = vld [vmem:[%s6386_s2 + $0x48] sm:$0xf0] }
  0xb5   : > { %1767 = vmatpush.bf16.msrb.mxu3 %v3844_v37  ;;  %v3489_v37 = vld [vmem:[%s6385_s1 + $0x318] sm:$0xf0]  ;;  %v1515_v3 = vpop.f32.mrf.mxu3 }
  0xb6   : > { %1729 = vmatpush.bf16.msrb.mxu0 %v3444_v48  ;;  %v3919_v48 = vld [vmem:[%s6386_s2 + $0x70] sm:$0xf]  ;;  %v3492_v55 = vor.u32 %v4312_v36, %v3489_v37  ;;  %v4410_v37 = vld [vmem:[%s6386_s2 + $0x14] sm:$0xf0] }
  0xb7   : > { %1742 = vmatpush.bf16.msrb.mxu1 %v3572_v49  ;;  %v4422_v49 = vld [vmem:[%s6386_s2 + $0x74] sm:$0xf0]  ;;  %v1489_v53 = vpop.f32.mrf.mxu1  ;;  %v3871_v36 = vld [vmem:[%s6386_s2 + $0x10] sm:$0xf] }
  0xb8   : > { %1755 = vmatpush.bf16.msrb.mxu2 %v3700_v51  ;;  %v1476_v51 = vpop.f32.mrf.mxu0  ;;  %v3920_v58 = vor.u32 %v4422_v49, %v3919_v48  ;;  %v3872_v48 = vor.u32 %v4410_v37, %v3871_v36  ;;  %v4429_v37 = vld [vmem:[%s6386_s2 + $0xb4] sm:$0xf] }
  0xb9   : > { %1768 = vmatpush.bf16.msrb.mxu3 %v3828_v54  ;;  %v3983_v54 = vld [vmem:[%s6386_s2 + $0xf0] sm:$0xf] }
  0xba   : > { %1730 = vmatpush.bf16.msrb.mxu0 %v3428_v59  ;;  %v478_v59 = vperm.slane %v5840_v52, 0  ;;  %v3984_v63 = vor.u32 %v4438_v45, %v3983_v54  ;;  %v4421_v54 = vld [vmem:[%s6386_s2 + $0x74] sm:$0xf]  ;;  %v3936_v45 = vor.u32 %v4426_v43, %v3935_v42  ;;  %v4015_v42 = vld [vmem:[%s6386_s2 + $0x130] sm:$0xf] }
  0xbb   : > { %1743 = vmatpush.bf16.msrb.mxu1 %v3556_v60  ;;  %v3911_v60 = vld [vmem:[%s6386_s2 + $0x60] sm:$0xf]  ;;  %v4446_v43 = vld [vmem:[%s6386_s2 + $0x134] sm:$0xf0] }
  0xbc   : > { %1756 = vmatpush.bf16.msrb.mxu2 %v3684_v61  ;;  %v4420_v61 = vld [vmem:[%s6386_s2 + $0x64] sm:$0xf0]  ;;  %v1477_v4 = vadd.f32 %v1476_v51, %v478_v59  ;;  %v4437_v59 = vld [vmem:[%s6386_s2 + $0xf4] sm:$0xf] }
  0xbd   : > { %1769 = vmatpush.bf16.msrb.mxu3 %v3812_v1  ;;  %v4436_v1 = vld [vmem:[%s6386_s2 + $0xe4] sm:$0xf0]  ;;  %v3912_v2 = vor.u32 %v4420_v61, %v3911_v60  ;;  %v1517_v17 = vpop.f32.mrf.mxu3  ;;  %v3985_v60 = vld [vmem:[%s6386_s2 + $0xf8] sm:$0xf0] }
  0xbe   : > { %1731 = vmatpush.bf16.msrb.mxu0 %v3412_v7  ;;  %v1490_v12 = vadd.f32 %v1489_v53, %v1477_v4  ;;  %v4408_v53 = vld [vmem:[%s6386_s2 + $0x4] sm:$0xf0]  ;;  %v3988_v4 = vor.u32 %v4437_v59, %v3985_v60 }
  0xbf   : > { %1744 = vmatpush.bf16.msrb.mxu1 %v3540_v8  ;;  %v3976_v8 = vor.u32 %v4436_v1, %v3975_v0  ;;  %v4419_v1 = vld [vmem:[%s6386_s2 + $0x64] sm:$0xf]  ;;  %v4444_v59 = vld [vmem:[%s6386_s2 + $0x124] sm:$0xf0] }
  0xc0   : > { %1757 = vmatpush.bf16.msrb.mxu2 %v3668_v9  ;;  %v1478_v7 = vpop.f32.mrf.mxu0  ;;  %v1491_v9 = vpop.f32.mrf.mxu1  ;;  %v1503_v18 = vadd.f32 %v1502_v62, %v1490_v12  ;;  %v4039_v12 = vld [vmem:[%s6386_s2 + $0x160] sm:$0xf] }
  0xc1   : > { %1770 = vmatpush.bf16.msrb.mxu3 %v3796_v13  ;;  %v1504_v13 = vpop.f32.mrf.mxu2  ;;  %v3977_v7 = vld [vmem:[%s6386_s2 + $0xe8] sm:$0xf0]  ;;  %v4454_v9 = vld [vmem:[%s6386_s2 + $0x174] sm:$0xf0] }
  0xc2   : > { %1732 = vmatpush.bf16.msrb.mxu0 %v3396_v19  ;;  %v3887_v19 = vld [vmem:[%s6386_s2 + $0x30] sm:$0xf]  ;;  %v1516_v27 = vadd.f32 %v1515_v3, %v1503_v18  ;;  %v3905_v13 = vld [vmem:[%s6386_s2 + $0x58] sm:$0xf0] }
  0xc3   : > { %1745 = vmatpush.bf16.msrb.mxu1 %v3524_v20  ;;  %v4414_v20 = vld [vmem:[%s6386_s2 + $0x34] sm:$0xf0]  ;;  %v4031_v18 = vld [vmem:[%s6386_s2 + $0x150] sm:$0xf] }
  0xc4   : > { %1758 = vmatpush.bf16.msrb.mxu2 %v3652_v21 }
  0xc5   : > { %1771 = vmatpush.bf16.msrb.mxu3 %v3780_v25  ;;  %v3888_v25 = vor.u32 %v4414_v20, %v3887_v19  ;;  %v4450_v19 = vld [vmem:[%s6386_s2 + $0x154] sm:$0xf0] }
  0xc6   : > { %1733 = vmatpush.bf16.msrb.mxu0 %v3380_v31 }
  0xc7   : > { %1746 = vmatpush.bf16.msrb.mxu1 %v3508_v33  ;;  %v4428_v33 = vld [vmem:[%s6386_s2 + $0xa4] sm:$0xf0] }
  0xc8   : > { %1759 = vmatpush.bf16.msrb.mxu2 %v3636_v34  ;;  %v3880_v34 = vor.u32 %v4412_v29, %v3879_v28  ;;  %v4023_v28 = vld [vmem:[%s6386_s2 + $0x140] sm:$0xf]  ;;  %v4448_v29 = vld [vmem:[%s6386_s2 + $0x144] sm:$0xf0] }
  0xc9   : > { %1772 = vmatpush.bf16.msrb.mxu3 %v3764_v38  ;;  %v3944_v38 = vor.u32 %v4428_v33, %v3943_v32  ;;  %v4413_v32 = vld [vmem:[%s6386_s2 + $0x34] sm:$0xf]  ;;  %v3889_v33 = vld [vmem:[%s6386_s2 + $0x38] sm:$0xf0] }
  0xca   : > { %1734 = vmatpush.bf16.msrb.mxu0 %v3364_v41  ;;  %v1528_v24 = vpop.f32.mrf.mxu0  ;;  %v3863_v41 = vld [vmem:[%s6386_s2] sm:$0xf] }
  0xcb   : > { %1747 = vmatpush.bf16.msrb.mxu1 %v3492_v55  ;;  %v1541_v26 = vpop.f32.mrf.mxu1  ;;  %v1529_v35 = vadd.f32 %v1528_v24, %v1516_v27  ;;  %v3864_v61 = vor.u32 %v4408_v53, %v3863_v41  ;;  %v4032_v27 = vor.u32 %v4450_v19, %v4031_v18  ;;  %v4453_v19 = vld [vmem:[%s6386_s2 + $0x174] sm:$0xf] }
  0xcc   : > { %1760 = vmatpush.bf16.msrb.mxu2 %v3620_v56  ;;  %v3921_v56 = vld [vmem:[%s6386_s2 + $0x78] sm:$0xf0] }
  0xcd   : > { %1773 = vmatpush.bf16.msrb.mxu3 %v3748_v57  ;;  %1735 = vmatmul.bf16.vlgmr.msrb.gmra.mxu0 %v4976_v40  ;;  %v3967_v40 = vld [vmem:[%s6386_s2 + $0xd0] sm:$0xf]  ;;  %v1542_v51 = vadd.f32 %v1541_v26, %v1529_v35  ;;  %v3927_v57 = vld [vmem:[%s6386_s2 + $0x80] sm:$0xf]  ;;  %v3961_v26 = vld [vmem:[%s6386_s2 + $0xc8] sm:$0xf0] }
  0xce   : > { %2176 = vmatpush.bf16.msra.mxu0 %v3920_v58  ;;  %1748 = vmatmul.bf16.vlgmr.msrb.gmra.mxu1 %v4986_v44  ;;  %v3895_v44 = vld [vmem:[%s6386_s2 + $0x40] sm:$0xf]  ;;  %v3968_v14 = vor.u32 %v4434_v10, %v3967_v40  ;;  %v4424_v58 = vld [vmem:[%s6386_s2 + $0x84] sm:$0xf0] }
  0xcf   : > { %2189 = vmatpush.bf16.msra.mxu1 %v3984_v63  ;;  %1761 = vmatmul.bf16.vlgmr.msrb.gmra.mxu2 %v5109_v47  ;;  %v4416_v47 = vld [vmem:[%s6386_s2 + $0x44] sm:$0xf0]  ;;  %v1779_v62 = vmax.f32 %v1542_v51, 0.0  ;;  %v3924_v63 = vor.u32 %v4421_v54, %v3921_v56  ;;  %v3928_v0 = vor.u32 %v4424_v58, %v3927_v57  ;;  %v3881_v51 = vld [vmem:[%s6386_s2 + $0x28] sm:$0xf0] }
  0xd0   : > { %1774 = vmatmul.bf16.vlgmr.msrb.gmra.mxu3 %v5118_v50  ;;  %v4432_v50 = vld [vmem:[%s6386_s2 + $0xc4] sm:$0xf0]  ;;  %v3896_v16 = vor.u32 %v4416_v47, %v3895_v44  ;;  %v4417_v47 = vld [vmem:[%s6386_s2 + $0x54] sm:$0xf]  ;;  %v4427_v54 = vld [vmem:[%s6386_s2 + $0xa4] sm:$0xf] }
  0xd1   : > { %v3960_v21 = vor.u32 %v4432_v50, %v3959_v15  ;;  %v5968_v40 = vpack.c.bf16 %v1779_v62, %v1779_v62  ;;  %v4452_v44 = vld [vmem:[%s6386_s2 + $0x164] sm:$0xf0]  ;;  %v4433_v50 = vld [vmem:[%s6386_s2 + $0xd4] sm:$0xf]  ;;  %v3908_v20 = vor.u32 %v4417_v47, %v3905_v13  ;;  %v4007_v58 = vld [vmem:[%s6386_s2 + $0x120] sm:$0xf] }
  0xd2   : > { %2177 = vmatpush.bf16.msra.mxu0 %v3912_v2  ;;  %v1554_v31 = vpop.f32.mrf.mxu2  ;;  %v1530_v46 = vpop.f32.mrf.mxu0  ;;  %v3913_v2 = vld [vmem:[%s6386_s2 + $0x68] sm:$0xf0]  ;;  %v4040_v17 = vor.u32 %v4452_v44, %v4039_v12  ;;  %v4409_v62 = vld [vmem:[%s6386_s2 + $0x14] sm:$0xf]  ;;  %v4423_v47 = vld [vmem:[%s6386_s2 + $0x84] sm:$0xf] }
  0xd3   : > { %2190 = vmatpush.bf16.msra.mxu1 %v3976_v8  ;;  %v1567_v39 = vpop.f32.mrf.mxu3  ;;  %v1543_v49 = vpop.f32.mrf.mxu1  ;;  %v4047_v8 = vld [vmem:[%s6386_s2 + $0x170] sm:$0xf]  ;;  %v3916_v10 = vor.u32 %v4419_v1, %v3913_v2  ;;  %v1555_v15 = vadd.f32 %v1554_v31, %v479_v5  ;;  %v4425_v2 = vld [vmem:[%s6386_s2 + $0x94] sm:$0xf]  ;;  %v4008_v5 = vor.u32 %v4444_v59, %v4007_v58  ;;  %v3865_v12 = vld [vmem:[%s6386_s2 + $0x8] sm:$0xf0] }
  0xd4   : > { %v4411_v49 = vld [vmem:[%s6386_s2 + $0x24] sm:$0xf]  ;;  %v3929_v13 = vld [vmem:[%s6386_s2 + $0x88] sm:$0xf0] }
  0xd5   : > { %v1568_v24 = vadd.f32 %v1567_v39, %v1555_v15  ;;  %v4024_v39 = vor.u32 %v4448_v29, %v4023_v28  ;;  %v3884_v60 = vor.u32 %v4411_v49, %v3881_v51  ;;  %v4470_v28 = vld [vmem:[%s6386_s2 + $0x1f4] sm:$0xf0]  ;;  %v4445_v49 = vld [vmem:[%s6386_s2 + $0x134] sm:$0xf]  ;;  %v4017_v51 = vld [vmem:[%s6386_s2 + $0x138] sm:$0xf0] }
  0xd6   : > { %2178 = vmatpush.bf16.msra.mxu0 %v3904_v11  ;;  %v4048_v11 = vor.u32 %v4454_v9, %v4047_v8  ;;  %v4442_v8 = vld [vmem:[%s6386_s2 + $0x114] sm:$0xf0]  ;;  %v4009_v59 = vld [vmem:[%s6386_s2 + $0x128] sm:$0xf0] }
  0xd7   : > { %2191 = vmatpush.bf16.msra.mxu1 %v3968_v14  ;;  %v3980_v14 = vor.u32 %v4435_v6, %v3977_v7  ;;  %v3999_v7 = vld [vmem:[%s6386_s2 + $0x110] sm:$0xf] }
  0xd8   : > { %2202 = vmatpush.bf16.msra.mxu2 %v4048_v11  ;;  %v4407_v11 = vld [vmem:[%s6386_s2 + $0x4] sm:$0xf]  ;;  %v4000_v15 = vor.u32 %v4442_v8, %v3999_v7 }
  0xd9   : > { %v3868_v18 = vor.u32 %v4407_v11, %v3865_v12  ;;  %v4439_v8 = vld [vmem:[%s6386_s2 + $0x104] sm:$0xf]  ;;  %v4063_v12 = vld [vmem:[%s6386_s2 + $0x190] sm:$0xf] }
  0xda   : > { %2179 = vmatpush.bf16.msra.mxu0 %v3896_v16  ;;  %v1556_v55 = vpop.f32.mrf.mxu2  ;;  %v3969_v16 = vld [vmem:[%s6386_s2 + $0xd8] sm:$0xf0] }
  0xdb   : > { %2192 = vmatpush.bf16.msra.mxu1 %v3960_v21  ;;  %v1569_v3 = vpop.f32.mrf.mxu3  ;;  %v4415_v21 = vld [vmem:[%s6386_s2 + $0x44] sm:$0xf]  ;;  %v3972_v23 = vor.u32 %v4433_v50, %v3969_v16  ;;  %v4016_v55 = vor.u32 %v4446_v43, %v4015_v42  ;;  %v3991_v16 = vld [vmem:[%s6386_s2 + $0x100] sm:$0xf]  ;;  %v4095_v42 = vld [vmem:[%s6386_s2 + $0x1d0] sm:$0xf] }
  0xdc   : > { %2203 = vmatpush.bf16.msra.mxu2 %v4040_v17  ;;  %v3937_v3 = vld [vmem:[%s6386_s2 + $0x98] sm:$0xf0]  ;;  %v4440_v17 = vld [vmem:[%s6386_s2 + $0x104] sm:$0xf0]  ;;  %v4466_v43 = vld [vmem:[%s6386_s2 + $0x1d4] sm:$0xf0] }
  0xdd   : > { %v3940_v44 = vor.u32 %v4425_v2, %v3937_v3  ;;  %v4071_v3 = vld [vmem:[%s6386_s2 + $0x1a0] sm:$0xf] }
  0xde   : > { %2180 = vmatpush.bf16.msra.mxu0 %v3888_v25  ;;  %v4431_v25 = vld [vmem:[%s6386_s2 + $0xc4] sm:$0xf] }
  0xdf   : > { %2193 = vmatpush.bf16.msra.mxu1 %v3952_v30  ;;  %v3900_v30 = vor.u32 %v4415_v21, %v3897_v22  ;;  %v3932_v21 = vor.u32 %v4423_v47, %v3929_v13  ;;  %v3992_v22 = vor.u32 %v4440_v17, %v3991_v16  ;;  %v4456_v16 = vld [vmem:[%s6386_s2 + $0x184] sm:$0xf0] }
  0xe0   : > { %2204 = vmatpush.bf16.msra.mxu2 %v4032_v27  ;;  %v4111_v27 = vld [vmem:[%s6386_s2 + $0x1f0] sm:$0xf] }
  0xe1   : > { %v4112_v29 = vor.u32 %v4470_v28, %v4111_v27 }
  0xe2   : > { %2181 = vmatpush.bf16.msra.mxu0 %v3880_v34  ;;  %v3964_v34 = vor.u32 %v4431_v25, %v3961_v26  ;;  %v4041_v25 = vld [vmem:[%s6386_s2 + $0x168] sm:$0xf0] }
  0xe3   : > { %2194 = vmatpush.bf16.msra.mxu1 %v3944_v38  ;;  %v3953_v38 = vld [vmem:[%s6386_s2 + $0xb8] sm:$0xf0]  ;;  %2215 = vmatpush.bf16.msra.mxu3 %v4112_v29  ;;  %v4465_v29 = vld [vmem:[%s6386_s2 + $0x1d4] sm:$0xf] }
  0xe4   : > { %v3956_v41 = vor.u32 %v4429_v37, %v3953_v38  ;;  %2205 = vmatpush.bf16.msra.mxu2 %v4024_v39  ;;  %v4447_v37 = vld [vmem:[%s6386_s2 + $0x144] sm:$0xf]  ;;  %v4025_v38 = vld [vmem:[%s6386_s2 + $0x148] sm:$0xf0] }
  0xe5   : > { %v4028_v39 = vor.u32 %v4447_v37, %v4025_v38  ;;  %v4089_v37 = vld [vmem:[%s6386_s2 + $0x1c8] sm:$0xf0] }
  0xe6   : > { %2182 = vmatpush.bf16.msra.mxu0 %v3872_v48  ;;  %v3892_v48 = vor.u32 %v4413_v32, %v3889_v33 }
  0xe7   : > { %2195 = vmatpush.bf16.msra.mxu1 %v3936_v45  ;;  %v3945_v45 = vld [vmem:[%s6386_s2 + $0xa8] sm:$0xf0] }
  0xe8   : > { %2206 = vmatpush.bf16.msra.mxu2 %v4016_v55  ;;  %v4464_v55 = vld [vmem:[%s6386_s2 + $0x1c4] sm:$0xf0] }
  0xea   : > { %2183 = vmatpush.bf16.msra.mxu0 %v3864_v61  ;;  %v1580_v31 = vpop.f32.mrf.mxu0 }
  0xeb   : > { %2196 = vmatpush.bf16.msra.mxu1 %v3928_v0  ;;  %v1581_v35 = vadd.f32 %v1580_v31, %v1568_v24  ;;  %v1593_v36 = vpop.f32.mrf.mxu1  ;;  %v3948_v0 = vor.u32 %v4427_v54, %v3945_v45  ;;  %v4451_v24 = vld [vmem:[%s6386_s2 + $0x164] sm:$0xf]  ;;  %v4020_v54 = vor.u32 %v4445_v49, %v4017_v51  ;;  %v4087_v45 = vld [vmem:[%s6386_s2 + $0x1c0] sm:$0xf]  ;;  %v4073_v49 = vld [vmem:[%s6386_s2 + $0x1a8] sm:$0xf0] }
  0xec   : > { %2207 = vmatpush.bf16.msra.mxu2 %v4008_v5  ;;  %v4044_v26 = vor.u32 %v4451_v24, %v4041_v25  ;;  %v4088_v58 = vor.u32 %v4464_v55, %v4087_v45  ;;  %v4105_v24 = vld [vmem:[%s6386_s2 + $0x1e8] sm:$0xf0]  ;;  %v4065_v45 = vld [vmem:[%s6386_s2 + $0x198] sm:$0xf0] }
  0xed   : > { %2184 = vmatmul.bf16.vlgmr.msra.gmra.mxu0 %v5968_v40  ;;  %v1594_v46 = vadd.f32 %v1593_v36, %v1581_v35  ;;  %v4468_v35 = vld [vmem:[%s6386_s2 + $0x1e4] sm:$0xf0] }
  0xee   : > { %2228 = vmatpush.bf16.msrb.mxu0 %v3924_v63  ;;  %v3873_v63 = vld [vmem:[%s6386_s2 + $0x18] sm:$0xf0] }
  0xef   : > { %2241 = vmatpush.bf16.msrb.mxu1 %v3988_v4  ;;  %v3876_v9 = vor.u32 %v4409_v62, %v3873_v63  ;;  %v480_v63 = vperm.slane %v5840_v52, 2 }
  0xf0   : > { %2208 = vmatpush.bf16.msra.mxu2 %v4000_v15 }
  0xf2   : > { %2229 = vmatpush.bf16.msrb.mxu0 %v3916_v10  ;;  %v1606_v53 = vpop.f32.mrf.mxu2  ;;  %v1582_v1 = vpop.f32.mrf.mxu0 }
  0xf3   : > { %2242 = vmatpush.bf16.msrb.mxu1 %v3980_v14  ;;  %v1607_v56 = vadd.f32 %v1606_v53, %v1594_v46  ;;  %v1619_v57 = vpop.f32.mrf.mxu3  ;;  %v1595_v4 = vpop.f32.mrf.mxu1  ;;  %v4096_v46 = vor.u32 %v4466_v43, %v4095_v42  ;;  %v4001_v1 = vld [vmem:[%s6386_s2 + $0x118] sm:$0xf0]  ;;  %v4461_v42 = vld [vmem:[%s6386_s2 + $0x1b4] sm:$0xf] }
  0xf4   : > { %2209 = vmatpush.bf16.msra.mxu2 %v3992_v22  ;;  %v4460_v4 = vld [vmem:[%s6386_s2 + $0x1a4] sm:$0xf0]  ;;  %v4081_v43 = vld [vmem:[%s6386_s2 + $0x1b8] sm:$0xf0] }
  0xf5   : > { %v1620_v61 = vadd.f32 %v1619_v57, %v1607_v56  ;;  %v4443_v56 = vld [vmem:[%s6386_s2 + $0x124] sm:$0xf]  ;;  %v4072_v11 = vor.u32 %v4460_v4, %v4071_v3 }
  0xf6   : > { %2230 = vmatpush.bf16.msrb.mxu0 %v3908_v20  ;;  %v4049_v20 = vld [vmem:[%s6386_s2 + $0x178] sm:$0xf0]  ;;  %v4012_v62 = vor.u32 %v4443_v56, %v4009_v59  ;;  %v4455_v56 = vld [vmem:[%s6386_s2 + $0x184] sm:$0xf] }
  0xf7   : > { %2243 = vmatpush.bf16.msrb.mxu1 %v3972_v23  ;;  %v1780_v6 = vmax.f32 %v1620_v61, 0.0  ;;  %v4052_v23 = vor.u32 %v4453_v19, %v4049_v20  ;;  %v4462_v61 = vld [vmem:[%s6386_s2 + $0x1b4] sm:$0xf0]  ;;  %v4113_v19 = vld [vmem:[%s6386_s2 + $0x1f8] sm:$0xf0] }
  0xf9   : > { %v1784_v10 = vpack.c.bf16 %v1780_v6, %v1780_v6  ;;  %2254 = vmatpush.bf16.msrb.mxu2 %v4052_v23  ;;  %v4467_v23 = vld [vmem:[%s6386_s2 + $0x1e4] sm:$0xf] }
  0xfa   : > { %2231 = vmatpush.bf16.msrb.mxu0 %v3900_v30  ;;  %v1608_v14 = vpop.f32.mrf.mxu2  ;;  %v4449_v30 = vld [vmem:[%s6386_s2 + $0x154] sm:$0xf]  ;;  %v4108_v27 = vor.u32 %v4467_v23, %v4105_v24  ;;  %v4478_v23 = vld [vmem:[%s6387_s3 + $0x38] sm:$0xff] }
  0xfb   : > { %2244 = vmatpush.bf16.msrb.mxu1 %v3964_v34  ;;  %v1621_v50 = vpop.f32.mrf.mxu3  ;;  %v4103_v34 = vld [vmem:[%s6386_s2 + $0x1e0] sm:$0xf]  ;;  %v4477_v24 = vld [vmem:[%s6387_s3 + $0x30] sm:$0xff] }
  0xfc   : > { %2197 = vmatmul.bf16.vlgmr.msra.gmra.mxu1 %v1784_v10  ;;  %v4104_v36 = vor.u32 %v4468_v35, %v4103_v34  ;;  %v4055_v50 = vld [vmem:[%s6386_s2 + $0x180] sm:$0xf] }
  0xfd   : > { %2255 = vmatpush.bf16.msrb.mxu2 %v4044_v26  ;;  %v4056_v17 = vor.u32 %v4456_v16, %v4055_v50 }
  0xfe   : > { %2232 = vmatpush.bf16.msrb.mxu0 %v3892_v48  ;;  %2216 = vmatpush.bf16.msra.mxu3 %v4104_v36  ;;  %v4463_v36 = vld [vmem:[%s6386_s2 + $0x1c4] sm:$0xf] }
  0xff   : > { %2245 = vmatpush.bf16.msrb.mxu1 %v3956_v41 }
 0x102   : > { %2233 = vmatpush.bf16.msrb.mxu0 %v3884_v60  ;;  %2217 = vmatpush.bf16.msra.mxu3 %v4096_v46  ;;  %v4079_v60 = vld [vmem:[%s6386_s2 + $0x1b0] sm:$0xf]  ;;  %v4084_v46 = vor.u32 %v4461_v42, %v4081_v43  ;;  %v4479_v42 = vld [vmem:[%s6387_s3 + $0x40] sm:$0xff] }
 0x103   : > { %2246 = vmatpush.bf16.msrb.mxu1 %v3948_v0  ;;  %v4441_v0 = vld [vmem:[%s6386_s2 + $0x114] sm:$0xf]  ;;  %v4080_v2 = vor.u32 %v4462_v61, %v4079_v60 }
 0x104   : > { %v4004_v5 = vor.u32 %v4441_v0, %v4001_v1 }
 0x106   : > { %2234 = vmatpush.bf16.msrb.mxu0 %v3876_v9  ;;  %2218 = vmatpush.bf16.msra.mxu3 %v4088_v58  ;;  %v3993_v9 = vld [vmem:[%s6386_s2 + $0x108] sm:$0xf0]  ;;  %v481_v58 = vperm.slane %v5840_v52, 3 }
 0x107   : > { %2247 = vmatpush.bf16.msrb.mxu1 %v3940_v44  ;;  %v4458_v44 = vld [vmem:[%s6386_s2 + $0x194] sm:$0xf0]  ;;  %v3996_v47 = vor.u32 %v4439_v8, %v3993_v9 }
 0x108   : > { %v4064_v14 = vor.u32 %v4458_v44, %v4063_v12  ;;  %v277_v44 = vld [vmem:[%s6390_s6 + $0x4] sm:$0x3] }
 0x10a   : > { %2235 = vmatpush.bf16.msrb.mxu0 %v3868_v18  ;;  %v1632_v31 = vpop.f32.mrf.mxu0  ;;  %2219 = vmatpush.bf16.msra.mxu3 %v4080_v2  ;;  %v4469_v18 = vld [vmem:[%s6386_s2 + $0x1f4] sm:$0xf] }
 0x10b   : > { %2248 = vmatpush.bf16.msrb.mxu1 %v3932_v21  ;;  %v1645_v33 = vpop.f32.mrf.mxu1  ;;  %v1633_v6 = vadd.f32 %v1632_v31, %v480_v63  ;;  %v4116_v21 = vor.u32 %v4469_v18, %v4113_v19 }
 0x10d   : > { %2236 = vmatmul.bf16.vlgmr.msrb.gmra.mxu0 %v5968_v40  ;;  %v4033_v40 = vld [vmem:[%s6386_s2 + $0x158] sm:$0xf0]  ;;  %v1646_v13 = vadd.f32 %v1645_v33, %v1633_v6 }
 0x10e   : > { %v4036_v32 = vor.u32 %v4449_v30, %v4033_v40  ;;  %2249 = vmatmul.bf16.vlgmr.msrb.gmra.mxu1 %v1784_v10  ;;  %2220 = vmatpush.bf16.msra.mxu3 %v4072_v11  ;;  %v4097_v30 = vld [vmem:[%s6386_s2 + $0x1d8] sm:$0xf0] }
 0x10f   : > { %v4100_v31 = vor.u32 %v4465_v29, %v4097_v30  ;;  %2415 = vmatpush.bf16.msra.mxu0 %v4478_v23  ;;  %v4485_v29 = vld [vmem:[%s6387_s3 + $0x70] sm:$0xff] }
 0x110   : > { %2256 = vmatpush.bf16.msrb.mxu2 %v4036_v32  ;;  %v4473_v30 = vld [vmem:[%s6387_s3 + $0x10] sm:$0xff] }
 0x112   : > { %v1658_v48 = vpop.f32.mrf.mxu2  ;;  %v1634_v41 = vpop.f32.mrf.mxu0  ;;  %2221 = vmatpush.bf16.msra.mxu3 %v4064_v14 }
 0x113   : > { %v1671_v53 = vpop.f32.mrf.mxu3  ;;  %v1647_v57 = vpop.f32.mrf.mxu1  ;;  %v1659_v15 = vadd.f32 %v1658_v48, %v1646_v13  ;;  %v4459_v48 = vld [vmem:[%s6386_s2 + $0x1a4] sm:$0xf]  ;;  %2416 = vmatpush.bf16.msra.mxu0 %v4477_v24 }
 0x114   : > { %2257 = vmatpush.bf16.msrb.mxu2 %v4028_v39  ;;  %v4092_v39 = vor.u32 %v4463_v36, %v4089_v37  ;;  %v4076_v41 = vor.u32 %v4459_v48, %v4073_v49  ;;  %v4057_v57 = vld [vmem:[%s6386_s2 + $0x188] sm:$0xf0]  ;;  %v4482_v36 = vld [vmem:[%s6387_s3 + $0x58] sm:$0xff]  ;;  %v4481_v37 = vld [vmem:[%s6387_s3 + $0x50] sm:$0xff] }
 0x115   : > { %v1672_v20 = vadd.f32 %v1671_v53, %v1659_v15  ;;  %v4060_v59 = vor.u32 %v4455_v56, %v4057_v57 }
 0x116   : > { %2222 = vmatpush.bf16.msra.mxu3 %v4056_v17  ;;  %v1853_v17 = vperm.slane %v277_v44, 1 }
 0x118   : > { %2258 = vmatpush.bf16.msrb.mxu2 %v4020_v54  ;;  %v4457_v54 = vld [vmem:[%s6386_s2 + $0x194] sm:$0xf] }
 0x119   : > { %v4068_v55 = vor.u32 %v4457_v54, %v4065_v45 }
 0x11a   : > { %v1660_v7 = vpop.f32.mrf.mxu2  ;;  %2267 = vmatpush.bf16.msrb.mxu3 %v4116_v21 }
 0x11b   : > { %v1673_v10 = vpop.f32.mrf.mxu3 }
 0x11c   : > { %2259 = vmatpush.bf16.msrb.mxu2 %v4012_v62 }
 0x11e   : > { %2268 = vmatpush.bf16.msrb.mxu3 %v4108_v27  ;;  %v4474_v27 = vld [vmem:[%s6387_s3 + $0x18] sm:$0xff] }
 0x120   : > { %2260 = vmatpush.bf16.msrb.mxu2 %v4004_v5 }
 0x122   : > { %2269 = vmatpush.bf16.msrb.mxu3 %v4100_v31  ;;  %v4472_v31 = vld [vmem:[%s6387_s3 + $0x8] sm:$0xff] }
 0x124   : > { %2261 = vmatpush.bf16.msrb.mxu2 %v3996_v47  ;;  %v1852_v47 = vperm.slane %v277_v44, 0 }
 0x126   : > { %2270 = vmatpush.bf16.msrb.mxu3 %v4092_v39  ;;  %v4480_v39 = vld [vmem:[%s6387_s3 + $0x48] sm:$0xff] }
 0x12a   : > { %v1684_v22 = vpop.f32.mrf.mxu0  ;;  %2271 = vmatpush.bf16.msrb.mxu3 %v4084_v46 }
 0x12b   : > { %v1685_v25 = vadd.f32 %v1684_v22, %v1672_v20  ;;  %v1697_v26 = vpop.f32.mrf.mxu1 }
 0x12d   : > { %v1698_v28 = vadd.f32 %v1697_v26, %v1685_v25  ;;  %v4476_v25 = vld [vmem:[%s6387_s3 + $0x28] sm:$0xff]  ;;  %v4475_v26 = vld [vmem:[%s6387_s3 + $0x20] sm:$0xff] }
 0x12e   : > { %2272 = vmatpush.bf16.msrb.mxu3 %v4076_v41  ;;  %2417 = vmatpush.bf16.msra.mxu0 %v4476_v25 }
 0x12f   : > { %v1781_v40 = vmax.f32 %v1698_v28, 0.0  ;;  %v4486_v28 = vld [vmem:[%s6387_s3 + $0x78] sm:$0xff] }
 0x130   : > { %2428 = vmatpush.bf16.msra.mxu1 %v4486_v28 }
 0x131   : > { %v1785_v32 = vpack.c.bf16 %v1781_v40, %v1781_v40 }
 0x132   : > { %v1710_v33 = vpop.f32.mrf.mxu2  ;;  %v1686_v35 = vpop.f32.mrf.mxu0  ;;  %2273 = vmatpush.bf16.msrb.mxu3 %v4068_v55  ;;  %2418 = vmatpush.bf16.msra.mxu0 %v4475_v26 }
 0x133   : > { %v1723_v34 = vpop.f32.mrf.mxu3  ;;  %2210 = vmatmul.bf16.vlgmr.msra.gmra.mxu2 %v1785_v32  ;;  %v1699_v38 = vpop.f32.mrf.mxu1  ;;  %v1711_v60 = vadd.f32 %v1710_v33, %v481_v58  ;;  %v4471_v33 = vld [vmem:[%s6387_s3] sm:$0xff] }
 0x134   : > { %2429 = vmatpush.bf16.msra.mxu1 %v4485_v29 }
 0x135   : > { %v1724_v61 = vadd.f32 %v1723_v34, %v1711_v60  ;;  %v4483_v34 = vld [vmem:[%s6387_s3 + $0x60] sm:$0xff]  ;;  %v4490_v60 = vld [vmem:[%s6389_s5 + $0x8] sm:$0xff] }
 0x136   : > { %2274 = vmatpush.bf16.msrb.mxu3 %v4060_v59  ;;  %2419 = vmatpush.bf16.msra.mxu0 %v4474_v27  ;;  %v4488_v59 = vld [vmem:[%s6388_s4 + $0x8] sm:$0xff] }
 0x137   : > { %2471 = vmatpush.bf16.msra.mxu2 %v4488_v59 }
 0x13a   : > { %v1712_v51 = vpop.f32.mrf.mxu2  ;;  %2420 = vmatpush.bf16.msra.mxu0 %v4473_v30 }
 0x13b   : > { %v1725_v53 = vpop.f32.mrf.mxu3 }
 0x13e   : > { %2421 = vmatpush.bf16.msra.mxu0 %v4472_v31 }
 0x142   : > { %2422 = vmatpush.bf16.msra.mxu0 %v4471_v33 }
 0x143   : > { %2262 = vmatmul.bf16.vlgmr.msrb.gmra.mxu2 %v1785_v32  ;;  %v4484_v32 = vld [vmem:[%s6387_s3 + $0x68] sm:$0xff] }
 0x144   : > { %2430 = vmatpush.bf16.msra.mxu1 %v4484_v32 }
 0x146   : > { %2700 = vmatpush.bf16.msrb.mxu0 %v4490_v60 }
 0x148   : > { %2431 = vmatpush.bf16.msra.mxu1 %v4483_v34 }
 0x14a   : > { %v1736_v62 = vpop.f32.mrf.mxu0 }
 0x14b   : > { %v1749_v63 = vpop.f32.mrf.mxu1  ;;  %v1737_v0 = vadd.f32 %v1736_v62, %v1724_v61  ;;  %v4489_v61 = vld [vmem:[%s6389_s5] sm:$0xff] }
 0x14c   : > { %2432 = vmatpush.bf16.msra.mxu1 %v4482_v36  ;;  %v4487_v62 = vld [vmem:[%s6388_s4] sm:$0xff]  ;;  %2701 = vmatpush.bf16.msrb.mxu0 %v4489_v61 }
 0x14d   : > { %v1750_v1 = vadd.f32 %v1749_v63, %v1737_v0  ;;  %2472 = vmatpush.bf16.msra.mxu2 %v4487_v62  ;;  %v4580_v63 = vmov 0  }
 0x150   : > { %2433 = vmatpush.bf16.msra.mxu1 %v4481_v37 }
 0x151   : > { %2567 = vmatpush.bf16.msrb.mxu2 %v4490_v60 }
 0x152   : > { %v1762_v2 = vpop.f32.mrf.mxu2  ;;  %v1738_v5 = vpop.f32.mrf.mxu0 }
 0x153   : > { %v1763_v3 = vadd.f32 %v1762_v2, %v1750_v1  ;;  %v1775_v4 = vpop.f32.mrf.mxu3  ;;  %v1751_v6 = vpop.f32.mrf.mxu1  ;;  %v4504_v2 = vld [vmem:[%s6390_s6 + $0x7] ss:$0 sm:$0xff] }
 0x154   : > { %2434 = vmatpush.bf16.msra.mxu1 %v4480_v39 }
 0x155   : > { %v1776_v7 = vadd.f32 %v1775_v4, %v1763_v3  ;;  %2568 = vmatpush.bf16.msrb.mxu2 %v4489_v61 }
 0x157   : > { %v1782_v8 = vmax.f32 %v1776_v7, 0.0 }
 0x158   : > { %2435 = vmatpush.bf16.msra.mxu1 %v4479_v42 }
 0x159   : > { %v1786_v9 = vpack.c.bf16 %v1782_v8, %v1782_v8 }
 0x15a   : > { %v1764_v10 = vpop.f32.mrf.mxu2 }
 0x15b   : > { %v1777_v52 = vpop.f32.mrf.mxu3  ;;  %2223 = vmatmul.bf16.vlgmr.msra.gmra.mxu3 %v1786_v9  ;;  %v4505_v10 = vld [vmem:[%s6390_s6 + $0x6] ss:$0 sm:$0xff] }
 0x15c   : > { %2508 = vmatpush.bf16.msra.mxu3 %v4490_v60  ;;  %2768 = vmatpush.bf16.msrb.mxu1 %v4490_v60 }
 0x160   : > { %2509 = vmatpush.bf16.msra.mxu3 %v4489_v61  ;;  %2769 = vmatpush.bf16.msrb.mxu1 %v4489_v61 }
 0x16a   : > { %v2185_v11 = vpop.f32.mrf.mxu0 }
 0x16b   : > { %2275 = vmatmul.bf16.vlgmr.msrb.gmra.mxu3 %v1786_v9  ;;  %v2186_v13 = vadd.f32 %v2185_v11, %v1852_v47 }
 0x16c   : > { %2634 = vmatpush.bf16.msrb.mxu3 %v4490_v60 }
 0x170   : > { %2635 = vmatpush.bf16.msrb.mxu3 %v4489_v61 }
 0x172   : > { %v2187_v12 = vpop.f32.mrf.mxu0 }
 0x179   : > { %v2198_v14 = vpop.f32.mrf.mxu1 }
 0x17a   : > { %v2199_v15 = vadd.f32 %v2198_v14, %v2186_v13 }
 0x17b   : > { %2510 = vmatmul.bf16.vlgmr.msra.gmra.mxu3 %v4580_v63 }
 0x17c   : > { %2902 = vmatpush.bf16.msra.mxu3 %v4490_v60 }
 0x180   : > { %2903 = vmatpush.bf16.msra.mxu3 %v4489_v61 }
 0x181   : > { %v2200_v16 = vpop.f32.mrf.mxu1 }
 0x18a   : > { %v2237_v50 = vpop.f32.mrf.mxu0 }
 0x18b   : > { %v2238_v18 = vadd.f32 %v2237_v50, %v1853_v17  ;;  %v2250_v20 = vpop.f32.mrf.mxu1 }
 0x18d   : > { %v2251_v21 = vadd.f32 %v2250_v20, %v2238_v18 }
 0x192   : > { %v2239_v19 = vpop.f32.mrf.mxu0 }
 0x193   : > { %v2252_v22 = vpop.f32.mrf.mxu1 }
 0x1b6   : > { %v2211_v40 = vpop.f32.mrf.mxu2 }
 0x1b7   : > { %v2212_v46 = vadd.f32 %v2211_v40, %v2199_v15  ;;  %v2482_v15 = vlaneseq }
 0x1b9   : > { %v2483_v16 = vand.u32 127, %v2482_v15 }
 0x1bb   : > { %vm2484_vm1 = vcmp.ge.s32.totalorder %v2483_v16, 64  ;;  %vm2485_vm2 = vcmp.lt.s32.totalorder %v2483_v16, 96 }
 0x1bc   : > { %vm6305_vm4 = vmand %vm2484_vm1, %vm2485_vm2 }
 0x1be   : > { %v2213_v35 = vpop.f32.mrf.mxu2 }
 0x1c6   : > { %v2263_v38 = vpop.f32.mrf.mxu2 }
 0x1c7   : > { %v2264_v54 = vadd.f32 %v2263_v38, %v2251_v21 }
 0x1ce   : > { %v2265_v43 = vpop.f32.mrf.mxu2 }
 0x1de   : > { %v2224_v48 = vpop.f32.mrf.mxu3 }
 0x1df   : > { %v2225_v49 = vadd.f32 %v2224_v48, %v2212_v46 }
 0x1e1   : > { %v2280_v51 = vmax.f32 %v2225_v49, 0.0 }
 0x1e3   : > { %v2282_v41 = vpack.c.bf16 %v2280_v51, %v2280_v51 }
 0x1e5   : > { %2423 = vmatmul.bf16.vlgmr.msra.gmra.mxu0 %v2282_v41 }
 0x1e6   : > { %v2226_v53 = vpop.f32.mrf.mxu3  ;;  %2968 = vmatpush.bf16.msra.mxu0 %v4490_v60 }
 0x1ea   : > { %2969 = vmatpush.bf16.msra.mxu0 %v4489_v61 }
 0x1ee   : > { %v2276_v45 = vpop.f32.mrf.mxu3 }
 0x1ef   : > { %v2277_v55 = vadd.f32 %v2276_v45, %v2264_v54 }
 0x1f1   : > { %v2281_v56 = vmax.f32 %v2277_v55, 0.0 }
 0x1f3   : > { %v2283_v57 = vpack.c.bf16 %v2281_v56, %v2281_v56 }
 0x1f5   : > { %2436 = vmatmul.bf16.vlgmr.msra.gmra.mxu1 %v2283_v57 }
 0x1f6   : > { %v2278_v58 = vpop.f32.mrf.mxu3 }
 0x1fe   : > { %v2511_v8 = vpop.f32.mrf.mxu3 }
 0x206   : > { %v2513_v9 = vpop.f32.mrf.mxu3 }
 0x262   : > { %v2424_v0 = vpop.f32.mrf.mxu0 }
 0x263   : > { %v2425_v3 = vadd.f32 %v4504_v2, %v2424_v0 }
 0x26a   : > { %v2426_v1 = vpop.f32.mrf.mxu0 }
 0x272   : > { %v2437_v4 = vpop.f32.mrf.mxu1 }
 0x273   : > { %v2438_v5 = vadd.f32 %v2437_v4, %v2425_v3 }
 0x275   : > { %v2441_v6 = vpack.c.bf16 %v2438_v5, %v2438_v5 }
 0x277   : > { %4189 = vmatmul.msk.bf16.vlgmr.msra.gmra.mxu2 %vm2461_vm0, %v2441_v6 }
 0x278   : > { %2834 = vmatpush.bf16.msra.mxu2 %v4490_v60 }
 0x27a   : > { %v2439_v7 = vpop.f32.mrf.mxu1 }
 0x27c   : > { %2835 = vmatpush.bf16.msra.mxu2 %v4489_v61 }
 0x2fa   : > { %v2474_v52 = vpop.f32.mrf.mxu2 }
 0x2fb   : > { %v6302_v11 = vadd.f32 %v4505_v10, %v2474_v52 }
 0x2fd   : > { %v2515_v12 = vadd.f32 %v2511_v8, %v6302_v11 }
 0x2ff   : > { %v4198_v44 = vmul.f32 -1.442695, %v2515_v12 }
 0x301   : > { %4508 = vpow2.f32 %v4198_v44 }
 0x302   : > { %v2476_v47 = vpop.f32.mrf.mxu2 }
 0x307   : > { %v4509_v13 = vpop.eup %4508 }
 0x308   : > { %v2520_v14 = vadd.f32 1.0, %v4509_v13 }
 0x30a   : > { %4510 = vrcp.f32 %v2520_v14  ;;  %v2532_v19 = vand.u32 2147483648, %v2520_v14  ;;  %v2530_v21 = vand.u32 2147483647, %v2520_v14  ;;  %vm2526_vm5 = vweird.f32 %v2520_v14 }
 0x30b   : > { %4512 = vtanh.f32 %v2515_v12 }
 0x30c   : > { %v2533_v24 = vor.u32 1.1754944e-38, %v2532_v19  ;;  %vm2531_vm7 = vcmp.eq.f32.partialorder %v2530_v21, 8.507059e+37 }
 0x310   : > { %v4511_v50 = vpop.eup %4510 }
 0x311   : > { %v2522_v17 = vmul.f32 %v4511_v50, %v2520_v14  ;;  %vm2527_vm3 = vweird.f32 %v4511_v50  ;;  %v4513_v26 = vpop.eup %4512 }
 0x312   : > { %vm2528_vm6 = vmor %vm2526_vm5, %vm2527_vm3 }
 0x313   : > { %v2523_v18 = vsub.f32 1.0, %v2522_v17 }
 0x315   : > { %v2524_v20 = vmul.f32 %v4511_v50, %v2523_v18 }
 0x317   : > { %v2525_v23 = vadd.f32 %v4511_v50, %v2524_v20 }
 0x319   : > { %v2529_v25 = vsel %vm2528_vm6, %v4511_v50, %v2525_v23 }
 0x31a   : > { %v2534_v27 = vsel %vm2531_vm7, %v2533_v24, %v2529_v25 }
 0x31b   : > { %v2536_v28 = vsel %vm6305_vm4, %v4513_v26, %v2534_v27 }
 0x31c   : > { %2539 = vrot.lane.b32.xlu0 %v2536_v28, %s4581_s11  ;;  %v2537_v40 = vmul.f32 0.0, %v2536_v28 }
 0x38e   : > { %v2540_v29 = vpop.permute.xlu0 %2539 }
 0x38f   : > { %v2542_v30 = vmul.f32 %v2540_v29, %v2536_v28 }
 0x391   : > { %2544 = vrot.lane.b32.xlu0 %v2542_v30, %s4582_s12 }
 0x403   : > { %v2545_v31 = vpop.permute.xlu0 %2544 }
 0x404   : > { %v2547_v32 = vadd.f32 %v2545_v31, %v2537_v40 }
 0x406   : > { %4514 = vtanh.f32 %v2547_v32  ;;  %v2600_v0 = vrot.slane %v2547_v32, 7 }
 0x40c   : > { %v4515_v33 = vpop.eup %4514 }
 0x40d   : > { %2550 = vrot.lane.b32.xlu1 %v4515_v33, %s4581_s11 }
 0x47f   : > { %v2551_v34 = vpop.permute.xlu1 %2550 }
 0x480   : > { %v2553_v35 = vmul.f32 %v2551_v34, %v2536_v28 }
 0x482   : > { %v2554_v36 = vpack.c.bf16 %v2553_v35, %v2553_v35 }
 0x484   : > { %2556 = vrot.lane.b32.xlu1 %v2554_v36, %s4582_s12 }
 0x4f6   : > { %v2557_v37 = vpop.permute.xlu1 %2556 }
 0x4f7   : > { %4199 = vmatmul.msk.bf16.vlgmr.msrb.gmra.mxu2 %vm2461_vm0, %v2557_v37 }
 0x57a   : > { %v2570_v38 = vpop.f32.mrf.mxu2 }
 0x57b   : > { %v2575_v39 = vrot.slane %v2570_v38, 7 }
 0x57d   : > { %v2577_v42 = vadd.f32 %v2575_v39, %v6302_v11 }
 0x57f   : > { %v4200_v43 = vmul.f32 -1.442695, %v2577_v42 }
 0x581   : > { %4516 = vpow2.f32 %v4200_v43 }
 0x582   : > { %v2572_v46 = vpop.f32.mrf.mxu2 }
 0x587   : > { %v4517_v48 = vpop.eup %4516 }
 0x588   : > { %v2582_v49 = vadd.f32 1.0, %v4517_v48 }
 0x58a   : > { %4518 = vrcp.f32 %v2582_v49  ;;  %v2594_v54 = vand.u32 2147483648, %v2582_v49  ;;  %v2592_v55 = vand.u32 2147483647, %v2582_v49  ;;  %vm2588_vm9 = vweird.f32 %v2582_v49 }
 0x58b   : > { %4520 = vtanh.f32 %v2577_v42 }
 0x58c   : > { %v2595_v57 = vor.u32 1.1754944e-38, %v2594_v54  ;;  %vm2593_vm11 = vcmp.eq.f32.partialorder %v2592_v55, 8.507059e+37 }
 0x590   : > { %v4519_v51 = vpop.eup %4518 }
 0x591   : > { %v2584_v41 = vmul.f32 %v4519_v51, %v2582_v49  ;;  %vm2589_vm8 = vweird.f32 %v4519_v51  ;;  %v4521_v59 = vpop.eup %4520 }
 0x592   : > { %vm2590_vm10 = vmor %vm2588_vm9, %vm2589_vm8 }
 0x593   : > { %v2585_v53 = vsub.f32 1.0, %v2584_v41 }
 0x595   : > { %v2586_v45 = vmul.f32 %v4519_v51, %v2585_v53 }
 0x597   : > { %v2587_v56 = vadd.f32 %v4519_v51, %v2586_v45 }
 0x599   : > { %v2591_v58 = vsel %vm2590_vm10, %v4519_v51, %v2587_v56 }
 0x59a   : > { %v2596_v60 = vsel %vm2593_vm11, %v2595_v57, %v2591_v58 }
 0x59b   : > { %v2598_v61 = vsel %vm6305_vm4, %v4521_v59, %v2596_v60 }
 0x59c   : > { %2604 = vrot.lane.b32.xlu2 %v2598_v61, %s4581_s11  ;;  %v2602_v1 = vmul.f32 %v2600_v0, %v2598_v61 }
 0x5f6   : > { %v2605_v62 = vpop.permute.xlu2 %2604 }
 0x5f7   : > { %v2607_v63 = vmul.f32 %v2605_v62, %v2598_v61 }
 0x5f9   : > { %2609 = vrot.lane.b32.xlu2 %v2607_v63, %s4582_s12 }
 0x653   : > { %v2610_v2 = vpop.permute.xlu2 %2609 }
 0x654   : > { %v2612_v3 = vadd.f32 %v2610_v2, %v2602_v1 }
 0x656   : > { %4522 = vtanh.f32 %v2612_v3  ;;  %v2667_v29 = vrot.slane %v2612_v3, 7 }
 0x65c   : > { %v4523_v4 = vpop.eup %4522 }
 0x65d   : > { %2615 = vrot.lane.b32.xlu0 %v4523_v4, %s4581_s11 }
 0x6cf   : > { %v2616_v5 = vpop.permute.xlu0 %2615 }
 0x6d0   : > { %v2618_v6 = vmul.f32 %v2616_v5, %v2598_v61 }
 0x6d2   : > { %v2619_v7 = vpack.c.bf16 %v2618_v6, %v2618_v6 }
 0x6d4   : > { %v2621_v8 = vshrl.u32 %v2619_v7, 16 }
 0x6d6   : > { %2623 = vrot.lane.b32.xlu1 %v2621_v8, %s4582_s12 }
 0x748   : > { %v2624_v9 = vpop.permute.xlu1 %2623 }
 0x749   : > { %4201 = vmatmul.msk.bf16.vlgmr.msrb.gmra.mxu3 %vm2461_vm0, %v2624_v9 }
 0x7cc   : > { %v2637_v10 = vpop.f32.mrf.mxu3 }
 0x7cd   : > { %v2642_v52 = vrot.slane %v2637_v10, 6 }
 0x7cf   : > { %v2644_v12 = vadd.f32 %v2642_v52, %v6302_v11 }
 0x7d1   : > { %v4202_v44 = vmul.f32 -1.442695, %v2644_v12 }
 0x7d3   : > { %4524 = vpow2.f32 %v4202_v44 }
 0x7d4   : > { %v2639_v47 = vpop.f32.mrf.mxu3 }
 0x7d9   : > { %v4525_v13 = vpop.eup %4524 }
 0x7da   : > { %v2649_v14 = vadd.f32 1.0, %v4525_v13 }
 0x7dc   : > { %4526 = vrcp.f32 %v2649_v14  ;;  %v2661_v17 = vand.u32 2147483648, %v2649_v14  ;;  %v2659_v19 = vand.u32 2147483647, %v2649_v14  ;;  %vm2655_vm13 = vweird.f32 %v2649_v14 }
 0x7dd   : > { %4528 = vtanh.f32 %v2644_v12 }
 0x7de   : > { %v2662_v21 = vor.u32 1.1754944e-38, %v2661_v17  ;;  %vm2660_vm15 = vcmp.eq.f32.partialorder %v2659_v19, 8.507059e+37 }
 0x7e2   : > { %v4527_v15 = vpop.eup %4526 }
 0x7e3   : > { %v2651_v50 = vmul.f32 %v4527_v15, %v2649_v14  ;;  %vm2656_vm12 = vweird.f32 %v4527_v15  ;;  %v4529_v24 = vpop.eup %4528 }
 0x7e4   : > { %vm2657_vm14 = vmor %vm2655_vm13, %vm2656_vm12 }
 0x7e5   : > { %v2652_v16 = vsub.f32 1.0, %v2651_v50 }
 0x7e7   : > { %v2653_v18 = vmul.f32 %v4527_v15, %v2652_v16 }
 0x7e9   : > { %v2654_v20 = vadd.f32 %v4527_v15, %v2653_v18 }
 0x7eb   : > { %v2658_v23 = vsel %vm2657_vm14, %v4527_v15, %v2654_v20 }
 0x7ec   : > { %v2663_v25 = vsel %vm2660_vm15, %v2662_v21, %v2658_v23 }
 0x7ed   : > { %v2665_v26 = vsel %vm6305_vm4, %v4529_v24, %v2663_v25 }
 0x7ee   : > { %2671 = vrot.lane.b32.xlu2 %v2665_v26, %s4581_s11  ;;  %v2669_v30 = vmul.f32 %v2667_v29, %v2665_v26 }
 0x848   : > { %v2672_v27 = vpop.permute.xlu2 %2671 }
 0x849   : > { %v2674_v28 = vmul.f32 %v2672_v27, %v2665_v26 }
 0x84b   : > { %2676 = vrot.lane.b32.xlu0 %v2674_v28, %s4582_s12 }
 0x8bd   : > { %v2677_v40 = vpop.permute.xlu0 %2676 }
 0x8be   : > { %v2679_v31 = vadd.f32 %v2677_v40, %v2669_v30 }
 0x8c0   : > { %4530 = vtanh.f32 %v2679_v31  ;;  %v2733_v0 = vrot.slane %v2679_v31, 7 }
 0x8c6   : > { %v4531_v32 = vpop.eup %4530 }
 0x8c7   : > { %2682 = vrot.lane.b32.xlu1 %v4531_v32, %s4581_s11 }
 0x939   : > { %v2683_v33 = vpop.permute.xlu1 %2682 }
 0x93a   : > { %v2685_v34 = vmul.f32 %v2683_v33, %v2665_v26 }
 0x93c   : > { %v2686_v35 = vpack.c.bf16 %v2685_v34, %v2685_v34 }
 0x93e   : > { %v2688_v36 = vrot.slane %v2686_v35, 1 }
 0x940   : > { %2689 = vrot.lane.b32.xlu2 %v2688_v36, %s4582_s12 }
 0x99a   : > { %v2690_v37 = vpop.permute.xlu2 %2689 }
 0x99b   : > { %4203 = vmatmul.msk.bf16.vlgmr.msrb.gmra.mxu0 %vm2461_vm0, %v2690_v37 }
 0xa18   : > { %v2703_v38 = vpop.f32.mrf.mxu0 }
 0xa19   : > { %v2708_v39 = vrot.slane %v2703_v38, 5 }
 0xa1b   : > { %v2710_v42 = vadd.f32 %v2708_v39, %v6302_v11 }
 0xa1d   : > { %v4204_v43 = vmul.f32 -1.442695, %v2710_v42 }
 0xa1f   : > { %4532 = vpow2.f32 %v4204_v43 }
 0xa20   : > { %v2705_v46 = vpop.f32.mrf.mxu0 }
 0xa25   : > { %v4533_v48 = vpop.eup %4532 }
 0xa26   : > { %v2715_v49 = vadd.f32 1.0, %v4533_v48 }
 0xa28   : > { %4534 = vrcp.f32 %v2715_v49  ;;  %v2727_v54 = vand.u32 2147483648, %v2715_v49  ;;  %v2725_v55 = vand.u32 2147483647, %v2715_v49  ;;  %vm2721_vm2 = vweird.f32 %v2715_v49 }
 0xa29   : > { %4536 = vtanh.f32 %v2710_v42 }
 0xa2a   : > { %v2728_v57 = vor.u32 1.1754944e-38, %v2727_v54  ;;  %vm2726_vm5 = vcmp.eq.f32.partialorder %v2725_v55, 8.507059e+37 }
 0xa2e   : > { %v4535_v51 = vpop.eup %4534 }
 0xa2f   : > { %v2717_v41 = vmul.f32 %v4535_v51, %v2715_v49  ;;  %vm2722_vm1 = vweird.f32 %v4535_v51  ;;  %v4537_v59 = vpop.eup %4536 }
 0xa30   : > { %vm2723_vm3 = vmor %vm2721_vm2, %vm2722_vm1 }
 0xa31   : > { %v2718_v53 = vsub.f32 1.0, %v2717_v41 }
 0xa33   : > { %v2719_v45 = vmul.f32 %v4535_v51, %v2718_v53 }
 0xa35   : > { %v2720_v56 = vadd.f32 %v4535_v51, %v2719_v45 }
 0xa37   : > { %v2724_v58 = vsel %vm2723_vm3, %v4535_v51, %v2720_v56 }
 0xa38   : > { %v2729_v60 = vsel %vm2726_vm5, %v2728_v57, %v2724_v58 }
 0xa39   : > { %v2731_v61 = vsel %vm6305_vm4, %v4537_v59, %v2729_v60 }
 0xa3a   : > { %2737 = vrot.lane.b32.xlu0 %v2731_v61, %s4581_s11  ;;  %v2735_v1 = vmul.f32 %v2733_v0, %v2731_v61 }
 0xaac   : > { %v2738_v62 = vpop.permute.xlu0 %2737 }
 0xaad   : > { %v2740_v63 = vmul.f32 %v2738_v62, %v2731_v61 }
 0xaaf   : > { %2742 = vrot.lane.b32.xlu1 %v2740_v63, %s4582_s12 }
 0xb21   : > { %v2743_v2 = vpop.permute.xlu1 %2742 }
 0xb22   : > { %v2745_v3 = vadd.f32 %v2743_v2, %v2735_v1 }
 0xb24   : > { %4538 = vtanh.f32 %v2745_v3  ;;  %v2801_v30 = vrot.slane %v2745_v3, 7 }
 0xb2a   : > { %v4539_v4 = vpop.eup %4538 }
 0xb2b   : > { %2748 = vrot.lane.b32.xlu2 %v4539_v4, %s4581_s11 }
 0xb85   : > { %v2749_v5 = vpop.permute.xlu2 %2748 }
 0xb86   : > { %v2751_v6 = vmul.f32 %v2749_v5, %v2731_v61 }
 0xb88   : > { %v2752_v7 = vpack.c.bf16 %v2751_v6, %v2751_v6 }
 0xb8a   : > { %v2754_v8 = vshrl.u32 %v2752_v7, 16 }
 0xb8c   : > { %v2756_v9 = vrot.slane %v2754_v8, 1 }
 0xb8e   : > { %2757 = vrot.lane.b32.xlu0 %v2756_v9, %s4582_s12 }
 0xc00   : > { %v2758_v10 = vpop.permute.xlu0 %2757 }
 0xc01   : > { %4205 = vmatmul.msk.bf16.vlgmr.msrb.gmra.mxu1 %vm2461_vm0, %v2758_v10 }
 0xc7e   : > { %v2771_v52 = vpop.f32.mrf.mxu1 }
 0xc7f   : > { %v2776_v12 = vrot.slane %v2771_v52, 4 }
 0xc81   : > { %v2778_v44 = vadd.f32 %v2776_v12, %v6302_v11 }
 0xc83   : > { %v4206_v47 = vmul.f32 -1.442695, %v2778_v44 }
 0xc85   : > { %4540 = vpow2.f32 %v4206_v47 }
 0xc86   : > { %v2773_v13 = vpop.f32.mrf.mxu1 }
 0xc8b   : > { %v4541_v14 = vpop.eup %4540 }
 0xc8c   : > { %v2783_v15 = vadd.f32 1.0, %v4541_v14 }
 0xc8e   : > { %4542 = vrcp.f32 %v2783_v15  ;;  %v2795_v18 = vand.u32 2147483648, %v2783_v15  ;;  %v2793_v20 = vand.u32 2147483647, %v2783_v15  ;;  %vm2789_vm7 = vweird.f32 %v2783_v15 }
 0xc8f   : > { %4544 = vtanh.f32 %v2778_v44 }
 0xc90   : > { %v2796_v23 = vor.u32 1.1754944e-38, %v2795_v18  ;;  %vm2794_vm9 = vcmp.eq.f32.partialorder %v2793_v20, 8.507059e+37 }
 0xc94   : > { %v4543_v50 = vpop.eup %4542 }
 0xc95   : > { %v2785_v16 = vmul.f32 %v4543_v50, %v2783_v15  ;;  %vm2790_vm6 = vweird.f32 %v4543_v50  ;;  %v4545_v25 = vpop.eup %4544 }
 0xc96   : > { %vm2791_vm8 = vmor %vm2789_vm7, %vm2790_vm6  ;;  %vm3038_vm7 = vcmask 7175  }
 0xc97   : > { %v2786_v17 = vsub.f32 1.0, %v2785_v16 }
 0xc99   : > { %v2787_v19 = vmul.f32 %v4543_v50, %v2786_v17 }
 0xc9b   : > { %v2788_v21 = vadd.f32 %v4543_v50, %v2787_v19 }
 0xc9d   : > { %v2792_v24 = vsel %vm2791_vm8, %v4543_v50, %v2788_v21 }
 0xc9e   : > { %v2797_v26 = vsel %vm2794_vm9, %v2796_v23, %v2792_v24 }
 0xc9f   : > { %v2799_v27 = vsel %vm6305_vm4, %v4545_v25, %v2797_v26 }
 0xca0   : > { %2805 = vrot.lane.b32.xlu1 %v2799_v27, %s4581_s11  ;;  %v2803_v40 = vmul.f32 %v2801_v30, %v2799_v27 }
 0xd12   : > { %v2806_v28 = vpop.permute.xlu1 %2805 }
 0xd13   : > { %v2808_v29 = vmul.f32 %v2806_v28, %v2799_v27 }
 0xd15   : > { %2810 = vrot.lane.b32.xlu2 %v2808_v29, %s4582_s12 }
 0xd6f   : > { %v2811_v31 = vpop.permute.xlu2 %2810 }
 0xd70   : > { %v2813_v32 = vadd.f32 %v2811_v31, %v2803_v40 }
 0xd72   : > { %4546 = vtanh.f32 %v2813_v32  ;;  %v2867_v1 = vrot.slane %v2813_v32, 7 }
 0xd78   : > { %v4547_v33 = vpop.eup %4546 }
 0xd79   : > { %2816 = vrot.lane.b32.xlu0 %v4547_v33, %s4581_s11 }
 0xdeb   : > { %v2817_v34 = vpop.permute.xlu0 %2816 }
 0xdec   : > { %v2819_v35 = vmul.f32 %v2817_v34, %v2799_v27 }
 0xdee   : > { %v2820_v36 = vpack.c.bf16 %v2819_v35, %v2819_v35 }
 0xdf0   : > { %v2822_v37 = vrot.slane %v2820_v36, 2 }
 0xdf2   : > { %2823 = vrot.lane.b32.xlu1 %v2822_v37, %s4582_s12 }
 0xe64   : > { %v2824_v38 = vpop.permute.xlu1 %2823 }
 0xe65   : > { %4207 = vmatmul.msk.bf16.vlgmr.msra.gmra.mxu2 %vm2461_vm0, %v2824_v38 }
 0xee8   : > { %v2837_v39 = vpop.f32.mrf.mxu2 }
 0xee9   : > { %v2842_v42 = vrot.slane %v2837_v39, 3 }
 0xeeb   : > { %v2844_v43 = vadd.f32 %v2842_v42, %v6302_v11 }
 0xeed   : > { %v4208_v46 = vmul.f32 -1.442695, %v2844_v43 }
 0xeef   : > { %4548 = vpow2.f32 %v4208_v46 }
 0xef0   : > { %v2839_v48 = vpop.f32.mrf.mxu2 }
 0xef5   : > { %v4549_v49 = vpop.eup %4548 }
 0xef6   : > { %v2849_v51 = vadd.f32 1.0, %v4549_v49 }
 0xef8   : > { %4550 = vrcp.f32 %v2849_v51  ;;  %v2861_v45 = vand.u32 2147483648, %v2849_v51  ;;  %v2859_v56 = vand.u32 2147483647, %v2849_v51  ;;  %vm2855_vm11 = vweird.f32 %v2849_v51 }
 0xef9   : > { %4552 = vtanh.f32 %v2844_v43 }
 0xefa   : > { %v2862_v58 = vor.u32 1.1754944e-38, %v2861_v45  ;;  %vm2860_vm13 = vcmp.eq.f32.partialorder %v2859_v56, 8.507059e+37 }
 0xefe   : > { %v4551_v41 = vpop.eup %4550 }
 0xeff   : > { %v2851_v53 = vmul.f32 %v4551_v41, %v2849_v51  ;;  %vm2856_vm10 = vweird.f32 %v4551_v41  ;;  %v4553_v60 = vpop.eup %4552 }
 0xf00   : > { %vm2857_vm12 = vmor %vm2855_vm11, %vm2856_vm10 }
 0xf01   : > { %v2852_v54 = vsub.f32 1.0, %v2851_v53 }
 0xf03   : > { %v2853_v55 = vmul.f32 %v4551_v41, %v2852_v54 }
 0xf05   : > { %v2854_v57 = vadd.f32 %v4551_v41, %v2853_v55 }
 0xf07   : > { %v2858_v59 = vsel %vm2857_vm12, %v4551_v41, %v2854_v57 }
 0xf08   : > { %v2863_v61 = vsel %vm2860_vm13, %v2862_v58, %v2858_v59 }
 0xf09   : > { %v2865_v62 = vsel %vm6305_vm4, %v4553_v60, %v2863_v61 }
 0xf0a   : > { %2871 = vrot.lane.b32.xlu2 %v2865_v62, %s4581_s11  ;;  %v2869_v2 = vmul.f32 %v2867_v1, %v2865_v62  ;;  %v4506_v1 = vld [vmem:[%s6390_s6 + $0x8] ss:$0 sm:$0xff] }
 0xf64   : > { %v2872_v63 = vpop.permute.xlu2 %2871 }
 0xf65   : > { %v2874_v0 = vmul.f32 %v2872_v63, %v2865_v62 }
 0xf67   : > { %2876 = vrot.lane.b32.xlu0 %v2874_v0, %s4582_s12 }
 0xfd9   : > { %v2877_v3 = vpop.permute.xlu0 %2876 }
 0xfda   : > { %v2879_v4 = vadd.f32 %v2877_v3, %v2869_v2 }
 0xfdc   : > { %4554 = vtanh.f32 %v2879_v4  ;;  %v2935_v40 = vrot.slane %v2879_v4, 7 }
 0xfe2   : > { %v4555_v5 = vpop.eup %4554 }
 0xfe3   : > { %2882 = vrot.lane.b32.xlu1 %v4555_v5, %s4581_s11 }
0x1055   : > { %v2883_v6 = vpop.permute.xlu1 %2882 }
0x1056   : > { %v2885_v7 = vmul.f32 %v2883_v6, %v2865_v62 }
0x1058   : > { %v2886_v8 = vpack.c.bf16 %v2885_v7, %v2885_v7 }
0x105a   : > { %v2888_v9 = vshrl.u32 %v2886_v8, 16 }
0x105c   : > { %v2890_v10 = vrot.slane %v2888_v9, 2 }
0x105e   : > { %2891 = vrot.lane.b32.xlu2 %v2890_v10, %s4582_s12 }
0x10b8   : > { %v2892_v52 = vpop.permute.xlu2 %2891 }
0x10b9   : > { %4209 = vmatmul.msk.bf16.vlgmr.msra.gmra.mxu3 %vm2461_vm0, %v2892_v52 }
0x113c   : > { %v2905_v12 = vpop.f32.mrf.mxu3 }
0x113d   : > { %v2910_v44 = vrot.slane %v2905_v12, 2  ;;  %v4507_v12 = vld [vmem:[%s6390_s6 + $0x9] ss:$0 sm:$0xff] }
0x113f   : > { %v2912_v47 = vadd.f32 %v2910_v44, %v6302_v11 }
0x1141   : > { %v4210_v13 = vmul.f32 -1.442695, %v2912_v47 }
0x1143   : > { %4556 = vpow2.f32 %v4210_v13 }
0x1144   : > { %v2907_v14 = vpop.f32.mrf.mxu3 }
0x1149   : > { %v4557_v15 = vpop.eup %4556 }
0x114a   : > { %v2917_v50 = vadd.f32 1.0, %v4557_v15 }
0x114c   : > { %4558 = vrcp.f32 %v2917_v50  ;;  %v2929_v19 = vand.u32 2147483648, %v2917_v50  ;;  %v2927_v21 = vand.u32 2147483647, %v2917_v50  ;;  %vm2923_vm15 = vweird.f32 %v2917_v50 }
0x114d   : > { %4560 = vtanh.f32 %v2912_v47 }
0x114e   : > { %v2930_v24 = vor.u32 1.1754944e-38, %v2929_v19  ;;  %vm2928_vm2 = vcmp.eq.f32.partialorder %v2927_v21, 8.507059e+37 }
0x1152   : > { %v4559_v16 = vpop.eup %4558 }
0x1153   : > { %v2919_v17 = vmul.f32 %v4559_v16, %v2917_v50  ;;  %vm2924_vm14 = vweird.f32 %v4559_v16  ;;  %v4561_v26 = vpop.eup %4560 }
0x1154   : > { %vm2925_vm1 = vmor %vm2923_vm15, %vm2924_vm14 }
0x1155   : > { %v2920_v18 = vsub.f32 1.0, %v2919_v17 }
0x1157   : > { %v2921_v20 = vmul.f32 %v4559_v16, %v2920_v18 }
0x1159   : > { %v2922_v23 = vadd.f32 %v4559_v16, %v2921_v20 }
0x115b   : > { %v2926_v25 = vsel %vm2925_vm1, %v4559_v16, %v2922_v23 }
0x115c   : > { %v2931_v27 = vsel %vm2928_vm2, %v2930_v24, %v2926_v25 }
0x115d   : > { %v2933_v28 = vsel %vm6305_vm4, %v4561_v26, %v2931_v27 }
0x115e   : > { %2939 = vrot.lane.b32.xlu0 %v2933_v28, %s4581_s11  ;;  %v2937_v31 = vmul.f32 %v2935_v40, %v2933_v28 }
0x11d0   : > { %v2940_v29 = vpop.permute.xlu0 %2939 }
0x11d1   : > { %v2942_v30 = vmul.f32 %v2940_v29, %v2933_v28 }
0x11d3   : > { %2944 = vrot.lane.b32.xlu1 %v2942_v30, %s4582_s12 }
0x1245   : > { %v2945_v32 = vpop.permute.xlu1 %2944 }
0x1246   : > { %v2947_v33 = vadd.f32 %v2945_v32, %v2937_v31 }
0x1248   : > { %4562 = vtanh.f32 %v2947_v33  ;;  %v3001_v2 = vrot.slane %v2947_v33, 7 }
0x124e   : > { %v4563_v34 = vpop.eup %4562 }
0x124f   : > { %2950 = vrot.lane.b32.xlu2 %v4563_v34, %s4581_s11 }
0x12a9   : > { %v2951_v35 = vpop.permute.xlu2 %2950 }
0x12aa   : > { %v2953_v36 = vmul.f32 %v2951_v35, %v2933_v28 }
0x12ac   : > { %v2954_v37 = vpack.c.bf16 %v2953_v36, %v2953_v36 }
0x12ae   : > { %v2956_v38 = vrot.slane %v2954_v37, 3 }
0x12b0   : > { %2957 = vrot.lane.b32.xlu0 %v2956_v38, %s4582_s12 }
0x1322   : > { %v2958_v39 = vpop.permute.xlu0 %2957 }
0x1323   : > { %4211 = vmatmul.msk.bf16.vlgmr.msra.gmra.mxu0 %vm2461_vm0, %v2958_v39 }
0x13a0   : > { %v2971_v42 = vpop.f32.mrf.mxu0 }
0x13a1   : > { %v2976_v43 = vrot.slane %v2971_v42, 1 }
0x13a3   : > { %v2978_v46 = vadd.f32 %v2976_v43, %v6302_v11 }
0x13a5   : > { %v4212_v48 = vmul.f32 -1.442695, %v2978_v46 }
0x13a7   : > { %4564 = vpow2.f32 %v4212_v48 }
0x13a8   : > { %v2973_v49 = vpop.f32.mrf.mxu0 }
0x13ad   : > { %v4565_v51 = vpop.eup %4564 }
0x13ae   : > { %v2983_v41 = vadd.f32 1.0, %v4565_v51 }
0x13b0   : > { %4566 = vrcp.f32 %v2983_v41  ;;  %v2995_v55 = vand.u32 2147483648, %v2983_v41  ;;  %v2993_v57 = vand.u32 2147483647, %v2983_v41  ;;  %vm2989_vm0 = vweird.f32 %v2983_v41 }
0x13b1   : > { %4568 = vtanh.f32 %v2978_v46 }
0x13b2   : > { %v2996_v59 = vor.u32 1.1754944e-38, %v2995_v55  ;;  %vm2994_vm6 = vcmp.eq.f32.partialorder %v2993_v57, 8.507059e+37 }
0x13b6   : > { %v4567_v53 = vpop.eup %4566 }
0x13b7   : > { %v2985_v54 = vmul.f32 %v4567_v53, %v2983_v41  ;;  %vm2990_vm3 = vweird.f32 %v4567_v53  ;;  %v4569_v11 = vpop.eup %4568 }
0x13b8   : > { %vm2991_vm5 = vmor %vm2989_vm0, %vm2990_vm3 }
0x13b9   : > { %v2986_v45 = vsub.f32 1.0, %v2985_v54 }
0x13bb   : > { %v2987_v56 = vmul.f32 %v4567_v53, %v2986_v45 }
0x13bd   : > { %v2988_v58 = vadd.f32 %v4567_v53, %v2987_v56 }
0x13bf   : > { %v2992_v60 = vsel %vm2991_vm5, %v4567_v53, %v2988_v58 }
0x13c0   : > { %v2997_v61 = vsel %vm2994_vm6, %v2996_v59, %v2992_v60 }
0x13c1   : > { %v2999_v62 = vsel %vm6305_vm4, %v4569_v11, %v2997_v61  ;;  %vm3030_vm4 = vcmask 261127  }
0x13c2   : > { %3005 = vrot.lane.b32.xlu1 %v2999_v62, %s4581_s11  ;;  %v3003_v3 = vmul.f32 %v3001_v2, %v2999_v62 }
0x13ca   : > { %3022 = vrot.lane.b32.xlu1 %v4506_v1, %s4583_s23 }
0x1434   : > { %v3006_v63 = vpop.permute.xlu1 %3005 }
0x1435   : > { %v3008_v0 = vmul.f32 %v3006_v63, %v2999_v62 }
0x1437   : > { %3010 = vrot.lane.b32.xlu2 %v3008_v0, %s4582_s12 }
0x143c   : > { %v3023_v7 = vpop.permute.xlu1 %3022 }
0x1491   : > { %v3011_v4 = vpop.permute.xlu2 %3010 }
0x1492   : > { %v3013_v5 = vadd.f32 %v3011_v4, %v3003_v3 }
0x1494   : > { %4570 = vtanh.f32 %v3013_v5 }
0x149a   : > { %v4571_v22 = vpop.eup %4570 }
0x149b   : > { %3016 = vrot.lane.b32.xlu0 %v4571_v22, %s4581_s11 }
0x150d   : > { %v3017_v6 = vpop.permute.xlu0 %3016 }
0x150e   : > { %v3019_v8 = vmul.f32 %v3017_v6, %v2999_v62 }
0x1510   : > { %v3025_v9 = vmul.f32 %v3023_v7, %v3019_v8 }
0x1512   : > { %3027 = vrot.lane.b32.xlu2 %v3025_v9, %s4582_s12 }
0x156c   : > { %v3028_v10 = vpop.permute.xlu2 %3027 }
0x156d   : > { %v3031_v52 = vsel %vm3030_vm4, %v3028_v10, 0.0 }
0x156e   : > { %3032 = vadd.xlane.f32.xlu0 %v3031_v52 }
0x15e1   : > { %v3033_v44 = vpop.xlane.xlu0 %3032 }
0x15e2   : > { %v3037_v47 = vadd.f32 %v4507_v12, %v3033_v44 }
0x15e4   : > { %3039 = vst.msk [vmem:[%s274_s19 - $0x7] sm:$0x80] %vm3038_vm7, %v3037_v47 }
0x15e5 PF: > { %s17_s24 = sadd.s32 1, %s4578_s24  }
0x15e6   : > { %p14_p4 = scmp.ge.s32.totalorder %s17_s24, 4  }
0x15e8   :  { %16 = sbr.rel (!%p14_p4) target bundleno = 1 (0x1), region = 78 }

</bundles_post_ra>
